<compile_context>
chip_gen: v5e
topology: v5e:2x2
jax: 0.10.0
libtpu: 0.0.40
codegen_flags: <defaults>
</compile_context>

<pallas_src>
import functools

import jax
import jax.numpy as jnp
from jax.experimental import pallas as pl
from jax.experimental.pallas import tpu as pltpu


# ----------------------------------------------------------------------------
# Fused kernel: one Do-slab of the output per grid step, all in VMEM.
# ----------------------------------------------------------------------------
def _fused_resample_kernel(wz_ref, p_ref, wyx_ref, o_ref):
    """wz_ref : [Dt, D]           z-axis 2-tap weights for this output slab
    p_ref  : [D, H*W*C]         whole parameter grid, features-last
    wyx_ref: [H*W*C, Ho*Wo*C]   (Wy ⊗ Wx ⊗ I_C)^T  (y & x taps folded)
    o_ref  : [Dt, Ho*Wo*C]      lane-dense output slab
    """
    # Contract D, then H and W jointly — two plain MXU matmuls.
    t1 = jnp.dot(
        wz_ref[...],
        p_ref[...],
        preferred_element_type=jnp.float32,
        precision=jax.lax.Precision.HIGHEST,
    )
    o_ref[...] = jnp.dot(
        t1,
        wyx_ref[...],
        preferred_element_type=jnp.float32,
        precision=jax.lax.Precision.HIGHEST,
    ).astype(o_ref.dtype)


# ----------------------------------------------------------------------------
# Per-axis 2-tap interpolation weights
# (grid_sample: mode='bilinear', align_corners=True, padding_mode='zeros')
# ----------------------------------------------------------------------------
def _make_interp_matrix(coords_1d, src_size):
    """coords in [-1, 1] -> [len(coords), src_size] 2-tap weight matrix."""
    coords_1d = coords_1d.astype(jnp.float32)
    f = (coords_1d + 1.0) * 0.5 * (src_size - 1)          # align_corners=True
    i0 = jnp.floor(f)
    i1 = i0 + 1.0
    w1 = f - i0
    w0 = 1.0 - w1
    idx = jnp.arange(src_size, dtype=jnp.float32)
    # out-of-range corner indices match no column -> zero padding
    m0 = (i0[:, None] == idx[None, :]).astype(jnp.float32) * w0[:, None]
    m1 = (i1[:, None] == idx[None, :]).astype(jnp.float32) * w1[:, None]
    return m0 + m1


def _pick_do_block(do):
    # >=2 grid steps on the 'parallel' axis so both v7x TensorCores get work,
    # while keeping the block's sublane dim a multiple of 8 (or full extent).
    # By construction the chosen block always divides do evenly (no padded
    # edge blocks, no garbage accumulation).
    if do % 2 == 0 and (do // 2) % 8 == 0:
        return do // 2
    return do


# ----------------------------------------------------------------------------
# Forward pass (jitted; Wz/Wy/Wx and the folded kron constant-fold under jit)
# ----------------------------------------------------------------------------
@functools.partial(jax.jit, static_argnames=("out_spatial",))
def grid_resampling_forward(param, out_spatial):
    """param: [D, H, W, C] float32 (the module's features-last Parameter);
    out_spatial: static (Do, Ho, Wo) regular query mesh.
    Returns [Do, Ho, Wo, C] float32 — exactly what forward() returns."""
    D, H, W, C = param.shape
    Do, Ho, Wo = out_spatial

    # mesh.get_rescaled_coord_mesh(lb=-1, ub=1) for a regular mesh, per axis.
    wz = _make_interp_matrix(jnp.linspace(-1.0, 1.0, Do), D)   # [Do, D]
    wy = _make_interp_matrix(jnp.linspace(-1.0, 1.0, Ho), H)   # [Ho, H]
    wx = _make_interp_matrix(jnp.linspace(-1.0, 1.0, Wo), W)   # [Wo, W]

    # Fold the y & x taps (and identity over C) into one constant:
    #   wyx_t[h*W*C + w*C + c, ho*Wo*C + wo*C + c'] = Wy[ho,h]*Wx[wo,w]*δ(c,c')
    # TODO(synk): for large rep/query meshes this folded constant grows as
    # (H*W*C)*(Ho*Wo*C); switch to three separable (batched) contractions
    # tiled over Do/Ho and budget VMEM <= ~48 MiB on v7x for that path.
    wyx_t = jnp.kron(wy, jnp.kron(wx, jnp.eye(C, dtype=jnp.float32))).T

    p2 = param.reshape(D, H * W * C).astype(jnp.float32)       # free reshape

    dt = _pick_do_block(Do)
    n_lanes = Ho * Wo * C

    out2d = pl.pallas_call(
        _fused_resample_kernel,
        out_shape=jax.ShapeDtypeStruct((Do, n_lanes), jnp.float32),
        grid=(Do // dt,),
        in_specs=[
            pl.BlockSpec((dt, D), lambda i: (i, 0)),               # Wz slab
            pl.BlockSpec((D, H * W * C), lambda i: (0, 0)),        # param (resident)
            pl.BlockSpec((H * W * C, n_lanes), lambda i: (0, 0)),  # folded y/x taps
        ],
        out_specs=pl.BlockSpec((dt, n_lanes), lambda i: (i, 0)),
        compiler_params=pltpu.CompilerParams(
            dimension_semantics=("parallel",),
        ),
    )(wz, p2, wyx_t)

    # [Do, Ho*Wo*C] is row-major identical to [Do, Ho, Wo, C] -> free reshape.
    return out2d.reshape(Do, Ho, Wo, C)


# ----------------------------------------------------------------------------
# Pure-JAX reference: direct trilinear grid_sample (8-corner gather)
# ----------------------------------------------------------------------------
def ref_grid_sample_3d(param, out_spatial):
    D, H, W, C = param.shape
    Do, Ho, Wo = out_spatial
    gz = jnp.linspace(-1.0, 1.0, Do)
    gy = jnp.linspace(-1.0, 1.0, Ho)
    gx = jnp.linspace(-1.0, 1.0, Wo)
    zz, yy, xx = jnp.meshgrid(gz, gy, gx, indexing="ij")
    fz = (zz + 1.0) * 0.5 * (D - 1)
    fy = (yy + 1.0) * 0.5 * (H - 1)
    fx = (xx + 1.0) * 0.5 * (W - 1)

    def corners(f):
        i0 = jnp.floor(f).astype(jnp.int32)
        i1 = i0 + 1
        w1 = f - i0.astype(f.dtype)
        w0 = 1.0 - w1
        return ((i0, w0), (i1, w1))

    acc = jnp.zeros((Do, Ho, Wo, C), jnp.float32)
    for iz, wz_ in corners(fz):
        for iy, wy_ in corners(fy):
            for ix, wx_ in corners(fx):
                valid = (
                    (iz >= 0) & (iz < D)
                    & (iy >= 0) & (iy < H)
                    & (ix >= 0) & (ix < W)
                )
                izc = jnp.clip(iz, 0, D - 1)
                iyc = jnp.clip(iy, 0, H - 1)
                ixc = jnp.clip(ix, 0, W - 1)
                v = param[izc, iyc, ixc]                       # [Do,Ho,Wo,C]
                w = (wz_ * wy_ * wx_ * valid.astype(jnp.float32))[..., None]
                acc = acc + w * v
    return acc


if __name__ == "__main__":
    # rep_mesh.matrix_size = (8, 8, 8), out_features = 4  -> param [8,8,8,4]
    # query mesh (forward arg)                            -> (16, 16, 16)
    key = jax.random.PRNGKey(0)
    D, H, W, C = 8, 8, 8, 4
    out_spatial = (16, 16, 16)
    param = jax.random.normal(key, (D, H, W, C), dtype=jnp.float32)  # randn init

    out = grid_resampling_forward(param, out_spatial)
    out = jax.block_until_ready(out)
    assert out.shape == (*out_spatial, C) and out.dtype == jnp.float32

    ref = jax.block_until_ready(ref_grid_sample_3d(param, out_spatial))
    max_err = float(jnp.max(jnp.abs(out - ref)))
    assert max_err < 1e-5, f"mismatch vs reference grid_sample: {max_err}"

    # TODO(synk): non-regular (sliced / irregular) SliceableMesh query coords
    # are not separable; they would need a per-point gather path instead of
    # the per-axis weight factorization used here.
    print("KERNEL_OK")
</pallas_src>

<mosaic_0001>
module attributes {stable_mosaic.version = 11 : i64} {
  func.func @_fused_resample_kernel(%arg0: i32, %arg1: memref<8x8xf32, #tpu.memory_space<vmem>>, %arg2: memref<8x256xf32, #tpu.memory_space<vmem>>, %arg3: memref<256x1024xf32, #tpu.memory_space<vmem>>, %arg4: memref<8x1024xf32, #tpu.memory_space<vmem>>) attributes {dimension_semantics = [#tpu.dimension_semantics<parallel>], iteration_bounds = array<i64: 2>, scalar_prefetch = 0 : i64, scratch_operands = 0 : i64, tpu.core_type = #tpu.core_type<tc>, window_params = [{transform_indices = @transform_0, window_bounds = array<i64: 8, 8>}, {pipeline_mode = #tpu.pipeline_mode<synchronous>, transform_indices = @transform_1, window_bounds = array<i64: 8, 256>}, {pipeline_mode = #tpu.pipeline_mode<synchronous>, transform_indices = @transform_2, window_bounds = array<i64: 256, 1024>}, {transform_indices = @transform_3, window_bounds = array<i64: 8, 1024>}]} {
    %c0 = arith.constant 0 : index
    %c0_0 = arith.constant 0 : index
    %0 = vector.load %arg1[%c0, %c0_0] : memref<8x8xf32, #tpu.memory_space<vmem>>, vector<8x8xf32>
    %c0_1 = arith.constant 0 : index
    %c0_2 = arith.constant 0 : index
    %1 = vector.load %arg2[%c0_1, %c0_2] : memref<8x256xf32, #tpu.memory_space<vmem>>, vector<8x256xf32>
    %cst = arith.constant dense<0.000000e+00> : vector<8x256xf32>
    %2 = tpu.matmul %0, %1, %cst {dimension_numbers = #tpu.dot_dimension_numbers<[1], [0], [0], [1], [0, 0, 1, 1], [], []>, precision = #tpu.contract_precision<fp32>} : vector<8x8xf32>, vector<8x256xf32>, vector<8x256xf32> -> vector<8x256xf32>
    %c0_3 = arith.constant 0 : index
    %c0_4 = arith.constant 0 : index
    %3 = vector.load %arg3[%c0_3, %c0_4] : memref<256x1024xf32, #tpu.memory_space<vmem>>, vector<256x1024xf32>
    %cst_5 = arith.constant dense<0.000000e+00> : vector<8x1024xf32>
    %4 = tpu.matmul %2, %3, %cst_5 {dimension_numbers = #tpu.dot_dimension_numbers<[1], [0], [0], [1], [0, 0, 1, 1], [], []>, precision = #tpu.contract_precision<fp32>} : vector<8x256xf32>, vector<256x1024xf32>, vector<8x1024xf32> -> vector<8x1024xf32>
    %c0_6 = arith.constant 0 : index
    %c0_7 = arith.constant 0 : index
    %5 = vector.load %arg4[%c0_6, %c0_7] : memref<8x1024xf32, #tpu.memory_space<vmem>>, vector<8x1024xf32>
    tpu.vector_store %arg4[%c0_6, %c0_7], %4 {strides = array<i32>} : memref<8x1024xf32, #tpu.memory_space<vmem>>, vector<8x1024xf32>,
    return
  }
  func.func @transform_0(%arg0: i32) -> (i32, i32) {
    %c0_i32 = arith.constant 0 : i32
    %c0_i32_0 = arith.constant 0 : i32
    return %arg0, %c0_i32 : i32, i32
  }
  func.func @transform_1(%arg0: i32) -> (i32, i32) {
    %c0_i32 = arith.constant 0 : i32
    %c0_i32_0 = arith.constant 0 : i32
    %c0_i32_1 = arith.constant 0 : i32
    return %c0_i32, %c0_i32_0 : i32, i32
  }
  func.func @transform_2(%arg0: i32) -> (i32, i32) {
    %c0_i32 = arith.constant 0 : i32
    %c0_i32_0 = arith.constant 0 : i32
    %c0_i32_1 = arith.constant 0 : i32
    return %c0_i32, %c0_i32_0 : i32, i32
  }
  func.func @transform_3(%arg0: i32) -> (i32, i32) {
    %c0_i32 = arith.constant 0 : i32
    %c0_i32_0 = arith.constant 0 : i32
    return %arg0, %c0_i32 : i32, i32
  }
}

</mosaic_0001>

<bundles_post_ra>
// kernel: grid_resampling_forward.1
= control target key start
LH: loop header
LB: loop body
LE: loop exit
PB: predicated region body
PF: predicated region fallthrough
CT: control target
= control target key end

     0   :  { %s6289_s12 = smov 0   ;;  %s11074_s0 = inlined_call_operand.vmem [shape: f32[16,8], index: 0, kind: input, shape index: {}]   ;;  %s11075_s1 = inlined_call_operand.vmem [shape: f32[8,256], index: 1, kind: input, shape index: {}]   ;;  %s11076_s2 = inlined_call_operand.vmem [shape: f32[256,1024], index: 2, kind: input, shape index: {}]   ;;  %s11077_s3 = inlined_call_operand.vmem [shape: f32[16,1024], index: 3, kind: output, shape index: {}]  }
   0x1 LB: > { %s6242_s13 = sadd.s32 4294967295, %s6267_s12   ;;  %p6246_p0 = scmp.ge.s32.totalorder %s6267_s12, 1  ;;  %s6267_s12 = sphi %s6289_s12, %s13_s12  }
   0x2   : > { %p136_p1 = scmp.lt.s32.totalorder %s6267_s12, 3 }
   0x4   : > { %p137_p2 = pnand %p6246_p0, %p136_p1 }
   0x6   : > { %140 = sbr.rel (%p137_p2) target bundleno = 1061 (0x425), region = 32 }
   0xb   : > { %v169_v0 = vld [vmem:[%s11075_s1] sm:$0xff]  ;;  %p159_p3 = scmp.lt.s32.totalorder %s6242_s13, 1  ;;  %v170_v1 = vld [vmem:[%s11075_s1 + $0x8] sm:$0xff]  ;;  %vm171_vm0 = vcmask 64512  }
   0xc   : > { %v190_v2 = vand.u32 4294901760, %v169_v0  ;;  %v336_v3 = vand.u32 4294901760, %v170_v1  ;;  %v587_v4 = vld [vmem:[%s11076_s2 + $0x3c0] sm:$0xff] }
   0xd   : > { %s11566_s13 = smov (!%p159_p3, %s6242_s13), 1  ;;  %v579_v5 = vld [vmem:[%s11076_s2 + $0x380] sm:$0xff]  ;;  %v6314_v9 = vand.u32 4294901760, %v587_v4 }
   0xe   : > { %v571_v6 = vld [vmem:[%s11076_s2 + $0x340] sm:$0xff]  ;;  %v217_v7 = vsub.f32 %v169_v0, %v190_v2  ;;  %267 = vmatpush.msra.mxu3 %v190_v2  ;;  %191 = vmatpush.msra.mxu0 %v190_v2  ;;  %v363_v8 = vsub.f32 %v170_v1, %v336_v3  ;;  %v6316_v10 = vand.u32 4294901760, %v579_v5  ;;  %s6247_s26 = sshll.u32 %s11566_s13, 3  ;;  %s6252_s25 = sshll.u32 %s11566_s13, 6 }
   0xf   : > { %v563_v11 = vld [vmem:[%s11076_s2 + $0x300] sm:$0xff]  ;;  %s162_s29 = scalar_lea.vmem %s11074_s0, %s6247_s26  ;;  %v6326_v14 = vsub.f32 %v587_v4, %v6314_v9  ;;  %v6328_v15 = vand.u32 4294901760, %v571_v6  ;;  %s7863_s4 = scalar_lea.vmem %s11077_s3, %s6252_s25 }
  0x10   : > { %244 = vmatpush.msra.mxu2 %v217_v7  ;;  %v218_v12 = vand.u32 4294901760, %v217_v7  ;;  %v364_v13 = vand.u32 4294901760, %v363_v8  ;;  %v555_v16 = vld [vmem:[%s11076_s2 + $0x2c0] sm:$0xff]  ;;  %v6333_v18 = vand.u32 4294901760, %v563_v11  ;;  %v6336_v22 = vsub.f32 %v579_v5, %v6316_v10 }
  0x11   : > { %v168_v17 = vld [vmem:[%s162_s29] sm:$0xff]  ;;  %v6340_v24 = vand.u32 4294901760, %v555_v16  ;;  %v766_v28 = vand.u32 4294901760, %v6326_v14  ;;  %v6347_v29 = vsub.f32 %v571_v6, %v6328_v15 }
  0x12   : > { %337 = vmatpush.msrb.mxu2 %v336_v3  ;;  %v173_v19 = vsel %vm171_vm0, %v168_v17, 0  ;;  %v219_v20 = vsub.f32 %v217_v7, %v218_v12  ;;  %293 = vmatpush.msrb.mxu0 %v218_v12  ;;  %v365_v21 = vsub.f32 %v363_v8, %v364_v13  ;;  %v547_v25 = vld [vmem:[%s11076_s2 + $0x280] sm:$0xff]  ;;  %v772_v32 = vand.u32 4294901760, %v6336_v22 }
  0x13   : > { %v6338_v23 = vand.u32 4294901760, %v173_v19  ;;  %v539_v31 = vld [vmem:[%s11076_s2 + $0x240] sm:$0xff]  ;;  %v6357_v33 = vsub.f32 %v563_v11, %v6333_v18  ;;  %v6359_v34 = vand.u32 4294901760, %v547_v25  ;;  %v767_v36 = vsub.f32 %v6326_v14, %v766_v28 }
  0x14   : > { %v220_v26 = vand.u32 4294901760, %v219_v20  ;;  %v366_v27 = vand.u32 4294901760, %v365_v21  ;;  %v778_v37 = vand.u32 4294901760, %v6347_v29  ;;  %v6371_v38 = vsub.f32 %v555_v16, %v6340_v24  ;;  %v531_v40 = vld [vmem:[%s11076_s2 + $0x200] sm:$0xff] }
  0x15   : > { %v6350_v30 = vsub.f32 %v173_v19, %v6338_v23  ;;  %v6373_v39 = vand.u32 4294901760, %v539_v31  ;;  %v773_v42 = vsub.f32 %v6336_v22, %v772_v32  ;;  %v784_v43 = vand.u32 4294901760, %v6357_v33  ;;  %v523_v45 = vld [vmem:[%s11076_s2 + $0x1c0] sm:$0xff] }
  0x16   : > { %221 = vmatpush.msra.mxu1 %v220_v26  ;;  %367 = vmatpush.msrb.mxu3 %v366_v27  ;;  %v6386_v44 = vsub.f32 %v547_v25, %v6359_v34  ;;  %v6391_v47 = vand.u32 4294901760, %v531_v40  ;;  %v768_v48 = vand.u32 4294901760, %v767_v36  ;;  %v779_v49 = vsub.f32 %v6347_v29, %v778_v37  ;;  %v515_v52 = vld [vmem:[%s11076_s2 + $0x180] sm:$0xff] }
  0x17   : > { %247 = vmatmul.f32.vlgmr.msra.gmra.mxu2 %v6350_v30  ;;  %v6363_v35 = vand.u32 4294901760, %v6350_v30  ;;  %223 = vmatmul.f32.vlgmr.msra.gmra.mxu1 %v6338_v23  ;;  %v790_v50 = vand.u32 4294901760, %v6371_v38  ;;  %v6398_v51 = vsub.f32 %v539_v31, %v6373_v39  ;;  %v6403_v53 = vand.u32 4294901760, %v523_v45  ;;  %v507_v57 = vld [vmem:[%s11076_s2 + $0x140] sm:$0xff] }
  0x18   : > { %315 = vmatpush.msrb.mxu1 %v190_v2  ;;  %439 = vmatpush.msra.mxu2 %v364_v13  ;;  %v774_v54 = vand.u32 4294901760, %v773_v42  ;;  %v785_v55 = vsub.f32 %v6357_v33, %v784_v43  ;;  %v796_v56 = vand.u32 4294901760, %v6386_v44  ;;  %v6414_v58 = vsub.f32 %v531_v40, %v6391_v47  ;;  %v499_v60 = vld [vmem:[%s11076_s2 + $0x100] sm:$0xff] }
  0x19   : > { %271 = vmatmul.f32.vlgmr.msra.gmra.mxu3 %v6363_v35  ;;  %v195_v41 = vsub.f32 %v6350_v30, %v6363_v35  ;;  %v6416_v59 = vand.u32 4294901760, %v515_v52  ;;  %v780_v61 = vand.u32 4294901760, %v779_v49  ;;  %v791_v62 = vsub.f32 %v6371_v38, %v790_v50  ;;  %v491_v5 = vld [vmem:[%s11076_s2 + $0xc0] sm:$0xff] }
  0x1a   : > { %413 = vmatpush.msra.mxu1 %v336_v3  ;;  %461 = vmatpush.msra.mxu3 %v336_v3  ;;  %v802_v63 = vand.u32 4294901760, %v6398_v51  ;;  %v6428_v0 = vsub.f32 %v523_v45, %v6403_v53  ;;  %v6430_v1 = vand.u32 4294901760, %v507_v57  ;;  %v786_v2 = vand.u32 4294901760, %v785_v55  ;;  %v483_v12 = vld [vmem:[%s11076_s2 + $0x80] sm:$0xff] }
  0x1b   : > { %v196_v46 = vand.u32 4294901760, %v195_v41  ;;  %v797_v3 = vsub.f32 %v6386_v44, %v796_v56  ;;  %v6436_v4 = vand.u32 4294901760, %v499_v60  ;;  %v808_v6 = vand.u32 4294901760, %v6414_v58  ;;  %v475_v21 = vld [vmem:[%s11076_s2 + $0x40] sm:$0xff] }
  0x1c   : > { %v6444_v7 = vsub.f32 %v515_v52, %v6416_v59  ;;  %v803_v11 = vsub.f32 %v6398_v51, %v802_v63  ;;  %v814_v13 = vand.u32 4294901760, %v6428_v0  ;;  %v6457_v16 = vsub.f32 %v507_v57, %v6430_v1  ;;  %v467_v36 = vld [vmem:[%s11076_s2] sm:$0xff] }
  0x1d   : > { %197 = vmatmul.f32.vlgmr.msra.gmra.mxu0 %v196_v46  ;;  %v6459_v17 = vand.u32 4294901760, %v491_v5  ;;  %v798_v19 = vand.u32 4294901760, %v797_v3  ;;  %v6463_v20 = vsub.f32 %v499_v60, %v6436_v4  ;;  %v809_v25 = vsub.f32 %v6414_v58, %v808_v6  ;;  %v707_v3 = vld [vmem:[%s11076_s2 + $0x780] sm:$0xff] }
  0x1e   : > { %390 = vmatpush.msra.mxu0 %v363_v8  ;;  %v792_v8 = vand.u32 4294901760, %v791_v62  ;;  %v820_v26 = vand.u32 4294901760, %v6444_v7  ;;  %v6474_v27 = vand.u32 4294901760, %v483_v12  ;;  %v804_v31 = vand.u32 4294901760, %v803_v11 }
  0x1f   : > { %343 = vmatmul.f32.vlgmr.msrb.gmra.mxu2 %v196_v46  ;;  %317 = vmatmul.f32.vlgmr.msrb.gmra.mxu1 %v6338_v23  ;;  %v826_v40 = vand.u32 4294901760, %v6457_v16  ;;  %v6487_v41 = vsub.f32 %v491_v5, %v6459_v17  ;;  %v6489_v42 = vand.u32 4294901760, %v475_v21  ;;  %v832_v45 = vand.u32 4294901760, %v6463_v20 }
  0x20   : > { %769 = vmatpush.msrb.mxu1 %v768_v48  ;;  %867 = vmatpush.msrb.mxu2 %v6326_v14  ;;  %v821_v46 = vsub.f32 %v6444_v7, %v820_v26  ;;  %v6499_v48 = vsub.f32 %v483_v12, %v6474_v27  ;;  %v6501_v49 = vand.u32 4294901760, %v467_v36 }
  0x21   : > { %369 = vmatmul.f32.vlgmr.msrb.gmra.mxu3 %v6338_v23  ;;  %v11081_v55 = vand.u32 4294901760, %v6487_v41  ;;  %v6511_v57 = vsub.f32 %v475_v21, %v6489_v42 }
  0x22   : > { %775 = vmatpush.msrb.mxu1 %v774_v54  ;;  %870 = vmatpush.msrb.mxu2 %v6336_v22  ;;  %v827_v54 = vsub.f32 %v6457_v16, %v826_v40  ;;  %v822_v60 = vand.u32 4294901760, %v821_v46  ;;  %v11080_v62 = vand.u32 4294901760, %v6499_v48  ;;  %v11258_v22 = vand.u32 4294901760, %v6487_v41 }
  0x23   : > { %920 = vmatpush.msrb.mxu3 %v6314_v9  ;;  %v11079_v11 = vand.u32 4294901760, %v6511_v57 }
  0x24   : > { %781 = vmatpush.msrb.mxu1 %v780_v61  ;;  %873 = vmatpush.msrb.mxu2 %v6347_v29  ;;  %v833_v61 = vsub.f32 %v6463_v20, %v832_v45  ;;  %v828_v5 = vand.u32 4294901760, %v827_v54  ;;  %v845_v21 = vsub.f32 %v6499_v48, %v11080_v62  ;;  %v11260_v29 = vand.u32 4294901760, %v6511_v57 }
  0x25   : > { %295 = vmatmul.f32.vlgmr.msrb.gmra.mxu0 %v6338_v23  ;;  %922 = vmatpush.msrb.mxu3 %v6316_v10 }
  0x26   : > { %787 = vmatpush.msrb.mxu1 %v786_v2  ;;  %724 = vmatpush.msrb.mxu0 %v6314_v9  ;;  %v6524_v2 = vsub.f32 %v467_v36, %v6501_v49  ;;  %v699_v36 = vld [vmem:[%s11076_s2 + $0x740] sm:$0xff] }
  0x27   : > { %441 = vmatmul.f32.vlgmr.msra.gmra.mxu2 %v6338_v23  ;;  %417 = vmatmul.f32.vlgmr.msra.gmra.mxu1 %v6363_v35  ;;  %v815_v35 = vsub.f32 %v6428_v0, %v814_v13  ;;  %v6564_v54 = vand.u32 4294901760, %v699_v36 }
  0x28   : > { %793 = vmatpush.msrb.mxu1 %v792_v8  ;;  %876 = vmatpush.msrb.mxu2 %v6357_v33  ;;  %v839_v8 = vsub.f32 %v6487_v41, %v11081_v55  ;;  %v659_v33 = vld [vmem:[%s11076_s2 + $0x600] sm:$0xff] }
  0x29   : > { %463 = vmatmul.f32.vlgmr.msra.gmra.mxu3 %v6338_v23  ;;  %726 = vmatpush.msrb.mxu0 %v6316_v10  ;;  %v810_v23 = vand.u32 4294901760, %v809_v25  ;;  %v816_v52 = vand.u32 4294901760, %v815_v35  ;;  %v11078_v25 = vand.u32 4294901760, %v6524_v2 }
  0x2a   : > { %924 = vmatpush.msrb.mxu3 %v6328_v15  ;;  %799 = vmatpush.msrb.mxu1 %v798_v19  ;;  %v834_v19 = vand.u32 4294901760, %v833_v61  ;;  %v840_v35 = vand.u32 4294901760, %v839_v8 }
  0x2b   : > { %879 = vmatpush.msrb.mxu2 %v6371_v38  ;;  %728 = vmatpush.msrb.mxu0 %v6328_v15  ;;  %v857_v61 = vsub.f32 %v6524_v2, %v11078_v25  ;;  %v6588_v25 = vsub.f32 %v699_v36, %v6564_v54  ;;  %v651_v38 = vld [vmem:[%s11076_s2 + $0x5c0] sm:$0xff] }
  0x2c   : > { %926 = vmatpush.msrb.mxu3 %v6333_v18  ;;  %805 = vmatpush.msrb.mxu1 %v804_v31  ;;  %v6545_v31 = vand.u32 4294901760, %v707_v3 }
  0x2d   : > { %393 = vmatmul.f32.vlgmr.msra.gmra.mxu0 %v6350_v30  ;;  %882 = vmatpush.msrb.mxu2 %v6386_v44  ;;  %v715_v30 = vld [vmem:[%s11076_s2 + $0x7c0] sm:$0xff] }
  0x2e   : > { %928 = vmatpush.msrb.mxu3 %v6340_v24  ;;  %730 = vmatpush.msrb.mxu0 %v6333_v18  ;;  %v6536_v12 = vand.u32 4294901760, %v715_v30 }
  0x2f   : > { %811 = vmatpush.msrb.mxu1 %v810_v23  ;;  %885 = vmatpush.msrb.mxu2 %v6398_v51  ;;  %v851_v23 = vsub.f32 %v6511_v57, %v11079_v11 }
  0x30   : > { %930 = vmatpush.msrb.mxu3 %v6359_v34  ;;  %732 = vmatpush.msrb.mxu0 %v6340_v24  ;;  %v6557_v46 = vsub.f32 %v715_v30, %v6536_v12  ;;  %v6571_v30 = vsub.f32 %v707_v3, %v6545_v31  ;;  %v675_v3 = vld [vmem:[%s11076_s2 + $0x680] sm:$0xff] }
  0x31   : > { %817 = vmatpush.msrb.mxu1 %v816_v52  ;;  %888 = vmatpush.msrb.mxu2 %v6414_v58  ;;  %v691_v52 = vld [vmem:[%s11076_s2 + $0x700] sm:$0xff]  ;;  %v6599_v55 = vand.u32 4294901760, %v675_v3 }
  0x32   : > { %932 = vmatpush.msrb.mxu3 %v6373_v39  ;;  %734 = vmatpush.msrb.mxu0 %v6359_v34  ;;  %v6578_v8 = vand.u32 4294901760, %v691_v52  ;;  %v635_v58 = vld [vmem:[%s11076_s2 + $0x540] sm:$0xff] }
  0x33   : > { %823 = vmatpush.msrb.mxu1 %v822_v60  ;;  %891 = vmatpush.msrb.mxu2 %v6428_v0  ;;  %v846_v60 = vand.u32 4294901760, %v845_v21  ;;  %v11082_v21 = vand.u32 4294901760, %v6557_v46 }
  0x34   : > { %934 = vmatpush.msrb.mxu3 %v6391_v47  ;;  %736 = vmatpush.msrb.mxu0 %v6373_v39  ;;  %v6597_v62 = vsub.f32 %v691_v52, %v6578_v8 }
  0x35   : > { %829 = vmatpush.msrb.mxu1 %v828_v5  ;;  %894 = vmatpush.msrb.mxu2 %v6444_v7  ;;  %v683_v5 = vld [vmem:[%s11076_s2 + $0x6c0] sm:$0xff]  ;;  %v1108_v36 = vsub.f32 %v6557_v46, %v11082_v21  ;;  %v6619_v21 = vsub.f32 %v675_v3, %v6599_v55 }
  0x36   : > { %936 = vmatpush.msrb.mxu3 %v6403_v53  ;;  %738 = vmatpush.msrb.mxu0 %v6391_v47  ;;  %v6590_v11 = vand.u32 4294901760, %v683_v5 }
  0x37   : > { %835 = vmatpush.msrb.mxu1 %v834_v19  ;;  %897 = vmatpush.msrb.mxu2 %v6457_v16  ;;  %v852_v19 = vand.u32 4294901760, %v851_v23  ;;  %v1113_v23 = vand.u32 4294901760, %v6571_v30 }
  0x38   : > { %938 = vmatpush.msrb.mxu3 %v6416_v59  ;;  %740 = vmatpush.msrb.mxu0 %v6403_v53 }
  0x39   : > { %841 = vmatpush.msrb.mxu1 %v840_v35  ;;  %900 = vmatpush.msrb.mxu2 %v6463_v20  ;;  %v858_v35 = vand.u32 4294901760, %v857_v61  ;;  %v6609_v61 = vsub.f32 %v683_v5, %v6590_v11  ;;  %v1114_v52 = vsub.f32 %v6571_v30, %v1113_v23  ;;  %v1109_v5 = vand.u32 4294901760, %v1108_v36 }
  0x3a   : > { %940 = vmatpush.msrb.mxu3 %v6430_v1  ;;  %742 = vmatpush.msrb.mxu0 %v6416_v59 }
  0x3b   : > { %847 = vmatpush.msrb.mxu1 %v846_v60  ;;  %903 = vmatpush.msrb.mxu2 %v6487_v41  ;;  %v11083_v60 = vand.u32 4294901760, %v6588_v25  ;;  %v1115_v3 = vand.u32 4294901760, %v1114_v52 }
  0x3c   : > { %942 = vmatpush.msrb.mxu3 %v6436_v4  ;;  %744 = vmatpush.msrb.mxu0 %v6430_v1 }
  0x3d   : > { %853 = vmatpush.msrb.mxu1 %v852_v19  ;;  %906 = vmatpush.msrb.mxu2 %v6499_v48  ;;  %v1125_v19 = vand.u32 4294901760, %v6597_v62 }
  0x3e   : > { %944 = vmatpush.msrb.mxu3 %v6459_v17  ;;  %746 = vmatpush.msrb.mxu0 %v6436_v4 }
  0x3f   : > { %859 = vmatpush.msrb.mxu1 %v858_v35  ;;  %909 = vmatpush.msrb.mxu2 %v6511_v57  ;;  %v1120_v35 = vsub.f32 %v6588_v25, %v11083_v60  ;;  %v1126_v36 = vsub.f32 %v6597_v62, %v1125_v19 }
  0x40   : > { %946 = vmatpush.msrb.mxu3 %v6474_v27  ;;  %748 = vmatpush.msrb.mxu0 %v6459_v17 }
  0x41   : > { %1028 = vmatpush.msra.mxu1 %v6314_v9  ;;  %912 = vmatpush.msrb.mxu2 %v6524_v2  ;;  %v1131_v9 = vand.u32 4294901760, %v6609_v61  ;;  %v1121_v60 = vand.u32 4294901760, %v1120_v35  ;;  %v667_v35 = vld [vmem:[%s11076_s2 + $0x640] sm:$0xff] }
  0x42   : > { %948 = vmatpush.msrb.mxu3 %v6489_v42  ;;  %750 = vmatpush.msrb.mxu0 %v6474_v27 }
  0x43   : > { %1030 = vmatpush.msra.mxu1 %v6316_v10  ;;  %1065 = vmatpush.msra.mxu2 %v6536_v12  ;;  %v1137_v10 = vand.u32 4294901760, %v6619_v21  ;;  %v1132_v52 = vsub.f32 %v6609_v61, %v1131_v9 }
  0x44   : > { %950 = vmatpush.msrb.mxu3 %v6501_v49  ;;  %752 = vmatpush.msrb.mxu0 %v6489_v42 }
  0x45   : > { %1032 = vmatpush.msra.mxu1 %v6328_v15  ;;  %1067 = vmatpush.msra.mxu2 %v6545_v31  ;;  %v1127_v15 = vand.u32 4294901760, %v1126_v36  ;;  %v603_v36 = vld [vmem:[%s11076_s2 + $0x440] sm:$0xff] }
  0x46   : > { %1110 = vmatpush.msra.mxu3 %v1109_v5  ;;  %754 = vmatpush.msrb.mxu0 %v6501_v49  ;;  %v1138_v5 = vsub.f32 %v6619_v21, %v1137_v10 }
  0x47   : > { %1034 = vmatpush.msra.mxu1 %v6333_v18  ;;  %1069 = vmatpush.msra.mxu2 %v6564_v54  ;;  %v1133_v18 = vand.u32 4294901760, %v1132_v52 }
  0x48   : > { %1116 = vmatpush.msra.mxu3 %v1115_v3  ;;  %961 = vmatpush.msra.mxu0 %v766_v28  ;;  %v1139_v14 = vand.u32 4294901760, %v1138_v5  ;;  %v11259_v28 = vand.u32 4294901760, %v6499_v48  ;;  %v611_v48 = vld [vmem:[%s11076_s2 + $0x480] sm:$0xff] }
  0x49   : > { %1036 = vmatpush.msra.mxu1 %v6340_v24  ;;  %1071 = vmatpush.msra.mxu2 %v6578_v8  ;;  %v6663_v24 = vand.u32 4294901760, %v667_v35 }
  0x4a   : > { %1122 = vmatpush.msra.mxu3 %v1121_v60  ;;  %965 = vmatpush.msra.mxu0 %v772_v32  ;;  %v11261_v32 = vand.u32 4294901760, %v6524_v2  ;;  %v6779_v2 = vand.u32 4294901760, %v611_v48 }
  0x4b   : > { %1038 = vmatpush.msra.mxu1 %v6359_v34  ;;  %1073 = vmatpush.msra.mxu2 %v6590_v11  ;;  %v6704_v34 = vand.u32 4294901760, %v659_v33 }
  0x4c   : > { %1128 = vmatpush.msra.mxu3 %v1127_v15  ;;  %969 = vmatpush.msra.mxu0 %v778_v37  ;;  %v6707_v37 = vsub.f32 %v667_v35, %v6663_v24  ;;  %v6795_v35 = vsub.f32 %v611_v48, %v6779_v2 }
  0x4d   : > { %1040 = vmatpush.msra.mxu1 %v6373_v39  ;;  %1075 = vmatpush.msra.mxu2 %v6599_v55  ;;  %v6717_v44 = vsub.f32 %v659_v33, %v6704_v34 }
  0x4e   : > { %1134 = vmatpush.msra.mxu3 %v1133_v18  ;;  %973 = vmatpush.msra.mxu0 %v784_v43  ;;  %v1143_v39 = vand.u32 4294901760, %v6707_v37  ;;  %v6714_v43 = vand.u32 4294901760, %v651_v38  ;;  %v6792_v18 = vand.u32 4294901760, %v603_v36 }
  0x4f   : > { %1042 = vmatpush.msra.mxu1 %v6391_v47  ;;  %1077 = vmatpush.msra.mxu2 %v6663_v24  ;;  %v643_v47 = vld [vmem:[%s11076_s2 + $0x580] sm:$0xff]  ;;  %v1149_v51 = vand.u32 4294901760, %v6717_v44 }
  0x50   : > { %1140 = vmatpush.msra.mxu3 %v1139_v14  ;;  %977 = vmatpush.msra.mxu0 %v790_v50  ;;  %v1144_v50 = vsub.f32 %v6707_v37, %v1143_v39  ;;  %v6808_v33 = vsub.f32 %v603_v36, %v6792_v18 }
  0x51   : > { %1044 = vmatpush.msra.mxu1 %v6403_v53  ;;  %1079 = vmatpush.msra.mxu2 %v6704_v34  ;;  %v6727_v53 = vand.u32 4294901760, %v643_v47 }
  0x52   : > { %981 = vmatpush.msra.mxu0 %v796_v56  ;;  %v6730_v56 = vsub.f32 %v651_v38, %v6714_v43 }
  0x53   : > { %1046 = vmatpush.msra.mxu1 %v6416_v59  ;;  %1081 = vmatpush.msra.mxu2 %v6714_v43  ;;  %v1145_v59 = vand.u32 4294901760, %v1144_v50  ;;  %v1191_v50 = vand.u32 4294901760, %v6808_v33 }
  0x54   : > { %985 = vmatpush.msra.mxu0 %v802_v63  ;;  %v1150_v63 = vsub.f32 %v6717_v44, %v1149_v51  ;;  %v1155_v0 = vand.u32 4294901760, %v6730_v56 }
  0x55   : > { %1048 = vmatpush.msra.mxu1 %v6430_v1  ;;  %1083 = vmatpush.msra.mxu2 %v6727_v53  ;;  %v6740_v1 = vand.u32 4294901760, %v635_v58 }
  0x56   : > { %989 = vmatpush.msra.mxu0 %v808_v6  ;;  %v627_v6 = vld [vmem:[%s11076_s2 + $0x500] sm:$0xff]  ;;  %1146 = vmatpush.msra.mxu3 %v1145_v59  ;;  %v1151_v7 = vand.u32 4294901760, %v1150_v63  ;;  %v1192_v63 = vsub.f32 %v6808_v33, %v1191_v50 }
  0x57   : > { %1050 = vmatpush.msra.mxu1 %v6436_v4  ;;  %v6743_v4 = vsub.f32 %v643_v47, %v6727_v53  ;;  %1085 = vmatpush.msra.mxu2 %v6740_v1  ;;  %v6752_v16 = vand.u32 4294901760, %v627_v6 }
  0x58   : > { %993 = vmatpush.msra.mxu0 %v814_v13  ;;  %v1156_v13 = vsub.f32 %v6730_v56, %v1155_v0  ;;  %1152 = vmatpush.msra.mxu3 %v1151_v7  ;;  %v1193_v7 = vand.u32 4294901760, %v1192_v63 }
  0x59   : > { %1052 = vmatpush.msra.mxu1 %v6459_v17  ;;  %v6755_v17 = vsub.f32 %v635_v58, %v6740_v1  ;;  %v1161_v20 = vand.u32 4294901760, %v6743_v4  ;;  %1087 = vmatpush.msra.mxu2 %v6752_v16 }
  0x5a   : > { %997 = vmatpush.msra.mxu0 %v820_v26  ;;  %v619_v26 = vld [vmem:[%s11076_s2 + $0x4c0] sm:$0xff] }
  0x5b   : > { %1054 = vmatpush.msra.mxu1 %v6474_v27  ;;  %v1157_v27 = vand.u32 4294901760, %v1156_v13  ;;  %v6763_v41 = vand.u32 4294901760, %v619_v26 }
  0x5c   : > { %1001 = vmatpush.msra.mxu0 %v826_v40  ;;  %v1167_v40 = vand.u32 4294901760, %v6755_v17 }
  0x5d   : > { %1056 = vmatpush.msra.mxu1 %v6489_v42  ;;  %v6766_v42 = vsub.f32 %v627_v6, %v6752_v16  ;;  %1158 = vmatpush.msra.mxu3 %v1157_v27  ;;  %v6782_v60 = vsub.f32 %v619_v26, %v6763_v41 }
  0x5e   : > { %1005 = vmatpush.msra.mxu0 %v832_v45  ;;  %v1162_v45 = vsub.f32 %v6743_v4, %v1161_v20  ;;  %1089 = vmatpush.msra.mxu2 %v6763_v41 }
  0x5f   : > { %1058 = vmatpush.msra.mxu1 %v6501_v49  ;;  %v1168_v49 = vsub.f32 %v6755_v17, %v1167_v40  ;;  %v1173_v57 = vand.u32 4294901760, %v6766_v42  ;;  %v1179_v5 = vand.u32 4294901760, %v6782_v60 }
  0x60   : > { %1009 = vmatpush.msra.mxu0 %v11258_v22  ;;  %v1163_v3 = vand.u32 4294901760, %v1162_v45  ;;  %1091 = vmatpush.msra.mxu2 %v6779_v2 }
  0x61   : > { %v1169_v52 = vand.u32 4294901760, %v1168_v49  ;;  %v1174_v15 = vsub.f32 %v6766_v42, %v1173_v57  ;;  %v1180_v22 = vsub.f32 %v6782_v60, %v1179_v5 }
  0x62   : > { %1013 = vmatpush.msra.mxu0 %v11259_v28  ;;  %1164 = vmatpush.msra.mxu3 %v1163_v3  ;;  %v595_v28 = vld [vmem:[%s11076_s2 + $0x400] sm:$0xff] }
  0x63   : > { %v1175_v14 = vand.u32 4294901760, %v1174_v15  ;;  %1093 = vmatpush.msra.mxu2 %v6792_v18  ;;  %v1181_v38 = vand.u32 4294901760, %v1180_v22 }
  0x64   : > { %1017 = vmatpush.msra.mxu0 %v11260_v29  ;;  %1170 = vmatpush.msra.mxu3 %v1169_v52  ;;  %v1185_v29 = vand.u32 4294901760, %v6795_v35 }
  0x66   : > { %1021 = vmatpush.msra.mxu0 %v11261_v32  ;;  %v6805_v32 = vand.u32 4294901760, %v595_v28  ;;  %1176 = vmatpush.msra.mxu3 %v1175_v14  ;;  %v1186_v47 = vsub.f32 %v6795_v35, %v1185_v29 }
  0x68   : > { %1095 = vmatpush.msra.mxu2 %v6805_v32  ;;  %v6816_v58 = vsub.f32 %v595_v28, %v6805_v32  ;;  %1182 = vmatpush.msra.mxu3 %v1181_v38  ;;  %v1187_v59 = vand.u32 4294901760, %v1186_v47 }
  0x6a   : > { %v1197_v6 = vand.u32 4294901760, %v6816_v58  ;;  %1188 = vmatpush.msra.mxu3 %v1187_v59 }
  0x6c   : > { %v1198_v13 = vsub.f32 %v6816_v58, %v1197_v6  ;;  %1194 = vmatpush.msra.mxu3 %v1193_v7 }
  0x6e   : > { %v1199_v26 = vand.u32 4294901760, %v1198_v13 }
  0x70   : > { %1200 = vmatpush.msra.mxu3 %v1199_v26 }
  0x94   : > { %v224_v27 = vpop.f32.mrf.mxu1 }
  0x9a   : > { %v198_v45 = vpop.f32.mrf.mxu0  ;;  %v248_v48 = vpop.f32.mrf.mxu2 }
  0x9b   : > { %v225_v49 = vadd.f32 %v224_v27, %v198_v45 }
  0x9c   : > { %v272_v3 = vpop.f32.mrf.mxu3  ;;  %v318_v52 = vpop.f32.mrf.mxu1 }
  0x9d   : > { %v249_v36 = vadd.f32 %v248_v48, %v225_v49  ;;  %v11264_v48 = vand.u32 4294901760, %v6557_v46 }
  0x9f   : > { %v273_v15 = vadd.f32 %v272_v3, %v249_v36 }
  0xa2   : > { %v296_v14 = vpop.f32.mrf.mxu0  ;;  %v344_v22 = vpop.f32.mrf.mxu2 }
  0xa3   : > { %v297_v28 = vadd.f32 %v296_v14, %v273_v15 }
  0xa4   : > { %v370_v38 = vpop.f32.mrf.mxu3  ;;  %v418_v26 = vpop.f32.mrf.mxu1 }
  0xa5   : > { %v319_v47 = vadd.f32 %v318_v52, %v297_v28  ;;  %v371_v63 = vadd.f32 %v370_v38, %v344_v22  ;;  %v11266_v22 = vand.u32 4294901760, %v6588_v25 }
  0xa7   : > { %v6825_v59 = vand.u32 4294901760, %v319_v47 }
  0xa9   : > { %v6828_v7 = vsub.f32 %v319_v47, %v6825_v59  ;;  %861 = vmatmul.f32.vlgmr.msrb.gmra.mxu1 %v6825_v59 }
  0xaa   : > { %1261 = vmatpush.msrb.mxu1 %v6536_v12  ;;  %v394_v13 = vpop.f32.mrf.mxu0  ;;  %v442_v49 = vpop.f32.mrf.mxu2 }
  0xab   : > { %11262 = vst [vmem:[#allocation2_spill] sm:$0xff] %v6828_v7  ;;  %v395_v27 = vadd.f32 %v394_v13, %v371_v63  ;;  %915 = vmatmul.f32.vlgmr.msrb.gmra.mxu2 %v6828_v7  ;;  %v6834_v45 = vand.u32 4294901760, %v6828_v7  ;;  %v524_v63 = vld [vmem:[%s11076_s2 + $0x1c8] sm:$0xff] }
  0xac   : > { %1263 = vmatpush.msrb.mxu1 %v6545_v31  ;;  %1302 = vmatpush.msrb.mxu2 %v11264_v48  ;;  %v464_v52 = vpop.f32.mrf.mxu3 }
  0xad   : > { %11263 = vst [vmem:[#allocation3_spill] sm:$0xff] %v6834_v45  ;;  %v419_v3 = vadd.f32 %v418_v26, %v395_v27  ;;  %954 = vmatmul.f32.vlgmr.msrb.gmra.mxu3 %v6834_v45  ;;  %v758_v36 = vsub.f32 %v6828_v7, %v6834_v45 }
  0xae   : > { %1265 = vmatpush.msrb.mxu1 %v6564_v54  ;;  %1306 = vmatpush.msrb.mxu2 %v1113_v23 }
  0xaf   : > { %1369 = vmatpush.msrb.mxu3 %v6536_v12  ;;  %v443_v15 = vadd.f32 %v442_v49, %v419_v3  ;;  %v6846_v14 = vand.u32 4294901760, %v758_v36 }
  0xb0   : > { %1267 = vmatpush.msrb.mxu1 %v6578_v8  ;;  %1310 = vmatpush.msrb.mxu2 %v11266_v22 }
  0xb1   : > { %11265 = vst [vmem:[#allocation4_spill] sm:$0xff] %v6846_v14  ;;  %1371 = vmatpush.msrb.mxu3 %v6545_v31  ;;  %v465_v28 = vadd.f32 %v464_v52, %v443_v15  ;;  %760 = vmatmul.f32.vlgmr.msrb.gmra.mxu0 %v6846_v14  ;;  %v588_v31 = vld [vmem:[%s11076_s2 + $0x3c8] sm:$0xff] }
  0xb2   : > { %1060 = vmatmul.f32.vlgmr.msra.gmra.mxu1 %v6825_v59  ;;  %1208 = vmatpush.msrb.mxu0 %v6557_v46  ;;  %v500_v52 = vld [vmem:[%s11076_s2 + $0x108] sm:$0xff] }
  0xb3   : > { %v6855_v23 = vand.u32 4294901760, %v465_v28  ;;  %1269 = vmatpush.msrb.mxu1 %v6590_v11  ;;  %1314 = vmatpush.msrb.mxu2 %v1125_v19 }
  0xb4   : > { %1373 = vmatpush.msrb.mxu3 %v6564_v54  ;;  %1211 = vmatpush.msrb.mxu0 %v6571_v30  ;;  %v6889_v30 = vand.u32 4294901760, %v588_v31 }
  0xb5   : > { %v6863_v12 = vsub.f32 %v465_v28, %v6855_v23  ;;  %1271 = vmatpush.msrb.mxu1 %v6599_v55  ;;  %1318 = vmatpush.msrb.mxu2 %v1131_v9  ;;  %v556_v9 = vld [vmem:[%s11076_s2 + $0x2c8] sm:$0xff] }
  0xb6   : > { %1375 = vmatpush.msrb.mxu3 %v6578_v8  ;;  %1214 = vmatpush.msrb.mxu0 %v6588_v25  ;;  %v580_v25 = vld [vmem:[%s11076_s2 + $0x388] sm:$0xff] }
  0xb7   : > { %11267 = vst [vmem:[#allocation5_spill] sm:$0xff] %v6863_v12  ;;  %v6874_v46 = vand.u32 4294901760, %v6863_v12  ;;  %1273 = vmatpush.msrb.mxu1 %v6663_v24  ;;  %1322 = vmatpush.msrb.mxu2 %v1137_v10  ;;  %v6900_v8 = vand.u32 4294901760, %v580_v25  ;;  %v492_v28 = vld [vmem:[%s11076_s2 + $0xc8] sm:$0xff] }
  0xb8   : > { %1377 = vmatpush.msrb.mxu3 %v6590_v11  ;;  %1217 = vmatpush.msrb.mxu0 %v6597_v62  ;;  %v572_v62 = vld [vmem:[%s11076_s2 + $0x348] sm:$0xff] }
  0xb9   : > { %11268 = vst [vmem:[#allocation6_spill] sm:$0xff] %v6874_v46  ;;  %1275 = vmatpush.msrb.mxu1 %v6704_v34  ;;  %1326 = vmatpush.msrb.mxu2 %v1143_v39  ;;  %v1099_v54 = vsub.f32 %v6863_v12, %v6874_v46  ;;  %v6913_v19 = vand.u32 4294901760, %v572_v62  ;;  %v548_v39 = vld [vmem:[%s11076_s2 + $0x288] sm:$0xff] }
  0xba   : > { %1379 = vmatpush.msrb.mxu3 %v6599_v55  ;;  %1023 = vmatmul.f32.vlgmr.msra.gmra.mxu0 %v6825_v59  ;;  %v564_v55 = vld [vmem:[%s11076_s2 + $0x308] sm:$0xff] }
  0xbb   : > { %1220 = vmatpush.msrb.mxu0 %v6609_v61  ;;  %1277 = vmatpush.msrb.mxu1 %v6714_v43  ;;  %v6898_v11 = vand.u32 4294901760, %v1099_v54  ;;  %v6911_v61 = vsub.f32 %v588_v31, %v6889_v30  ;;  %v6926_v10 = vand.u32 4294901760, %v564_v55 }
  0xbc   : > { %1330 = vmatpush.msrb.mxu2 %v1149_v51  ;;  %1381 = vmatpush.msrb.mxu3 %v6663_v24 }
  0xbd   : > { %1223 = vmatpush.msrb.mxu0 %v6619_v21  ;;  %1279 = vmatpush.msrb.mxu1 %v6727_v53  ;;  %v6924_v21 = vsub.f32 %v580_v25, %v6900_v8  ;;  %v11101_v24 = vand.u32 4294901760, %v6911_v61  ;;  %v6952_v51 = vsub.f32 %v564_v55, %v6926_v10  ;;  %v7055_v25 = vand.u32 4294901760, %v500_v52 }
  0xbe   : > { %1334 = vmatpush.msrb.mxu2 %v1155_v0  ;;  %1383 = vmatpush.msrb.mxu3 %v6704_v34  ;;  %v6935_v34 = vsub.f32 %v572_v62, %v6913_v19  ;;  %v6956_v0 = vand.u32 4294901760, %v548_v39 }
  0xbf   : > { %1101 = vmatmul.f32.vlgmr.msra.gmra.mxu2 %v6898_v11  ;;  %1226 = vmatpush.msrb.mxu0 %v6707_v37  ;;  %v6937_v37 = vand.u32 4294901760, %v556_v9 }
  0xc0   : > { %1281 = vmatpush.msrb.mxu1 %v6740_v1  ;;  %1338 = vmatpush.msrb.mxu2 %v1161_v20  ;;  %v532_v20 = vld [vmem:[%s11076_s2 + $0x208] sm:$0xff] }
  0xc1   : > { %1385 = vmatpush.msrb.mxu3 %v6714_v43  ;;  %1229 = vmatpush.msrb.mxu0 %v6717_v44  ;;  %v540_v43 = vld [vmem:[%s11076_s2 + $0x248] sm:$0xff]  ;;  %v11099_v44 = vand.u32 4294901760, %v6924_v21  ;;  %v6982_v47 = vand.u32 4294901760, %v532_v20 }
  0xc2   : > { %1202 = vmatmul.f32.vlgmr.msra.gmra.mxu3 %v6855_v23  ;;  %1283 = vmatpush.msrb.mxu1 %v6752_v16  ;;  %v6971_v38 = vand.u32 4294901760, %v540_v43 }
  0xc3   : > { %1342 = vmatpush.msrb.mxu2 %v1167_v40  ;;  %1387 = vmatpush.msrb.mxu3 %v6727_v53  ;;  %v1449_v53 = vsub.f32 %v6911_v61, %v11101_v24  ;;  %v11098_v40 = vand.u32 4294901760, %v6935_v34  ;;  %v7016_v48 = vsub.f32 %v532_v20, %v6982_v47  ;;  %v644_v24 = vld [vmem:[%s11076_s2 + $0x588] sm:$0xff] }
  0xc4   : > { %1232 = vmatpush.msrb.mxu0 %v6730_v56  ;;  %1285 = vmatpush.msrb.mxu1 %v6763_v41  ;;  %v6969_v56 = vsub.f32 %v556_v9, %v6937_v37  ;;  %v7000_v26 = vsub.f32 %v540_v43, %v6971_v38  ;;  %v7070_v9 = vand.u32 4294901760, %v492_v28  ;;  %v476_v43 = vld [vmem:[%s11076_s2 + $0x48] sm:$0xff] }
  0xc5   : > { %1346 = vmatpush.msrb.mxu2 %v1173_v57  ;;  %1389 = vmatpush.msrb.mxu3 %v6740_v1  ;;  %v1455_v1 = vsub.f32 %v6924_v21, %v11099_v44  ;;  %v11097_v57 = vand.u32 4294901760, %v6952_v51  ;;  %v11092_v22 = vand.u32 4294901760, %v7016_v48 }
  0xc6   : > { %1235 = vmatpush.msrb.mxu0 %v6743_v4  ;;  %1287 = vmatpush.msrb.mxu1 %v6779_v2  ;;  %v6990_v4 = vsub.f32 %v548_v39, %v6956_v0  ;;  %v11095_v13 = vand.u32 4294901760, %v6969_v56  ;;  %v11093_v36 = vand.u32 4294901760, %v7000_v26 }
  0xc7   : > { %1350 = vmatpush.msrb.mxu2 %v1179_v5  ;;  %1391 = vmatpush.msrb.mxu3 %v6752_v16  ;;  %v1450_v16 = vand.u32 4294901760, %v1449_v53  ;;  %v1461_v5 = vsub.f32 %v6935_v34, %v11098_v40  ;;  %v1467_v27 = vsub.f32 %v6952_v51, %v11097_v57  ;;  %v1491_v39 = vsub.f32 %v7016_v48, %v11092_v22  ;;  %v652_v57 = vld [vmem:[%s11076_s2 + $0x5c8] sm:$0xff] }
  0xc8   : > { %1238 = vmatpush.msrb.mxu0 %v6755_v17  ;;  %1289 = vmatpush.msrb.mxu1 %v6792_v18  ;;  %v516_v17 = vld [vmem:[%s11076_s2 + $0x188] sm:$0xff]  ;;  %v1473_v3 = vsub.f32 %v6969_v56, %v11095_v13  ;;  %v1485_v62 = vsub.f32 %v7000_v26, %v11093_v36 }
  0xc9   : > { %1354 = vmatpush.msrb.mxu2 %v1185_v29  ;;  %1393 = vmatpush.msrb.mxu3 %v6763_v41  ;;  %v7007_v29 = vand.u32 4294901760, %v524_v63  ;;  %v1456_v41 = vand.u32 4294901760, %v1455_v1  ;;  %v7024_v49 = vand.u32 4294901760, %v516_v17  ;;  %v7083_v1 = vsub.f32 %v500_v52, %v7055_v25  ;;  %v660_v13 = vld [vmem:[%s11076_s2 + $0x608] sm:$0xff] }
  0xca   : > { %1241 = vmatpush.msrb.mxu0 %v6766_v42  ;;  %1291 = vmatpush.msrb.mxu1 %v6805_v32  ;;  %v508_v42 = vld [vmem:[%s11076_s2 + $0x148] sm:$0xff]  ;;  %v1474_v54 = vand.u32 4294901760, %v1473_v3  ;;  %v7247_v44 = vand.u32 4294901760, %v660_v13 }
  0xcb   : > { %1358 = vmatpush.msrb.mxu2 %v1191_v50  ;;  %1395 = vmatpush.msrb.mxu3 %v6779_v2  ;;  %v11094_v50 = vand.u32 4294901760, %v6990_v4  ;;  %v1462_v2 = vand.u32 4294901760, %v1461_v5  ;;  %v7040_v15 = vand.u32 4294901760, %v508_v42  ;;  %v7053_v31 = vsub.f32 %v516_v17, %v7024_v49 }
  0xcc   : > { %1295 = vmatmul.f32.vlgmr.msrb.gmra.mxu1 %v6874_v46  ;;  %1244 = vmatpush.msrb.mxu0 %v6782_v60  ;;  %v7038_v60 = vsub.f32 %v524_v63, %v7007_v29  ;;  %v1486_v63 = vand.u32 4294901760, %v1485_v62  ;;  %v7279_v46 = vand.u32 4294901760, %v644_v24 }
  0xcd   : > { %1451 = vmatpush.msra.mxu1 %v1450_v16  ;;  %1362 = vmatpush.msrb.mxu2 %v1197_v6  ;;  %v1468_v6 = vand.u32 4294901760, %v1467_v27  ;;  %v7068_v55 = vsub.f32 %v508_v42, %v7040_v15  ;;  %v11089_v53 = vand.u32 4294901760, %v7053_v31  ;;  %v468_v16 = vld [vmem:[%s11076_s2 + $0x8] sm:$0xff]  ;;  %v1492_v27 = vand.u32 4294901760, %v1491_v39 }
  0xce   : > { %1397 = vmatpush.msrb.mxu3 %v6792_v18  ;;  %1364 = vmatmul.f32.vlgmr.msrb.gmra.mxu2 %v6855_v23  ;;  %v1479_v18 = vsub.f32 %v6990_v4, %v11094_v50  ;;  %v7112_v52 = vand.u32 4294901760, %v468_v16 }
  0xcf   : > { %1457 = vmatpush.msra.mxu1 %v1456_v41  ;;  %1549 = vmatpush.msra.mxu2 %v6911_v61  ;;  %v11088_v17 = vand.u32 4294901760, %v7068_v55  ;;  %v7098_v41 = vsub.f32 %v492_v28, %v7070_v9  ;;  %v1503_v42 = vsub.f32 %v7053_v31, %v11089_v53 }
  0xd0   : > { %1247 = vmatpush.msrb.mxu0 %v6795_v35  ;;  %1399 = vmatpush.msrb.mxu3 %v6805_v32  ;;  %v484_v35 = vld [vmem:[%s11076_s2 + $0x88] sm:$0xff]  ;;  %v11091_v32 = vand.u32 4294901760, %v7038_v60  ;;  %v1480_v20 = vand.u32 4294901760, %v1479_v18 }
  0xd1   : > { %1401 = vmatmul.f32.vlgmr.msrb.gmra.mxu3 %v6855_v23  ;;  %1463 = vmatpush.msra.mxu1 %v1462_v2  ;;  %v11085_v2 = vand.u32 4294901760, %v7083_v1  ;;  %v1509_v28 = vsub.f32 %v7068_v55, %v11088_v17  ;;  %v11084_v18 = vand.u32 4294901760, %v7098_v41  ;;  %v1504_v62 = vand.u32 4294901760, %v1503_v42  ;;  %v692_v17 = vld [vmem:[%s11076_s2 + $0x708] sm:$0xff] }
  0xd2   : > { %1552 = vmatpush.msra.mxu2 %v6924_v21  ;;  %1602 = vmatpush.msra.mxu3 %v6889_v30  ;;  %v1497_v5 = vsub.f32 %v7038_v60, %v11091_v32  ;;  %v676_v32 = vld [vmem:[%s11076_s2 + $0x688] sm:$0xff] }
  0xd3   : > { %1250 = vmatpush.msrb.mxu0 %v6808_v33  ;;  %1469 = vmatpush.msra.mxu1 %v1468_v6  ;;  %v7085_v33 = vand.u32 4294901760, %v484_v35 }
  0xd4   : > { %1555 = vmatpush.msra.mxu2 %v6935_v34  ;;  %1604 = vmatpush.msra.mxu3 %v6900_v8  ;;  %v1498_v6 = vand.u32 4294901760, %v1497_v5  ;;  %v1521_v5 = vsub.f32 %v7098_v41, %v11084_v18 }
  0xd5   : > { %1253 = vmatpush.msrb.mxu0 %v6816_v58  ;;  %1475 = vmatpush.msra.mxu1 %v1474_v54  ;;  %v7100_v58 = vand.u32 4294901760, %v476_v43  ;;  %v7110_v3 = vsub.f32 %v484_v35, %v7085_v33  ;;  %v1515_v35 = vsub.f32 %v7083_v1, %v11085_v2 }
  0xd6   : > { %1256 = vmatmul.f32.vlgmr.msrb.gmra.mxu0 %v6863_v12  ;;  %1558 = vmatpush.msra.mxu2 %v6952_v51  ;;  %v1522_v2 = vand.u32 4294901760, %v1521_v5  ;;  %v7263_v12 = vand.u32 4294901760, %v652_v57 }
  0xd7   : > { %1406 = vmatpush.msra.mxu0 %v6889_v30  ;;  %1606 = vmatpush.msra.mxu3 %v6913_v19  ;;  %v7122_v54 = vsub.f32 %v476_v43, %v7100_v58  ;;  %v11086_v39 = vand.u32 4294901760, %v7110_v3  ;;  %v716_v43 = vld [vmem:[%s11076_s2 + $0x7c8] sm:$0xff]  ;;  %v1516_v42 = vand.u32 4294901760, %v1515_v35 }
  0xd8   : > { %1481 = vmatpush.msra.mxu1 %v1480_v20  ;;  %1561 = vmatpush.msra.mxu2 %v6969_v56  ;;  %v7132_v20 = vsub.f32 %v468_v16, %v7112_v52  ;;  %v708_v16 = vld [vmem:[%s11076_s2 + $0x788] sm:$0xff]  ;;  %v7154_v18 = vand.u32 4294901760, %v716_v43 }
  0xd9   : > { %1408 = vmatpush.msra.mxu0 %v6900_v8  ;;  %1608 = vmatpush.msra.mxu3 %v6926_v10  ;;  %v7162_v35 = vand.u32 4294901760, %v708_v16 }
  0xda   : > { %1487 = vmatpush.msra.mxu1 %v1486_v63  ;;  %1564 = vmatpush.msra.mxu2 %v6990_v4  ;;  %v1510_v63 = vand.u32 4294901760, %v1509_v28  ;;  %v11090_v28 = vand.u32 4294901760, %v7132_v20 }
  0xdb   : > { %1410 = vmatpush.msra.mxu0 %v6913_v19  ;;  %1610 = vmatpush.msra.mxu3 %v6937_v37 }
  0xdc   : > { %1493 = vmatpush.msra.mxu1 %v1492_v27  ;;  %1567 = vmatpush.msra.mxu2 %v7000_v26  ;;  %v11087_v27 = vand.u32 4294901760, %v7122_v54  ;;  %v1539_v5 = vsub.f32 %v7132_v20, %v11090_v28  ;;  %v7192_v28 = vand.u32 4294901760, %v692_v17 }
  0xdd   : > { %1412 = vmatpush.msra.mxu0 %v6926_v10  ;;  %1612 = vmatpush.msra.mxu3 %v6956_v0 }
  0xde   : > { %1499 = vmatpush.msra.mxu1 %v1498_v6  ;;  %1570 = vmatpush.msra.mxu2 %v7016_v48  ;;  %v1527_v6 = vsub.f32 %v7110_v3, %v11086_v39  ;;  %v700_v39 = vld [vmem:[%s11076_s2 + $0x748] sm:$0xff]  ;;  %v7216_v50 = vsub.f32 %v692_v17, %v7192_v28 }
  0xdf   : > { %1414 = vmatpush.msra.mxu0 %v6937_v37  ;;  %1614 = vmatpush.msra.mxu3 %v6971_v38  ;;  %v7181_v53 = vand.u32 4294901760, %v700_v39 }
  0xe0   : > { %1505 = vmatpush.msra.mxu1 %v1504_v62  ;;  %1573 = vmatpush.msra.mxu2 %v7038_v60  ;;  %v1533_v62 = vsub.f32 %v7122_v54, %v11087_v27  ;;  %v7174_v27 = vsub.f32 %v716_v43, %v7154_v18  ;;  %v7188_v43 = vsub.f32 %v708_v16, %v7162_v35 }
  0xe1   : > { %1416 = vmatpush.msra.mxu0 %v6956_v0  ;;  %1616 = vmatpush.msra.mxu3 %v6982_v47  ;;  %v7204_v16 = vsub.f32 %v700_v39, %v7181_v53  ;;  %11269 = vst [vmem:[#allocation7_spill] sm:$0xff] %v7216_v50 }
  0xe2   : > { %1511 = vmatpush.msra.mxu1 %v1510_v63  ;;  %1576 = vmatpush.msra.mxu2 %v7053_v31  ;;  %v1528_v63 = vand.u32 4294901760, %v1527_v6  ;;  %v1534_v6 = vand.u32 4294901760, %v1533_v62  ;;  %v11096_v22 = vand.u32 4294901760, %v7174_v27  ;;  %v11100_v36 = vand.u32 4294901760, %v7188_v43 }
  0xe3   : > { %1418 = vmatpush.msra.mxu0 %v6971_v38  ;;  %1618 = vmatpush.msra.mxu3 %v7007_v29  ;;  %v11104_v17 = vand.u32 4294901760, %v7204_v16 }
  0xe4   : > { %1517 = vmatpush.msra.mxu1 %v1516_v42  ;;  %1579 = vmatpush.msra.mxu2 %v7068_v55  ;;  %v684_v42 = vld [vmem:[%s11076_s2 + $0x6c8] sm:$0xff]  ;;  %v1790_v39 = vsub.f32 %v7174_v27, %v11096_v22 }
  0xe5   : > { %1420 = vmatpush.msra.mxu0 %v6982_v47  ;;  %1620 = vmatpush.msra.mxu3 %v7024_v49  ;;  %v7199_v62 = vand.u32 4294901760, %v684_v42 }
  0xe6   : > { %1523 = vmatpush.msra.mxu1 %v1522_v2  ;;  %1582 = vmatpush.msra.mxu2 %v7083_v1  ;;  %v1540_v2 = vand.u32 4294901760, %v1539_v5  ;;  %v668_v5 = vld [vmem:[%s11076_s2 + $0x648] sm:$0xff] }
  0xe7   : > { %1422 = vmatpush.msra.mxu0 %v7007_v29  ;;  %1622 = vmatpush.msra.mxu3 %v7040_v15 }
  0xe8   : > { %1529 = vmatpush.msra.mxu1 %v1528_v63  ;;  %1585 = vmatpush.msra.mxu2 %v7098_v41  ;;  %v7208_v63 = vand.u32 4294901760, %v676_v32 }
  0xe9   : > { %1424 = vmatpush.msra.mxu0 %v7024_v49  ;;  %1624 = vmatpush.msra.mxu3 %v7055_v25 }
  0xea   : > { %1535 = vmatpush.msra.mxu1 %v1534_v6  ;;  %1588 = vmatpush.msra.mxu2 %v7110_v3  ;;  %v7223_v6 = vsub.f32 %v684_v42, %v7199_v62  ;;  %v1796_v42 = vsub.f32 %v7188_v43, %v11100_v36  ;;  %v7239_v22 = vsub.f32 %v676_v32, %v7208_v63  ;;  %v1791_v36 = vand.u32 4294901760, %v1790_v39 }
  0xeb   : > { %1426 = vmatpush.msra.mxu0 %v7040_v15  ;;  %1626 = vmatpush.msra.mxu3 %v7070_v9 }
  0xec   : > { %1541 = vmatpush.msra.mxu1 %v1540_v2  ;;  %1591 = vmatpush.msra.mxu2 %v7122_v54  ;;  %11270 = vst [vmem:[#allocation8_spill] sm:$0xff] %v7223_v6  ;;  %v7231_v2 = vand.u32 4294901760, %v668_v5  ;;  %v1797_v39 = vand.u32 4294901760, %v1796_v42  ;;  %v11273_v42 = vand.u32 4294901760, %v7223_v6 }
  0xed   : > { %1428 = vmatpush.msra.mxu0 %v7055_v25  ;;  %1628 = vmatpush.msra.mxu3 %v7085_v33  ;;  %11271 = vst [vmem:[#allocation9_spill] sm:$0xff] %v7239_v22 }
  0xee   : > { %1543 = vmatmul.f32.vlgmr.msra.gmra.mxu1 %v6825_v59  ;;  %1594 = vmatpush.msra.mxu2 %v7132_v20  ;;  %v7261_v40 = vsub.f32 %v668_v5, %v7231_v2  ;;  %v11272_v5 = vand.u32 4294901760, %v7216_v50  ;;  %v1814_v32 = vsub.f32 %v7223_v6, %v11273_v42  ;;  %v620_v6 = vld [vmem:[%s11076_s2 + $0x4c8] sm:$0xff] }
  0xef   : > { %1710 = vmatpush.msrb.mxu1 %v6889_v30  ;;  %1430 = vmatpush.msra.mxu0 %v7070_v9  ;;  %v1802_v30 = vsub.f32 %v7204_v16, %v11104_v17 }
  0xf0   : > { %1630 = vmatpush.msra.mxu3 %v7100_v58  ;;  %1597 = vmatmul.f32.vlgmr.msra.gmra.mxu2 %v6828_v7  ;;  %v1808_v17 = vsub.f32 %v7216_v50, %v11272_v5  ;;  %v7277_v7 = vsub.f32 %v660_v13, %v7247_v44 }
  0xf1   : > { %1712 = vmatpush.msrb.mxu1 %v6900_v8  ;;  %1747 = vmatpush.msrb.mxu2 %v7154_v18  ;;  %v636_v8 = vld [vmem:[%s11076_s2 + $0x548] sm:$0xff]  ;;  %v1803_v5 = vand.u32 4294901760, %v1802_v30  ;;  %v7307_v30 = vsub.f32 %v644_v24, %v7279_v46 }
  0xf2   : > { %1432 = vmatpush.msra.mxu0 %v7085_v33  ;;  %1632 = vmatpush.msra.mxu3 %v7112_v52  ;;  %v7294_v50 = vand.u32 4294901760, %v636_v8 }
  0xf3   : > { %1636 = vmatmul.f32.vlgmr.msra.gmra.mxu3 %v6834_v45  ;;  %1714 = vmatpush.msrb.mxu1 %v6913_v19  ;;  %v628_v19 = vld [vmem:[%s11076_s2 + $0x508] sm:$0xff]  ;;  %v7292_v45 = vsub.f32 %v652_v57, %v7263_v12 }
  0xf4   : > { %1749 = vmatpush.msrb.mxu2 %v7162_v35  ;;  %1792 = vmatpush.msrb.mxu3 %v1791_v36  ;;  %v11274_v36 = vand.u32 4294901760, %v7239_v22  ;;  %v7309_v13 = vand.u32 4294901760, %v628_v19  ;;  %v7323_v57 = vsub.f32 %v636_v8, %v7294_v50 }
  0xf5   : > { %1434 = vmatpush.msra.mxu0 %v7100_v58  ;;  %1716 = vmatpush.msrb.mxu1 %v6926_v10  ;;  %v1809_v10 = vand.u32 4294901760, %v1808_v17 }
  0xf6   : > { %1751 = vmatpush.msrb.mxu2 %v7181_v53  ;;  %1798 = vmatpush.msrb.mxu3 %v1797_v39  ;;  %v1820_v42 = vsub.f32 %v7239_v22, %v11274_v36  ;;  %v1815_v39 = vand.u32 4294901760, %v1814_v32  ;;  %v612_v36 = vld [vmem:[%s11076_s2 + $0x488] sm:$0xff]  ;;  %v11275_v22 = vand.u32 4294901760, %v6911_v61  ;;  %v11277_v61 = vand.u32 4294901760, %v6924_v21 }
  0xf7   : > { %1436 = vmatpush.msra.mxu0 %v7112_v52  ;;  %1718 = vmatpush.msrb.mxu1 %v6937_v37  ;;  %v11276_v37 = vand.u32 4294901760, %v7261_v40  ;;  %v7336_v8 = vsub.f32 %v628_v19, %v7309_v13  ;;  %v7338_v17 = vand.u32 4294901760, %v612_v36  ;;  %v11279_v21 = vand.u32 4294901760, %v6935_v34 }
  0xf8   : > { %1442 = vmatmul.f32.vlgmr.msra.gmra.mxu0 %v6846_v14  ;;  %1753 = vmatpush.msrb.mxu2 %v7192_v28  ;;  %v7325_v14 = vand.u32 4294901760, %v620_v6  ;;  %v1821_v32 = vand.u32 4294901760, %v1820_v42 }
  0xf9   : > { %1643 = vmatpush.msrb.mxu0 %v11275_v22  ;;  %1804 = vmatpush.msrb.mxu3 %v1803_v5  ;;  %v1826_v24 = vsub.f32 %v7261_v40, %v11276_v37  ;;  %v11278_v22 = vand.u32 4294901760, %v7277_v7  ;;  %v1843_v37 = vand.u32 4294901760, %v7307_v30 }
  0xfa   : > { %1720 = vmatpush.msrb.mxu1 %v6956_v0  ;;  %1755 = vmatpush.msrb.mxu2 %v7199_v62  ;;  %v604_v0 = vld [vmem:[%s11076_s2 + $0x448] sm:$0xff] }
  0xfb   : > { %1647 = vmatpush.msrb.mxu0 %v11277_v61  ;;  %1810 = vmatpush.msrb.mxu3 %v1809_v10  ;;  %v1832_v5 = vsub.f32 %v7277_v7, %v11278_v22  ;;  %v1827_v42 = vand.u32 4294901760, %v1826_v24  ;;  %v11280_v10 = vand.u32 4294901760, %v7292_v45  ;;  %v1849_v61 = vand.u32 4294901760, %v7323_v57 }
  0xfc   : > { %1722 = vmatpush.msrb.mxu1 %v6971_v38  ;;  %1757 = vmatpush.msrb.mxu2 %v7208_v63  ;;  %v7352_v22 = vsub.f32 %v620_v6, %v7325_v14  ;;  %v596_v38 = vld [vmem:[%s11076_s2 + $0x408] sm:$0xff]  ;;  %v7359_v34 = vand.u32 4294901760, %v604_v0  ;;  %v1844_v6 = vsub.f32 %v7307_v30, %v1843_v37 }
  0xfd   : > { %1651 = vmatpush.msrb.mxu0 %v11279_v21  ;;  %1816 = vmatpush.msrb.mxu3 %v1815_v39  ;;  %v1838_v19 = vsub.f32 %v7292_v45, %v11280_v10  ;;  %v11281_v39 = vand.u32 4294901760, %v6952_v51  ;;  %v1833_v24 = vand.u32 4294901760, %v1832_v5  ;;  %v1855_v21 = vand.u32 4294901760, %v7336_v8 }
  0xfe   : > { %1724 = vmatpush.msrb.mxu1 %v6982_v47  ;;  %1759 = vmatpush.msrb.mxu2 %v7231_v2  ;;  %v7368_v10 = vsub.f32 %v612_v36, %v7338_v17  ;;  %v7372_v47 = vand.u32 4294901760, %v596_v38  ;;  %v11282_v51 = vand.u32 4294901760, %v6969_v56  ;;  %v1850_v5 = vsub.f32 %v7323_v57, %v1849_v61 }
  0xff   : > { %1655 = vmatpush.msrb.mxu0 %v11281_v39  ;;  %1822 = vmatpush.msrb.mxu3 %v1821_v32  ;;  %v1839_v32 = vand.u32 4294901760, %v1838_v19  ;;  %v1861_v39 = vand.u32 4294901760, %v7352_v22  ;;  %v11283_v36 = vand.u32 4294901760, %v6990_v4  ;;  %v1845_v56 = vand.u32 4294901760, %v1844_v6 }
 0x100   : > { %1726 = vmatpush.msrb.mxu1 %v7007_v29  ;;  %1761 = vmatpush.msrb.mxu2 %v7247_v44  ;;  %v7383_v29 = vsub.f32 %v604_v0, %v7359_v34  ;;  %v1867_v19 = vand.u32 4294901760, %v7368_v10  ;;  %v11284_v0 = vand.u32 4294901760, %v7000_v26  ;;  %v1851_v4 = vand.u32 4294901760, %v1850_v5 }
 0x101   : > { %1659 = vmatpush.msrb.mxu0 %v11282_v51  ;;  %1828 = vmatpush.msrb.mxu3 %v1827_v42  ;;  %v1856_v42 = vsub.f32 %v7336_v8, %v1855_v21  ;;  %v11285_v6 = vand.u32 4294901760, %v7016_v48  ;;  %v11287_v5 = vand.u32 4294901760, %v7053_v31 }
 0x102   : > { %1728 = vmatpush.msrb.mxu1 %v7024_v49  ;;  %1763 = vmatpush.msrb.mxu2 %v7263_v12  ;;  %v7394_v49 = vsub.f32 %v596_v38, %v7372_v47  ;;  %v1868_v26 = vsub.f32 %v7368_v10, %v1867_v19 }
 0x103   : > { %1663 = vmatpush.msrb.mxu0 %v11283_v36  ;;  %1834 = vmatpush.msrb.mxu3 %v1833_v24  ;;  %v1862_v24 = vsub.f32 %v7352_v22, %v1861_v39  ;;  %v1857_v38 = vand.u32 4294901760, %v1856_v42  ;;  %v11289_v36 = vand.u32 4294901760, %v7083_v1  ;;  %v11292_v1 = vand.u32 4294901760, %v7110_v3 }
 0x104   : > { %1730 = vmatpush.msrb.mxu1 %v7040_v15  ;;  %1765 = vmatpush.msrb.mxu2 %v7279_v46  ;;  %v1873_v15 = vand.u32 4294901760, %v7383_v29  ;;  %v1879_v51 = vand.u32 4294901760, %v7394_v49  ;;  %v11295_v42 = vand.u32 4294901760, %v7204_v16  ;;  %v11296_v3 = vand.u32 4294901760, %v7132_v20  ;;  %v589_v20 = vld [vmem:[%s11076_s2 + $0x3d0] sm:$0xff] }
 0x105   : > { %1667 = vmatpush.msrb.mxu0 %v11284_v0  ;;  %1840 = vmatpush.msrb.mxu3 %v1839_v32  ;;  %v1863_v32 = vand.u32 4294901760, %v1862_v24  ;;  %v11297_v0 = vld [vmem:[#allocation7_spill] sm:$0xff] }
 0x106   : > { %1732 = vmatpush.msrb.mxu1 %v7055_v25  ;;  %1767 = vmatpush.msrb.mxu2 %v7294_v50  ;;  %v11286_v25 = vand.u32 4294901760, %v7038_v60  ;;  %v1874_v48 = vsub.f32 %v7383_v29, %v1873_v15  ;;  %v1880_v60 = vsub.f32 %v7394_v49, %v1879_v51 }
 0x107   : > { %1671 = vmatpush.msrb.mxu0 %v11285_v6  ;;  %1846 = vmatpush.msrb.mxu3 %v1845_v56  ;;  %v11293_v56 = vand.u32 4294901760, %v7188_v43 }
 0x108   : > { %1734 = vmatpush.msrb.mxu1 %v7070_v9  ;;  %1769 = vmatpush.msrb.mxu2 %v7309_v13  ;;  %v1869_v9 = vand.u32 4294901760, %v1868_v26  ;;  %v1875_v31 = vand.u32 4294901760, %v1874_v48 }
 0x109   : > { %1675 = vmatpush.msrb.mxu0 %v11286_v25  ;;  %1852 = vmatpush.msrb.mxu3 %v1851_v4  ;;  %v11298_v4 = vand.u32 4294901760, %v11297_v0  ;;  %v557_v25 = vld [vmem:[%s11076_s2 + $0x2d0] sm:$0xff] }
 0x10a   : > { %1736 = vmatpush.msrb.mxu1 %v7085_v33  ;;  %1771 = vmatpush.msrb.mxu2 %v7325_v14  ;;  %v11288_v33 = vand.u32 4294901760, %v7068_v55  ;;  %v11290_v55 = vand.u32 4294901760, %v7098_v41  ;;  %v11294_v41 = vand.u32 4294901760, %v7122_v54 }
 0x10b   : > { %1679 = vmatpush.msrb.mxu0 %v11287_v5  ;;  %1858 = vmatpush.msrb.mxu3 %v1857_v38 }
 0x10c   : > { %1738 = vmatpush.msrb.mxu1 %v7100_v58  ;;  %1773 = vmatpush.msrb.mxu2 %v7338_v17  ;;  %v1881_v58 = vand.u32 4294901760, %v1880_v60 }
 0x10d   : > { %1683 = vmatpush.msrb.mxu0 %v11288_v33  ;;  %1864 = vmatpush.msrb.mxu3 %v1863_v32 }
 0x10e   : > { %1740 = vmatpush.msrb.mxu1 %v7112_v52  ;;  %1775 = vmatpush.msrb.mxu2 %v7359_v34  ;;  %v11291_v52 = vand.u32 4294901760, %v7174_v27 }
 0x10f   : > { %1687 = vmatpush.msrb.mxu0 %v11289_v36  ;;  %1870 = vmatpush.msrb.mxu3 %v1869_v9  ;;  %v549_v9 = vld [vmem:[%s11076_s2 + $0x290] sm:$0xff] }
 0x110   : > { %1742 = vmatmul.f32.vlgmr.msrb.gmra.mxu1 %v6825_v59  ;;  %1777 = vmatpush.msrb.mxu2 %v7372_v47  ;;  %v7545_v60 = vand.u32 4294901760, %v549_v9  ;;  %v525_v36 = vld [vmem:[%s11076_s2 + $0x1d0] sm:$0xff] }
 0x111   : > { %1943 = vmatpush.msra.mxu1 %v7154_v18  ;;  %1691 = vmatpush.msrb.mxu0 %v11290_v55 }
 0x112   : > { %1876 = vmatpush.msrb.mxu3 %v1875_v31  ;;  %1783 = vmatmul.f32.vlgmr.msrb.gmra.mxu2 %v6898_v11 }
 0x113   : > { %1945 = vmatpush.msra.mxu1 %v7162_v35  ;;  %1984 = vmatpush.msra.mxu2 %v11291_v52 }
 0x114   : > { %1695 = vmatpush.msrb.mxu0 %v11292_v1  ;;  %1882 = vmatpush.msrb.mxu3 %v1881_v58 }
 0x115   : > { %1884 = vmatmul.f32.vlgmr.msrb.gmra.mxu3 %v6855_v23  ;;  %1947 = vmatpush.msra.mxu1 %v7181_v53 }
 0x116   : > { %1988 = vmatpush.msra.mxu2 %v11293_v56  ;;  %2051 = vmatpush.msra.mxu3 %v7154_v18  ;;  %v11299_v18 = vld [vmem:[#allocation8_spill] sm:$0xff] }
 0x117   : > { %1699 = vmatpush.msrb.mxu0 %v11294_v41  ;;  %1949 = vmatpush.msra.mxu1 %v7192_v28  ;;  %v11300_v54 = vand.u32 4294901760, %v11299_v18  ;;  %v509_v56 = vld [vmem:[%s11076_s2 + $0x150] sm:$0xff]  ;;  %v11306_v41 = vld [vmem:[#allocation6_spill] sm:$0xff] }
 0x118   : > { %1992 = vmatpush.msra.mxu2 %v11295_v42  ;;  %2053 = vmatpush.msra.mxu3 %v7162_v35  ;;  %v11301_v35 = vld [vmem:[#allocation9_spill] sm:$0xff] }
 0x119   : > { %1703 = vmatpush.msrb.mxu0 %v11296_v3  ;;  %1951 = vmatpush.msra.mxu1 %v7199_v62  ;;  %v11302_v24 = vand.u32 4294901760, %v11301_v35 }
 0x11a   : > { %1705 = vmatmul.f32.vlgmr.msrb.gmra.mxu0 %v6825_v59  ;;  %1996 = vmatpush.msra.mxu2 %v11298_v4  ;;  %v7628_v4 = vand.u32 4294901760, %v509_v56 }
 0x11b   : > { %1890 = vmatpush.msra.mxu0 %v7174_v27  ;;  %2055 = vmatpush.msra.mxu3 %v7181_v53  ;;  %v581_v53 = vld [vmem:[%s11076_s2 + $0x390] sm:$0xff]  ;;  %v7478_v27 = vand.u32 4294901760, %v589_v20 }
 0x11c   : > { %1953 = vmatpush.msra.mxu1 %v7208_v63  ;;  %2000 = vmatpush.msra.mxu2 %v11300_v54  ;;  %v7488_v6 = vand.u32 4294901760, %v581_v53 }
 0x11d   : > { %1893 = vmatpush.msra.mxu0 %v7188_v43  ;;  %2057 = vmatpush.msra.mxu3 %v7192_v28  ;;  %v11303_v43 = vand.u32 4294901760, %v7261_v40  ;;  %v573_v28 = vld [vmem:[%s11076_s2 + $0x350] sm:$0xff]  ;;  %v7499_v38 = vsub.f32 %v589_v20, %v7478_v27 }
 0x11e   : > { %1955 = vmatpush.msra.mxu1 %v7231_v2  ;;  %2004 = vmatpush.msra.mxu2 %v11302_v24  ;;  %v7501_v26 = vand.u32 4294901760, %v573_v28  ;;  %v493_v20 = vld [vmem:[%s11076_s2 + $0xd0] sm:$0xff] }
 0x11f   : > { %1896 = vmatpush.msra.mxu0 %v7204_v16  ;;  %2059 = vmatpush.msra.mxu3 %v7199_v62  ;;  %v11304_v62 = vand.u32 4294901760, %v7277_v7  ;;  %v565_v16 = vld [vmem:[%s11076_s2 + $0x310] sm:$0xff]  ;;  %v11135_v48 = vand.u32 4294901760, %v7499_v38 }
 0x120   : > { %1957 = vmatpush.msra.mxu1 %v7247_v44  ;;  %2008 = vmatpush.msra.mxu2 %v11303_v43  ;;  %v7514_v32 = vand.u32 4294901760, %v565_v16  ;;  %v7523_v5 = vsub.f32 %v573_v28, %v7501_v26  ;;  %v7656_v43 = vsub.f32 %v509_v56, %v7628_v4  ;;  %v7658_v28 = vand.u32 4294901760, %v493_v20 }
 0x121   : > { %1899 = vmatpush.msra.mxu0 %v11297_v0  ;;  %2061 = vmatpush.msra.mxu3 %v7208_v63  ;;  %v11305_v63 = vand.u32 4294901760, %v7292_v45 }
 0x122   : > { %1959 = vmatpush.msra.mxu1 %v7263_v12  ;;  %2012 = vmatpush.msra.mxu2 %v11304_v62 }
 0x123   : > { %1902 = vmatpush.msra.mxu0 %v11299_v18  ;;  %2063 = vmatpush.msra.mxu3 %v7231_v2  ;;  %v7512_v2 = vsub.f32 %v581_v53, %v7488_v6 }
 0x124   : > { %1961 = vmatpush.msra.mxu1 %v7279_v46  ;;  %2016 = vmatpush.msra.mxu2 %v11305_v63  ;;  %v477_v63 = vld [vmem:[%s11076_s2 + $0x50] sm:$0xff] }
 0x125   : > { %1905 = vmatpush.msra.mxu0 %v11301_v35  ;;  %2065 = vmatpush.msra.mxu3 %v7247_v44  ;;  %v7525_v44 = vand.u32 4294901760, %v557_v25 }
 0x126   : > { %1963 = vmatpush.msra.mxu1 %v7294_v50  ;;  %2020 = vmatpush.msra.mxu2 %v1843_v37  ;;  %v7540_v37 = vsub.f32 %v565_v16, %v7514_v32 }
 0x127   : > { %1908 = vmatpush.msra.mxu0 %v7261_v40  ;;  %2067 = vmatpush.msra.mxu3 %v7263_v12  ;;  %v541_v12 = vld [vmem:[%s11076_s2 + $0x250] sm:$0xff]  ;;  %v11134_v40 = vand.u32 4294901760, %v7512_v2  ;;  %v7557_v33 = vsub.f32 %v557_v25, %v7525_v44 }
 0x128   : > { %1965 = vmatpush.msra.mxu1 %v7309_v13  ;;  %2024 = vmatpush.msra.mxu2 %v1849_v61  ;;  %v533_v61 = vld [vmem:[%s11076_s2 + $0x210] sm:$0xff] }
 0x129   : > { %1911 = vmatpush.msra.mxu0 %v7277_v7  ;;  %2069 = vmatpush.msra.mxu3 %v7279_v46  ;;  %v2131_v7 = vsub.f32 %v7499_v38, %v11135_v48  ;;  %v11133_v46 = vand.u32 4294901760, %v7523_v5  ;;  %v7570_v31 = vand.u32 4294901760, %v533_v61  ;;  %v11130_v58 = vand.u32 4294901760, %v7557_v33 }
 0x12a   : > { %1967 = vmatpush.msra.mxu1 %v7325_v14  ;;  %2028 = vmatpush.msra.mxu2 %v1855_v21  ;;  %v7559_v21 = vand.u32 4294901760, %v541_v12 }
 0x12b   : > { %1914 = vmatpush.msra.mxu0 %v7292_v45  ;;  %2071 = vmatpush.msra.mxu3 %v7294_v50  ;;  %v2137_v45 = vsub.f32 %v7512_v2, %v11134_v40  ;;  %v11132_v50 = vand.u32 4294901760, %v7540_v37  ;;  %v7604_v1 = vsub.f32 %v533_v61, %v7570_v31  ;;  %v2155_v3 = vsub.f32 %v7557_v33, %v11130_v58  ;;  %v661_v58 = vld [vmem:[%s11076_s2 + $0x610] sm:$0xff] }
 0x12c   : > { %1969 = vmatpush.msra.mxu1 %v7338_v17  ;;  %2032 = vmatpush.msra.mxu2 %v1861_v39  ;;  %v2143_v39 = vsub.f32 %v7523_v5, %v11133_v46  ;;  %v7588_v55 = vsub.f32 %v541_v12, %v7559_v21  ;;  %v7835_v48 = vand.u32 4294901760, %v661_v58 }
 0x12d   : > { %1917 = vmatpush.msra.mxu0 %v7307_v30  ;;  %2073 = vmatpush.msra.mxu3 %v7309_v13  ;;  %v7579_v30 = vsub.f32 %v549_v9, %v7545_v60  ;;  %v2132_v13 = vand.u32 4294901760, %v2131_v7  ;;  %v2149_v52 = vsub.f32 %v7540_v37, %v11132_v50  ;;  %v11127_v18 = vand.u32 4294901760, %v7604_v1  ;;  %v469_v7 = vld [vmem:[%s11076_s2 + $0x10] sm:$0xff] }
 0x12e   : > { %1971 = vmatpush.msra.mxu1 %v7359_v34  ;;  %2036 = vmatpush.msra.mxu2 %v1867_v19  ;;  %v517_v19 = vld [vmem:[%s11076_s2 + $0x190] sm:$0xff]  ;;  %v2144_v42 = vand.u32 4294901760, %v2143_v39  ;;  %v11128_v0 = vand.u32 4294901760, %v7588_v55  ;;  %v2156_v24 = vand.u32 4294901760, %v2155_v3  ;;  %v761_v12 = vpop.f32.mrf.mxu0  ;;  %v7686_v39 = vsub.f32 %v493_v20, %v7658_v28 }
 0x12f   : > { %1920 = vmatpush.msra.mxu0 %v7323_v57  ;;  %2075 = vmatpush.msra.mxu3 %v7325_v14  ;;  %v7596_v14 = vand.u32 4294901760, %v525_v36  ;;  %v2138_v57 = vand.u32 4294901760, %v2137_v45  ;;  %v2173_v62 = vsub.f32 %v7604_v1, %v11127_v18  ;;  %v11307_v45 = vld [vmem:[#allocation5_spill] sm:$0xff]  ;;  %v7700_v3 = vand.u32 4294901760, %v469_v7  ;;  %v677_v18 = vld [vmem:[%s11076_s2 + $0x690] sm:$0xff] }
 0x130   : > { %1973 = vmatpush.msra.mxu1 %v7372_v47  ;;  %2040 = vmatpush.msra.mxu2 %v1873_v15  ;;  %v501_v15 = vld [vmem:[%s11076_s2 + $0x110] sm:$0xff]  ;;  %v2167_v53 = vsub.f32 %v7588_v55, %v11128_v0 }
 0x131   : > { %1923 = vmatpush.msra.mxu0 %v7336_v8  ;;  %2077 = vmatpush.msra.mxu3 %v7338_v17  ;;  %v11129_v8 = vand.u32 4294901760, %v7579_v30  ;;  %v7613_v17 = vand.u32 4294901760, %v517_v19  ;;  %v7632_v54 = vand.u32 4294901760, %v501_v15  ;;  %v653_v50 = vld [vmem:[%s11076_s2 + $0x5d0] sm:$0xff] }
 0x132   : > { %1977 = vmatmul.f32.vlgmr.msra.gmra.mxu1 %v11306_v41  ;;  %2044 = vmatpush.msra.mxu2 %v1879_v51  ;;  %v7626_v51 = vsub.f32 %v525_v36, %v7596_v14  ;;  %v2168_v61 = vand.u32 4294901760, %v2167_v53  ;;  %v916_v53 = vpop.f32.mrf.mxu2 }
 0x133   : > { %2133 = vmatpush.msrb.mxu1 %v2132_v13  ;;  %1926 = vmatpush.msra.mxu0 %v7352_v22  ;;  %v2150_v22 = vand.u32 4294901760, %v2149_v52  ;;  %v7643_v35 = vsub.f32 %v517_v19, %v7613_v17  ;;  %v7665_v16 = vsub.f32 %v501_v15, %v7632_v54  ;;  %v11123_v13 = vand.u32 4294901760, %v7656_v43  ;;  %v862_v19 = vpop.f32.mrf.mxu1 }
 0x134   : > { %2079 = vmatpush.msra.mxu3 %v7359_v34  ;;  %2046 = vmatmul.f32.vlgmr.msra.gmra.mxu2 %v6855_v23  ;;  %v2161_v34 = vsub.f32 %v7579_v30, %v11129_v8  ;;  %v863_v56 = vadd.f32 %v862_v19, %v761_v12  ;;  %v7796_v8 = vand.u32 4294901760, %v677_v18 }
 0x135   : > { %2139 = vmatpush.msrb.mxu1 %v2138_v57  ;;  %2231 = vmatpush.msrb.mxu2 %v7499_v38  ;;  %v11125_v9 = vand.u32 4294901760, %v7643_v35  ;;  %v2174_v57 = vand.u32 4294901760, %v2173_v62  ;;  %v11120_v52 = vand.u32 4294901760, %v7665_v16  ;;  %v2191_v20 = vsub.f32 %v7656_v43, %v11123_v13 }
 0x136   : > { %1929 = vmatpush.msra.mxu0 %v7368_v10  ;;  %2081 = vmatpush.msra.mxu3 %v7372_v47  ;;  %v485_v10 = vld [vmem:[%s11076_s2 + $0x90] sm:$0xff]  ;;  %v11126_v47 = vand.u32 4294901760, %v7626_v51  ;;  %v2162_v25 = vand.u32 4294901760, %v2161_v34  ;;  %v11119_v34 = vand.u32 4294901760, %v7686_v39  ;;  %v917_v62 = vadd.f32 %v916_v53, %v863_v56 }
 0x137   : > { %2083 = vmatmul.f32.vlgmr.msra.gmra.mxu3 %v6855_v23  ;;  %2145 = vmatpush.msrb.mxu1 %v2144_v42  ;;  %v2185_v15 = vsub.f32 %v7643_v35, %v11125_v9  ;;  %v1024_v56 = vpop.f32.mrf.mxu0 }
 0x138   : > { %2234 = vmatpush.msrb.mxu2 %v7512_v2  ;;  %2284 = vmatpush.msrb.mxu3 %v7478_v27  ;;  %v2179_v36 = vsub.f32 %v7626_v51, %v11126_v47  ;;  %v2203_v19 = vsub.f32 %v7686_v39, %v11119_v34 }
 0x139   : > { %1932 = vmatpush.msra.mxu0 %v7383_v29  ;;  %2151 = vmatpush.msrb.mxu1 %v2150_v22  ;;  %v7673_v29 = vand.u32 4294901760, %v485_v10 }
 0x13a   : > { %2237 = vmatpush.msrb.mxu2 %v7523_v5  ;;  %2286 = vmatpush.msrb.mxu3 %v7488_v6  ;;  %v2180_v22 = vand.u32 4294901760, %v2179_v36  ;;  %v2192_v36 = vand.u32 4294901760, %v2191_v20 }
 0x13b   : > { %1935 = vmatpush.msra.mxu0 %v7394_v49  ;;  %2157 = vmatpush.msrb.mxu1 %v2156_v24  ;;  %v7688_v49 = vand.u32 4294901760, %v477_v63  ;;  %v7698_v42 = vsub.f32 %v485_v10, %v7673_v29  ;;  %v2197_v10 = vsub.f32 %v7665_v16, %v11120_v52 }
 0x13c   : > { %1938 = vmatmul.f32.vlgmr.msra.gmra.mxu0 %v11307_v45  ;;  %2240 = vmatpush.msrb.mxu2 %v7540_v37 }
 0x13d   : > { %2088 = vmatpush.msrb.mxu0 %v7478_v27  ;;  %2288 = vmatpush.msrb.mxu3 %v7501_v26  ;;  %v7710_v24 = vsub.f32 %v477_v63, %v7688_v49  ;;  %v11121_v12 = vand.u32 4294901760, %v7698_v42  ;;  %v717_v63 = vld [vmem:[%s11076_s2 + $0x7d0] sm:$0xff] }
 0x13e   : > { %2163 = vmatpush.msrb.mxu1 %v2162_v25  ;;  %2243 = vmatpush.msrb.mxu2 %v7557_v33  ;;  %v2186_v25 = vand.u32 4294901760, %v2185_v15  ;;  %v2198_v15 = vand.u32 4294901760, %v2197_v10  ;;  %v7742_v52 = vand.u32 4294901760, %v717_v63 }
 0x13f   : > { %2090 = vmatpush.msrb.mxu0 %v7488_v6  ;;  %2290 = vmatpush.msrb.mxu3 %v7514_v32  ;;  %v2209_v20 = vsub.f32 %v7698_v42, %v11121_v12  ;;  %v701_v12 = vld [vmem:[%s11076_s2 + $0x750] sm:$0xff] }
 0x140   : > { %2169 = vmatpush.msrb.mxu1 %v2168_v61  ;;  %2246 = vmatpush.msrb.mxu2 %v7579_v30  ;;  %v7720_v61 = vsub.f32 %v469_v7, %v7700_v3  ;;  %v955_v7 = vpop.f32.mrf.mxu3  ;;  %v7769_v13 = vand.u32 4294901760, %v701_v12 }
 0x141   : > { %2092 = vmatpush.msrb.mxu0 %v7501_v26  ;;  %2292 = vmatpush.msrb.mxu3 %v7525_v44  ;;  %v956_v53 = vadd.f32 %v955_v7, %v917_v62  ;;  %v2204_v62 = vand.u32 4294901760, %v2203_v19 }
 0x142   : > { %2175 = vmatpush.msrb.mxu1 %v2174_v57  ;;  %2249 = vmatpush.msrb.mxu2 %v7588_v55  ;;  %11308 = vst [vmem:[#allocation7_spill] sm:$0xff] %v7720_v61  ;;  %v11122_v57 = vand.u32 4294901760, %v7710_v24  ;;  %v11124_v34 = vand.u32 4294901760, %v7720_v61 }
 0x143   : > { %2094 = vmatpush.msrb.mxu0 %v7514_v32  ;;  %2294 = vmatpush.msrb.mxu3 %v7545_v60  ;;  %v1025_v10 = vadd.f32 %v1024_v56, %v956_v53  ;;  %v7762_v56 = vsub.f32 %v717_v63, %v7742_v52  ;;  %v693_v53 = vld [vmem:[%s11076_s2 + $0x710] sm:$0xff] }
 0x144   : > { %2181 = vmatpush.msrb.mxu1 %v2180_v22  ;;  %2252 = vmatpush.msrb.mxu2 %v7604_v1  ;;  %v709_v22 = vld [vmem:[%s11076_s2 + $0x790] sm:$0xff]  ;;  %v2221_v19 = vsub.f32 %v7720_v61, %v11124_v34  ;;  %v7780_v47 = vand.u32 4294901760, %v693_v53 }
 0x145   : > { %2096 = vmatpush.msrb.mxu0 %v7525_v44  ;;  %2296 = vmatpush.msrb.mxu3 %v7559_v21  ;;  %v7750_v7 = vand.u32 4294901760, %v709_v22 }
 0x146   : > { %2187 = vmatpush.msrb.mxu1 %v2186_v25  ;;  %2255 = vmatpush.msrb.mxu2 %v7626_v51  ;;  %v2215_v25 = vsub.f32 %v7710_v24, %v11122_v57  ;;  %v1061_v57 = vpop.f32.mrf.mxu1  ;;  %v2222_v0 = vand.u32 4294901760, %v2221_v19  ;;  %v669_v19 = vld [vmem:[%s11076_s2 + $0x650] sm:$0xff] }
 0x147   : > { %2098 = vmatpush.msrb.mxu0 %v7545_v60  ;;  %2298 = vmatpush.msrb.mxu3 %v7570_v31  ;;  %v1062_v63 = vadd.f32 %v1061_v57, %v1025_v10  ;;  %v7776_v9 = vsub.f32 %v709_v22, %v7750_v7  ;;  %v11131_v57 = vand.u32 4294901760, %v7762_v56 }
 0x148   : > { %2193 = vmatpush.msrb.mxu1 %v2192_v36  ;;  %2258 = vmatpush.msrb.mxu2 %v7643_v35  ;;  %v2210_v36 = vand.u32 4294901760, %v2209_v20  ;;  %v685_v20 = vld [vmem:[%s11076_s2 + $0x6d0] sm:$0xff]  ;;  %v2216_v34 = vand.u32 4294901760, %v2215_v25  ;;  %v1203_v22 = vpop.f32.mrf.mxu3  ;;  %v7792_v25 = vsub.f32 %v701_v12, %v7769_v13 }
 0x149   : > { %2100 = vmatpush.msrb.mxu0 %v7559_v21  ;;  %2300 = vmatpush.msrb.mxu3 %v7596_v14  ;;  %v7787_v10 = vand.u32 4294901760, %v685_v20 }
 0x14a   : > { %2199 = vmatpush.msrb.mxu1 %v2198_v15  ;;  %2261 = vmatpush.msrb.mxu2 %v7656_v43  ;;  %v1102_v15 = vpop.f32.mrf.mxu2 }
 0x14b   : > { %2102 = vmatpush.msrb.mxu0 %v7570_v31  ;;  %2302 = vmatpush.msrb.mxu3 %v7613_v17 }
 0x14c   : > { %2205 = vmatpush.msrb.mxu1 %v2204_v62  ;;  %2264 = vmatpush.msrb.mxu2 %v7665_v16  ;;  %v1103_v62 = vadd.f32 %v1102_v15, %v1062_v63  ;;  %v7804_v15 = vsub.f32 %v693_v53, %v7780_v47  ;;  %v7811_v63 = vsub.f32 %v685_v20, %v7787_v10 }
 0x14d   : > { %2104 = vmatpush.msrb.mxu0 %v7596_v14  ;;  %2304 = vmatpush.msrb.mxu3 %v7628_v4 }
 0x14e   : > { %2211 = vmatpush.msrb.mxu1 %v2210_v36  ;;  %2267 = vmatpush.msrb.mxu2 %v7686_v39  ;;  %v11136_v36 = vand.u32 4294901760, %v7776_v9  ;;  %11309 = vst [vmem:[#allocation8_spill] sm:$0xff] %v7804_v15  ;;  %v1204_v12 = vadd.f32 %v1203_v22, %v1103_v62  ;;  %v7819_v62 = vand.u32 4294901760, %v669_v19  ;;  %v1296_v46 = vpop.f32.mrf.mxu1 }
 0x14f   : > { %2106 = vmatpush.msrb.mxu0 %v7613_v17  ;;  %2306 = vmatpush.msrb.mxu3 %v7632_v54 }
 0x150   : > { %2217 = vmatpush.msrb.mxu1 %v2216_v34  ;;  %2270 = vmatpush.msrb.mxu2 %v7698_v42  ;;  %v2472_v34 = vsub.f32 %v7762_v56, %v11131_v57  ;;  %v2478_v20 = vsub.f32 %v7776_v9, %v11136_v36  ;;  %v7827_v57 = vsub.f32 %v677_v18, %v7796_v8  ;;  %v637_v36 = vld [vmem:[%s11076_s2 + $0x550] sm:$0xff] }
 0x151   : > { %2108 = vmatpush.msrb.mxu0 %v7628_v4  ;;  %2308 = vmatpush.msrb.mxu3 %v7658_v28  ;;  %v7850_v41 = vsub.f32 %v669_v19, %v7819_v62  ;;  %v11312_v19 = vld [vmem:[#allocation3_spill] sm:$0xff] }
 0x152   : > { %2223 = vmatpush.msrb.mxu1 %v2222_v0  ;;  %2273 = vmatpush.msrb.mxu2 %v7710_v24  ;;  %v11137_v0 = vand.u32 4294901760, %v7792_v25  ;;  %11310 = vst [vmem:[#allocation9_spill] sm:$0xff] %v7827_v57  ;;  %v2473_v18 = vand.u32 4294901760, %v2472_v34  ;;  %v1365_v45 = vpop.f32.mrf.mxu2  ;;  %v7852_v34 = vand.u32 4294901760, %v653_v50 }
 0x153   : > { %2110 = vmatpush.msrb.mxu0 %v7632_v54  ;;  %2310 = vmatpush.msrb.mxu3 %v7673_v29  ;;  %v1257_v53 = vpop.f32.mrf.mxu0 }
 0x154   : > { %2225 = vmatmul.f32.vlgmr.msrb.gmra.mxu1 %v6825_v59  ;;  %2276 = vmatpush.msrb.mxu2 %v7720_v61  ;;  %v1258_v22 = vadd.f32 %v1257_v53, %v1204_v12  ;;  %v11311_v12 = vld [vmem:[#allocation2_spill] sm:$0xff]  ;;  %v2484_v40 = vsub.f32 %v7792_v25, %v11137_v0  ;;  %v11313_v0 = vand.u32 4294901760, %v7804_v15  ;;  %v11314_v61 = vand.u32 4294901760, %v7811_v63 }
 0x155   : > { %2392 = vmatpush.msra.mxu1 %v7478_v27  ;;  %2112 = vmatpush.msrb.mxu0 %v7658_v28  ;;  %v645_v27 = vld [vmem:[%s11076_s2 + $0x590] sm:$0xff] }
 0x156   : > { %2312 = vmatpush.msrb.mxu3 %v7688_v49  ;;  %2279 = vmatmul.f32.vlgmr.msrb.gmra.mxu2 %v11311_v12  ;;  %v1297_v53 = vadd.f32 %v1296_v46, %v1258_v22  ;;  %v2479_v46 = vand.u32 4294901760, %v2478_v20  ;;  %v2490_v20 = vsub.f32 %v7804_v15, %v11313_v0  ;;  %v7886_v15 = vsub.f32 %v653_v50, %v7852_v34  ;;  %v613_v0 = vld [vmem:[%s11076_s2 + $0x490] sm:$0xff] }
 0x157   : > { %2394 = vmatpush.msra.mxu1 %v7488_v6  ;;  %2429 = vmatpush.msra.mxu2 %v7742_v52  ;;  %v7873_v6 = vand.u32 4294901760, %v645_v27 }
 0x158   : > { %2114 = vmatpush.msrb.mxu0 %v7673_v29  ;;  %2314 = vmatpush.msrb.mxu3 %v7700_v3  ;;  %v1366_v22 = vadd.f32 %v1365_v45, %v1297_v53  ;;  %v1402_v45 = vpop.f32.mrf.mxu3  ;;  %v7871_v53 = vsub.f32 %v661_v58, %v7835_v48  ;;  %v2485_v58 = vand.u32 4294901760, %v2484_v40  ;;  %v2491_v40 = vand.u32 4294901760, %v2490_v20 }
 0x159   : > { %2318 = vmatmul.f32.vlgmr.msrb.gmra.mxu3 %v11312_v19  ;;  %2396 = vmatpush.msra.mxu1 %v7501_v26  ;;  %v2496_v19 = vsub.f32 %v7811_v63, %v11314_v61  ;;  %v629_v26 = vld [vmem:[%s11076_s2 + $0x510] sm:$0xff]  ;;  %v11315_v61 = vand.u32 4294901760, %v7827_v57  ;;  %v7933_v20 = vand.u32 4294901760, %v613_v0 }
 0x15a   : > { %2431 = vmatpush.msra.mxu2 %v7750_v7  ;;  %2474 = vmatpush.msra.mxu3 %v2473_v18  ;;  %v1403_v12 = vadd.f32 %v1402_v45, %v1366_v22  ;;  %v7888_v18 = vand.u32 4294901760, %v637_v36  ;;  %v7902_v45 = vsub.f32 %v645_v27, %v7873_v6 }
 0x15b   : > { %2116 = vmatpush.msrb.mxu0 %v7688_v49  ;;  %2398 = vmatpush.msra.mxu1 %v7514_v32  ;;  %v2502_v22 = vsub.f32 %v7827_v57, %v11315_v61  ;;  %v621_v32 = vld [vmem:[%s11076_s2 + $0x4d0] sm:$0xff]  ;;  %v2497_v61 = vand.u32 4294901760, %v2496_v19  ;;  %v11317_v57 = vand.u32 4294901760, %v7499_v38  ;;  %v11319_v38 = vand.u32 4294901760, %v7512_v2 }
 0x15c   : > { %2433 = vmatpush.msra.mxu2 %v7769_v13  ;;  %2480 = vmatpush.msra.mxu3 %v2479_v46  ;;  %6179 = vst [vmem:[%s7863_s4] sm:$0xff] %v1403_v12  ;;  %v7904_v46 = vand.u32 4294901760, %v629_v26  ;;  %v11316_v12 = vld [vmem:[#allocation4_spill] sm:$0xff]  ;;  %v7918_v50 = vsub.f32 %v637_v36, %v7888_v18  ;;  %v11321_v2 = vand.u32 4294901760, %v7523_v5 }
 0x15d   : > { %2118 = vmatpush.msrb.mxu0 %v7700_v3  ;;  %2400 = vmatpush.msra.mxu1 %v7525_v44  ;;  %v11318_v44 = vand.u32 4294901760, %v7850_v41  ;;  %v2503_v19 = vand.u32 4294901760, %v2502_v22 }
 0x15e   : > { %2124 = vmatmul.f32.vlgmr.msrb.gmra.mxu0 %v11316_v12  ;;  %2435 = vmatpush.msra.mxu2 %v7780_v47  ;;  %v7920_v12 = vand.u32 4294901760, %v621_v32  ;;  %v7931_v36 = vsub.f32 %v629_v26, %v7904_v46 }
 0x15f   : > { %2325 = vmatpush.msra.mxu0 %v11317_v57  ;;  %2486 = vmatpush.msra.mxu3 %v2485_v58  ;;  %v2508_v27 = vsub.f32 %v7850_v41, %v11318_v44  ;;  %v11320_v57 = vand.u32 4294901760, %v7871_v53  ;;  %v2525_v44 = vand.u32 4294901760, %v7902_v45 }
 0x160   : > { %2402 = vmatpush.msra.mxu1 %v7545_v60  ;;  %2437 = vmatpush.msra.mxu2 %v7787_v10  ;;  %v605_v60 = vld [vmem:[%s11076_s2 + $0x450] sm:$0xff] }
 0x161   : > { %2329 = vmatpush.msra.mxu0 %v11319_v38  ;;  %2492 = vmatpush.msra.mxu3 %v2491_v40  ;;  %v2514_v58 = vsub.f32 %v7871_v53, %v11320_v57  ;;  %v2509_v22 = vand.u32 4294901760, %v2508_v27  ;;  %v11322_v40 = vand.u32 4294901760, %v7886_v15  ;;  %v2531_v38 = vand.u32 4294901760, %v7918_v50 }
 0x162   : > { %2404 = vmatpush.msra.mxu1 %v7559_v21  ;;  %2439 = vmatpush.msra.mxu2 %v7796_v8  ;;  %v7947_v57 = vsub.f32 %v621_v32, %v7920_v12  ;;  %v597_v21 = vld [vmem:[%s11076_s2 + $0x410] sm:$0xff]  ;;  %v7954_v5 = vand.u32 4294901760, %v605_v60  ;;  %v2526_v32 = vsub.f32 %v7902_v45, %v2525_v44 }
 0x163   : > { %2333 = vmatpush.msra.mxu0 %v11321_v2  ;;  %2498 = vmatpush.msra.mxu3 %v2497_v61  ;;  %v2520_v26 = vsub.f32 %v7886_v15, %v11322_v40  ;;  %v11323_v61 = vand.u32 4294901760, %v7540_v37  ;;  %v2515_v27 = vand.u32 4294901760, %v2514_v58  ;;  %v2537_v2 = vand.u32 4294901760, %v7931_v36 }
 0x164   : > { %2406 = vmatpush.msra.mxu1 %v7570_v31  ;;  %2441 = vmatpush.msra.mxu2 %v7819_v62  ;;  %v7963_v40 = vsub.f32 %v613_v0, %v7933_v20  ;;  %v7967_v31 = vand.u32 4294901760, %v597_v21  ;;  %v11324_v37 = vand.u32 4294901760, %v7557_v33  ;;  %v2532_v58 = vsub.f32 %v7918_v50, %v2531_v38 }
 0x165   : > { %2337 = vmatpush.msra.mxu0 %v11323_v61  ;;  %2504 = vmatpush.msra.mxu3 %v2503_v19  ;;  %v2521_v19 = vand.u32 4294901760, %v2520_v26  ;;  %v2543_v61 = vand.u32 4294901760, %v7947_v57  ;;  %v11325_v0 = vand.u32 4294901760, %v7579_v30  ;;  %v2527_v33 = vand.u32 4294901760, %v2526_v32 }
 0x166   : > { %2408 = vmatpush.msra.mxu1 %v7596_v14  ;;  %2443 = vmatpush.msra.mxu2 %v7835_v48  ;;  %v7978_v14 = vsub.f32 %v605_v60, %v7954_v5  ;;  %v2549_v26 = vand.u32 4294901760, %v7963_v40  ;;  %v11326_v60 = vand.u32 4294901760, %v7588_v55  ;;  %v2533_v30 = vand.u32 4294901760, %v2532_v58 }
 0x167   : > { %2341 = vmatpush.msra.mxu0 %v11324_v37  ;;  %2510 = vmatpush.msra.mxu3 %v2509_v22  ;;  %v2538_v22 = vsub.f32 %v7931_v36, %v2537_v2  ;;  %v11327_v32 = vand.u32 4294901760, %v7604_v1  ;;  %v11329_v58 = vand.u32 4294901760, %v7643_v35 }
 0x168   : > { %2410 = vmatpush.msra.mxu1 %v7613_v17  ;;  %2445 = vmatpush.msra.mxu2 %v7852_v34  ;;  %v7989_v17 = vsub.f32 %v597_v21, %v7967_v31  ;;  %v2550_v55 = vsub.f32 %v7963_v40, %v2549_v26 }
 0x169   : > { %2345 = vmatpush.msra.mxu0 %v11325_v0  ;;  %2516 = vmatpush.msra.mxu3 %v2515_v27  ;;  %v2544_v27 = vsub.f32 %v7947_v57, %v2543_v61  ;;  %v2539_v21 = vand.u32 4294901760, %v2538_v22  ;;  %v11331_v0 = vand.u32 4294901760, %v7665_v16  ;;  %v11334_v16 = vand.u32 4294901760, %v7698_v42  ;;  %v11338_v42 = vld [vmem:[#allocation7_spill] sm:$0xff] }
 0x16a   : > { %2412 = vmatpush.msra.mxu1 %v7628_v4  ;;  %2447 = vmatpush.msra.mxu2 %v7873_v6  ;;  %v2555_v4 = vand.u32 4294901760, %v7978_v14  ;;  %v2561_v37 = vand.u32 4294901760, %v7989_v17  ;;  %v11337_v22 = vand.u32 4294901760, %v7792_v25 }
 0x16b   : > { %2349 = vmatpush.msra.mxu0 %v11326_v60  ;;  %2522 = vmatpush.msra.mxu3 %v2521_v19  ;;  %v2545_v19 = vand.u32 4294901760, %v2544_v27  ;;  %v11339_v60 = vand.u32 4294901760, %v11338_v42 }
 0x16c   : > { %2414 = vmatpush.msra.mxu1 %v7632_v54  ;;  %2449 = vmatpush.msra.mxu2 %v7888_v18  ;;  %v11328_v54 = vand.u32 4294901760, %v7626_v51  ;;  %v2556_v1 = vsub.f32 %v7978_v14, %v2555_v4  ;;  %v2562_v51 = vsub.f32 %v7989_v17, %v2561_v37 }
 0x16d   : > { %2353 = vmatpush.msra.mxu0 %v11327_v32  ;;  %2528 = vmatpush.msra.mxu3 %v2527_v33  ;;  %v11335_v33 = vand.u32 4294901760, %v7776_v9 }
 0x16e   : > { %2416 = vmatpush.msra.mxu1 %v7658_v28  ;;  %2451 = vmatpush.msra.mxu2 %v7904_v46  ;;  %v2551_v28 = vand.u32 4294901760, %v2550_v55  ;;  %v2557_v35 = vand.u32 4294901760, %v2556_v1 }
 0x16f   : > { %2357 = vmatpush.msra.mxu0 %v11328_v54  ;;  %2534 = vmatpush.msra.mxu3 %v2533_v30  ;;  %v11340_v30 = vld [vmem:[#allocation8_spill] sm:$0xff] }
 0x170   : > { %2418 = vmatpush.msra.mxu1 %v7673_v29  ;;  %2453 = vmatpush.msra.mxu2 %v7920_v12  ;;  %v11330_v29 = vand.u32 4294901760, %v7656_v43  ;;  %v11332_v43 = vand.u32 4294901760, %v7686_v39  ;;  %v11336_v39 = vand.u32 4294901760, %v7710_v24  ;;  %v11341_v27 = vand.u32 4294901760, %v11340_v30  ;;  %v590_v24 = vld [vmem:[%s11076_s2 + $0x3d8] sm:$0xff] }
 0x171   : > { %2361 = vmatpush.msra.mxu0 %v11329_v58  ;;  %2540 = vmatpush.msra.mxu3 %v2539_v21 }
 0x172   : > { %2420 = vmatpush.msra.mxu1 %v7688_v49  ;;  %2455 = vmatpush.msra.mxu2 %v7933_v20  ;;  %v2563_v49 = vand.u32 4294901760, %v2562_v51 }
 0x173   : > { %2365 = vmatpush.msra.mxu0 %v11330_v29  ;;  %2546 = vmatpush.msra.mxu3 %v2545_v19  ;;  %v558_v19 = vld [vmem:[%s11076_s2 + $0x2d8] sm:$0xff] }
 0x174   : > { %2422 = vmatpush.msra.mxu1 %v7700_v3  ;;  %2457 = vmatpush.msra.mxu2 %v7954_v5  ;;  %v11333_v3 = vand.u32 4294901760, %v7762_v56 }
 0x175   : > { %2369 = vmatpush.msra.mxu0 %v11331_v0  ;;  %2552 = vmatpush.msra.mxu3 %v2551_v28  ;;  %v550_v28 = vld [vmem:[%s11076_s2 + $0x298] sm:$0xff] }
 0x176   : > { %2424 = vmatmul.f32.vlgmr.msra.gmra.mxu1 %v6825_v59  ;;  %2459 = vmatpush.msra.mxu2 %v7967_v31  ;;  %v8140_v51 = vand.u32 4294901760, %v550_v28 }
 0x177   : > { %2625 = vmatpush.msrb.mxu1 %v7742_v52  ;;  %2373 = vmatpush.msra.mxu0 %v11332_v43 }
 0x178   : > { %2558 = vmatpush.msra.mxu3 %v2557_v35  ;;  %2465 = vmatmul.f32.vlgmr.msra.gmra.mxu2 %v6898_v11  ;;  %v526_v35 = vld [vmem:[%s11076_s2 + $0x1d8] sm:$0xff] }
 0x179   : > { %2627 = vmatpush.msrb.mxu1 %v7750_v7  ;;  %2666 = vmatpush.msrb.mxu2 %v11333_v3 }
 0x17a   : > { %2377 = vmatpush.msra.mxu0 %v11334_v16  ;;  %2564 = vmatpush.msra.mxu3 %v2563_v49  ;;  %v510_v16 = vld [vmem:[%s11076_s2 + $0x158] sm:$0xff] }
 0x17b   : > { %2566 = vmatmul.f32.vlgmr.msra.gmra.mxu3 %v6855_v23  ;;  %2629 = vmatpush.msrb.mxu1 %v7769_v13 }
 0x17c   : > { %2670 = vmatpush.msrb.mxu2 %v11335_v33  ;;  %2733 = vmatpush.msrb.mxu3 %v7742_v52  ;;  %v11342_v52 = vand.u32 4294901760, %v7811_v63  ;;  %v11348_v33 = vld [vmem:[#allocation6_spill] sm:$0xff] }
 0x17d   : > { %2381 = vmatpush.msra.mxu0 %v11336_v39  ;;  %2631 = vmatpush.msrb.mxu1 %v7780_v47  ;;  %v502_v39 = vld [vmem:[%s11076_s2 + $0x118] sm:$0xff] }
 0x17e   : > { %2674 = vmatpush.msrb.mxu2 %v11337_v22  ;;  %2735 = vmatpush.msrb.mxu3 %v7750_v7  ;;  %v11343_v7 = vld [vmem:[#allocation9_spill] sm:$0xff] }
 0x17f   : > { %2385 = vmatpush.msra.mxu0 %v11339_v60  ;;  %2633 = vmatpush.msrb.mxu1 %v7787_v10  ;;  %v11344_v32 = vand.u32 4294901760, %v11343_v7 }
 0x180   : > { %2387 = vmatmul.f32.vlgmr.msra.gmra.mxu0 %v6825_v59  ;;  %2678 = vmatpush.msrb.mxu2 %v11341_v27  ;;  %v8226_v27 = vand.u32 4294901760, %v502_v39 }
 0x181   : > { %2572 = vmatpush.msrb.mxu0 %v7762_v56  ;;  %2737 = vmatpush.msrb.mxu3 %v7769_v13  ;;  %v582_v13 = vld [vmem:[%s11076_s2 + $0x398] sm:$0xff]  ;;  %v8073_v56 = vand.u32 4294901760, %v590_v24 }
 0x182   : > { %2635 = vmatpush.msrb.mxu1 %v7796_v8  ;;  %2682 = vmatpush.msrb.mxu2 %v11342_v52  ;;  %v8083_v21 = vand.u32 4294901760, %v582_v13  ;;  %v494_v52 = vld [vmem:[%s11076_s2 + $0xd8] sm:$0xff] }
 0x183   : > { %2575 = vmatpush.msrb.mxu0 %v7776_v9  ;;  %2739 = vmatpush.msrb.mxu3 %v7780_v47  ;;  %v11345_v9 = vand.u32 4294901760, %v7850_v41  ;;  %v574_v47 = vld [vmem:[%s11076_s2 + $0x358] sm:$0xff]  ;;  %v8094_v55 = vsub.f32 %v590_v24, %v8073_v56 }
 0x184   : > { %2637 = vmatpush.msrb.mxu1 %v7819_v62  ;;  %2686 = vmatpush.msrb.mxu2 %v11344_v32  ;;  %v8096_v54 = vand.u32 4294901760, %v574_v47 }
 0x185   : > { %2578 = vmatpush.msrb.mxu0 %v7792_v25  ;;  %2741 = vmatpush.msrb.mxu3 %v7787_v10  ;;  %v11346_v10 = vand.u32 4294901760, %v7871_v53  ;;  %v566_v25 = vld [vmem:[%s11076_s2 + $0x318] sm:$0xff]  ;;  %v11159_v1 = vand.u32 4294901760, %v8094_v55 }
 0x186   : > { %2639 = vmatpush.msrb.mxu1 %v7835_v48  ;;  %2690 = vmatpush.msrb.mxu2 %v11345_v9  ;;  %v8118_v58 = vsub.f32 %v574_v47, %v8096_v54 }
 0x187   : > { %2581 = vmatpush.msrb.mxu0 %v11340_v30  ;;  %2743 = vmatpush.msrb.mxu3 %v7796_v8  ;;  %v11347_v8 = vand.u32 4294901760, %v7886_v15  ;;  %v8223_v30 = vand.u32 4294901760, %v510_v16 }
 0x188   : > { %2641 = vmatpush.msrb.mxu1 %v7852_v34  ;;  %2694 = vmatpush.msrb.mxu2 %v11346_v10  ;;  %v8253_v10 = vand.u32 4294901760, %v494_v52 }
 0x189   : > { %2584 = vmatpush.msrb.mxu0 %v7811_v63  ;;  %2745 = vmatpush.msrb.mxu3 %v7819_v62  ;;  %v8107_v63 = vsub.f32 %v582_v13, %v8083_v21  ;;  %v8109_v62 = vand.u32 4294901760, %v566_v25  ;;  %v8251_v47 = vsub.f32 %v510_v16, %v8223_v30  ;;  %v1598_v16 = vpop.f32.mrf.mxu2 }
 0x18a   : > { %2643 = vmatpush.msrb.mxu1 %v7873_v6  ;;  %2698 = vmatpush.msrb.mxu2 %v11347_v8  ;;  %v478_v8 = vld [vmem:[%s11076_s2 + $0x58] sm:$0xff] }
 0x18b   : > { %2587 = vmatpush.msrb.mxu0 %v11343_v7  ;;  %2747 = vmatpush.msrb.mxu3 %v7835_v48  ;;  %v8120_v48 = vand.u32 4294901760, %v558_v19 }
 0x18c   : > { %2645 = vmatpush.msrb.mxu1 %v7888_v18  ;;  %2702 = vmatpush.msrb.mxu2 %v2525_v44  ;;  %v8135_v44 = vsub.f32 %v566_v25, %v8109_v62  ;;  %v8257_v25 = vsub.f32 %v502_v39, %v8226_v27 }
 0x18d   : > { %2590 = vmatpush.msrb.mxu0 %v7850_v41  ;;  %2749 = vmatpush.msrb.mxu3 %v7852_v34  ;;  %v542_v41 = vld [vmem:[%s11076_s2 + $0x258] sm:$0xff]  ;;  %v11158_v34 = vand.u32 4294901760, %v8107_v63 }
 0x18e   : > { %2647 = vmatpush.msrb.mxu1 %v7904_v46  ;;  %2706 = vmatpush.msrb.mxu2 %v2531_v38  ;;  %v8149_v38 = vsub.f32 %v558_v19, %v8120_v48  ;;  %v8151_v29 = vand.u32 4294901760, %v542_v41  ;;  %v1544_v19 = vpop.f32.mrf.mxu1 }
 0x18f   : > { %2593 = vmatpush.msrb.mxu0 %v7871_v53  ;;  %2751 = vmatpush.msrb.mxu3 %v7873_v6  ;;  %v2813_v6 = vsub.f32 %v8094_v55, %v11159_v1  ;;  %v11157_v53 = vand.u32 4294901760, %v8118_v58 }
 0x190   : > { %2649 = vmatpush.msrb.mxu1 %v7920_v12  ;;  %2710 = vmatpush.msrb.mxu2 %v2537_v2  ;;  %v534_v2 = vld [vmem:[%s11076_s2 + $0x218] sm:$0xff]  ;;  %v11154_v49 = vand.u32 4294901760, %v8149_v38  ;;  %v8183_v43 = vsub.f32 %v542_v41, %v8151_v29 }
 0x191   : > { %2596 = vmatpush.msrb.mxu0 %v7886_v15  ;;  %2753 = vmatpush.msrb.mxu3 %v7888_v18  ;;  %v2819_v15 = vsub.f32 %v8107_v63, %v11158_v34  ;;  %v11156_v18 = vand.u32 4294901760, %v8135_v44  ;;  %v2825_v0 = vsub.f32 %v8118_v58, %v11157_v53 }
 0x192   : > { %2651 = vmatpush.msrb.mxu1 %v7933_v20  ;;  %2714 = vmatpush.msrb.mxu2 %v2543_v61  ;;  %v8172_v61 = vsub.f32 %v550_v28, %v8140_v51  ;;  %v2837_v42 = vsub.f32 %v8149_v38, %v11154_v49  ;;  %v662_v49 = vld [vmem:[%s11076_s2 + $0x618] sm:$0xff] }
 0x193   : > { %2599 = vmatpush.msrb.mxu0 %v7902_v45  ;;  %2755 = vmatpush.msrb.mxu3 %v7904_v46  ;;  %v8174_v45 = vand.u32 4294901760, %v534_v2  ;;  %v2814_v46 = vand.u32 4294901760, %v2813_v6  ;;  %v2831_v3 = vsub.f32 %v8135_v44, %v11156_v18  ;;  %v2826_v22 = vand.u32 4294901760, %v2825_v0  ;;  %v654_v18 = vld [vmem:[%s11076_s2 + $0x5d8] sm:$0xff] }
 0x194   : > { %2653 = vmatpush.msrb.mxu1 %v7954_v5  ;;  %2718 = vmatpush.msrb.mxu2 %v2549_v26  ;;  %v518_v26 = vld [vmem:[%s11076_s2 + $0x198] sm:$0xff]  ;;  %v2838_v32 = vand.u32 4294901760, %v2837_v42  ;;  %v8430_v1 = vand.u32 4294901760, %v662_v49 }
 0x195   : > { %2602 = vmatpush.msrb.mxu0 %v7918_v50  ;;  %2757 = vmatpush.msrb.mxu3 %v7920_v12  ;;  %v8191_v50 = vand.u32 4294901760, %v526_v35  ;;  %v2820_v12 = vand.u32 4294901760, %v2819_v15 }
 0x196   : > { %2655 = vmatpush.msrb.mxu1 %v7967_v31  ;;  %2722 = vmatpush.msrb.mxu2 %v2555_v4  ;;  %v11153_v4 = vand.u32 4294901760, %v8172_v61 }
 0x197   : > { %2605 = vmatpush.msrb.mxu0 %v7931_v36  ;;  %2759 = vmatpush.msrb.mxu3 %v7933_v20  ;;  %v8206_v36 = vsub.f32 %v534_v2, %v8174_v45  ;;  %v8208_v20 = vand.u32 4294901760, %v518_v26  ;;  %v8221_v60 = vsub.f32 %v526_v35, %v8191_v50  ;;  %v470_v35 = vld [vmem:[%s11076_s2 + $0x18] sm:$0xff] }
 0x198   : > { %2659 = vmatmul.f32.vlgmr.msrb.gmra.mxu1 %v11348_v33  ;;  %2726 = vmatpush.msrb.mxu2 %v2561_v37  ;;  %v11152_v37 = vand.u32 4294901760, %v8183_v43 }
 0x199   : > { %2815 = vmatpush.msra.mxu1 %v2814_v46  ;;  %2608 = vmatpush.msrb.mxu0 %v7947_v57  ;;  %v2832_v57 = vand.u32 4294901760, %v2831_v3  ;;  %v11151_v24 = vand.u32 4294901760, %v8206_v36  ;;  %v8238_v7 = vsub.f32 %v518_v26, %v8208_v20  ;;  %v11150_v9 = vand.u32 4294901760, %v8221_v60  ;;  %v11349_v46 = vld [vmem:[#allocation5_spill] sm:$0xff] }
 0x19a   : > { %2761 = vmatpush.msrb.mxu3 %v7954_v5  ;;  %2728 = vmatmul.f32.vlgmr.msrb.gmra.mxu2 %v6855_v23  ;;  %v2843_v5 = vsub.f32 %v8172_v61, %v11153_v4  ;;  %v2849_v13 = vsub.f32 %v8183_v43, %v11152_v37  ;;  %v11147_v26 = vand.u32 4294901760, %v8251_v47  ;;  %v11143_v3 = vand.u32 4294901760, %v8257_v25 }
 0x19b   : > { %2821 = vmatpush.msra.mxu1 %v2820_v12  ;;  %2913 = vmatpush.msra.mxu2 %v8094_v55  ;;  %v2855_v41 = vsub.f32 %v8206_v36, %v11151_v24  ;;  %v2861_v0 = vsub.f32 %v8221_v60, %v11150_v9  ;;  %v8281_v12 = vsub.f32 %v494_v52, %v8253_v10 }
 0x19c   : > { %2611 = vmatpush.msrb.mxu0 %v7963_v40  ;;  %2763 = vmatpush.msrb.mxu3 %v7967_v31  ;;  %v486_v40 = vld [vmem:[%s11076_s2 + $0x98] sm:$0xff]  ;;  %v1443_v31 = vpop.f32.mrf.mxu0  ;;  %v2844_v28 = vand.u32 4294901760, %v2843_v5  ;;  %v2850_v15 = vand.u32 4294901760, %v2849_v13 }
 0x19d   : > { %2765 = vmatmul.f32.vlgmr.msrb.gmra.mxu3 %v6855_v23  ;;  %2827 = vmatpush.msra.mxu1 %v2826_v22  ;;  %v8268_v6 = vand.u32 4294901760, %v486_v40  ;;  %v1545_v2 = vadd.f32 %v1544_v19, %v1443_v31  ;;  %v2856_v39 = vand.u32 4294901760, %v2855_v41  ;;  %v2862_v5 = vand.u32 4294901760, %v2861_v0 }
 0x19e   : > { %2916 = vmatpush.msra.mxu2 %v8107_v63  ;;  %2966 = vmatpush.msra.mxu3 %v8073_v56  ;;  %v11145_v13 = vand.u32 4294901760, %v8281_v12  ;;  %v2879_v31 = vsub.f32 %v8257_v25, %v11143_v3  ;;  %v710_v3 = vld [vmem:[%s11076_s2 + $0x798] sm:$0xff] }
 0x19f   : > { %2614 = vmatpush.msrb.mxu0 %v7978_v14  ;;  %2833 = vmatpush.msra.mxu1 %v2832_v57  ;;  %v11149_v14 = vand.u32 4294901760, %v8238_v7  ;;  %v8293_v42 = vsub.f32 %v486_v40, %v8268_v6  ;;  %v8295_v57 = vand.u32 4294901760, %v470_v35  ;;  %v1599_v52 = vadd.f32 %v1598_v16, %v1545_v2  ;;  %v1637_v2 = vpop.f32.mrf.mxu3 }
 0x1a0   : > { %2919 = vmatpush.msra.mxu2 %v8118_v58  ;;  %2968 = vmatpush.msra.mxu3 %v8083_v21 }
 0x1a1   : > { %2617 = vmatpush.msrb.mxu0 %v7989_v17  ;;  %2839 = vmatpush.msra.mxu1 %v2838_v32  ;;  %v8283_v17 = vand.u32 4294901760, %v478_v8  ;;  %v2867_v22 = vsub.f32 %v8238_v7, %v11149_v14  ;;  %v2873_v32 = vsub.f32 %v8251_v47, %v11147_v26  ;;  %v8315_v41 = vsub.f32 %v470_v35, %v8295_v57  ;;  %v694_v26 = vld [vmem:[%s11076_s2 + $0x718] sm:$0xff] }
 0x1a2   : > { %2620 = vmatmul.f32.vlgmr.msrb.gmra.mxu0 %v11349_v46  ;;  %2922 = vmatpush.msra.mxu2 %v8135_v44  ;;  %v1638_v0 = vadd.f32 %v1637_v2, %v1599_v52  ;;  %v2885_v35 = vsub.f32 %v8281_v12, %v11145_v13  ;;  %v678_v14 = vld [vmem:[%s11076_s2 + $0x698] sm:$0xff] }
 0x1a3   : > { %2770 = vmatpush.msra.mxu0 %v8073_v56  ;;  %2970 = vmatpush.msra.mxu3 %v8096_v54  ;;  %v8305_v40 = vsub.f32 %v478_v8, %v8283_v17  ;;  %v2868_v19 = vand.u32 4294901760, %v2867_v22  ;;  %11350 = vst [vmem:[#allocation7_spill] sm:$0xff] %v8315_v41  ;;  %v2874_v16 = vand.u32 4294901760, %v2873_v32  ;;  %v2880_v22 = vand.u32 4294901760, %v2879_v31 }
 0x1a4   : > { %2845 = vmatpush.msra.mxu1 %v2844_v28  ;;  %2925 = vmatpush.msra.mxu2 %v8149_v38  ;;  %v11144_v28 = vand.u32 4294901760, %v8293_v42  ;;  %v1706_v8 = vpop.f32.mrf.mxu0  ;;  %v11148_v32 = vand.u32 4294901760, %v8315_v41  ;;  %v2886_v31 = vand.u32 4294901760, %v2885_v35 }
 0x1a5   : > { %2772 = vmatpush.msra.mxu0 %v8083_v21  ;;  %2972 = vmatpush.msra.mxu3 %v8109_v62  ;;  %v1707_v52 = vadd.f32 %v1706_v8, %v1638_v0  ;;  %v8345_v8 = vand.u32 4294901760, %v710_v3  ;;  %v702_v0 = vld [vmem:[%s11076_s2 + $0x758] sm:$0xff] }
 0x1a6   : > { %2851 = vmatpush.msra.mxu1 %v2850_v15  ;;  %2928 = vmatpush.msra.mxu2 %v8172_v61  ;;  %v718_v15 = vld [vmem:[%s11076_s2 + $0x7d8] sm:$0xff]  ;;  %v2903_v35 = vsub.f32 %v8315_v41, %v11148_v32  ;;  %v8375_v32 = vand.u32 4294901760, %v694_v26 }
 0x1a7   : > { %2774 = vmatpush.msra.mxu0 %v8096_v54  ;;  %2974 = vmatpush.msra.mxu3 %v8120_v48  ;;  %v8337_v2 = vand.u32 4294901760, %v718_v15 }
 0x1a8   : > { %2857 = vmatpush.msra.mxu1 %v2856_v39  ;;  %2931 = vmatpush.msra.mxu2 %v8183_v43  ;;  %v11146_v39 = vand.u32 4294901760, %v8305_v40  ;;  %v8399_v37 = vsub.f32 %v694_v26, %v8375_v32 }
 0x1a9   : > { %2776 = vmatpush.msra.mxu0 %v8109_v62  ;;  %2976 = vmatpush.msra.mxu3 %v8140_v51 }
 0x1aa   : > { %2863 = vmatpush.msra.mxu1 %v2862_v5  ;;  %2934 = vmatpush.msra.mxu2 %v8206_v36  ;;  %v2891_v5 = vsub.f32 %v8293_v42, %v11144_v28  ;;  %v1743_v28 = vpop.f32.mrf.mxu1 }
 0x1ab   : > { %2778 = vmatpush.msra.mxu0 %v8120_v48  ;;  %2978 = vmatpush.msra.mxu3 %v8151_v29  ;;  %v1744_v13 = vadd.f32 %v1743_v28, %v1707_v52  ;;  %v8364_v28 = vand.u32 4294901760, %v702_v0 }
 0x1ac   : > { %2869 = vmatpush.msra.mxu1 %v2868_v19  ;;  %2937 = vmatpush.msra.mxu2 %v8221_v60  ;;  %v2897_v19 = vsub.f32 %v8305_v40, %v11146_v39  ;;  %v8357_v39 = vsub.f32 %v718_v15, %v8337_v2  ;;  %v8371_v15 = vsub.f32 %v710_v3, %v8345_v8 }
 0x1ad   : > { %2780 = vmatpush.msra.mxu0 %v8140_v51  ;;  %2980 = vmatpush.msra.mxu3 %v8174_v45  ;;  %v8387_v24 = vsub.f32 %v702_v0, %v8364_v28 }
 0x1ae   : > { %2875 = vmatpush.msra.mxu1 %v2874_v16  ;;  %2940 = vmatpush.msra.mxu2 %v8238_v7  ;;  %v2892_v16 = vand.u32 4294901760, %v2891_v5  ;;  %v2898_v52 = vand.u32 4294901760, %v2897_v19  ;;  %v1784_v5 = vpop.f32.mrf.mxu2  ;;  %v11155_v19 = vand.u32 4294901760, %v8357_v39 }
 0x1af   : > { %2782 = vmatpush.msra.mxu0 %v8151_v29  ;;  %2982 = vmatpush.msra.mxu3 %v8191_v50  ;;  %v1785_v9 = vadd.f32 %v1784_v5, %v1744_v13  ;;  %11351 = vst [vmem:[#allocation8_spill] sm:$0xff] %v8387_v24  ;;  %v11160_v13 = vand.u32 4294901760, %v8371_v15  ;;  %v1885_v5 = vpop.f32.mrf.mxu3 }
 0x1b0   : > { %2881 = vmatpush.msra.mxu1 %v2880_v22  ;;  %2943 = vmatpush.msra.mxu2 %v8251_v47  ;;  %v686_v22 = vld [vmem:[%s11076_s2 + $0x6d8] sm:$0xff] }
 0x1b1   : > { %2784 = vmatpush.msra.mxu0 %v8174_v45  ;;  %2984 = vmatpush.msra.mxu3 %v8208_v20  ;;  %v8382_v3 = vand.u32 4294901760, %v686_v22  ;;  %v1886_v0 = vadd.f32 %v1885_v5, %v1785_v9  ;;  %v646_v9 = vld [vmem:[%s11076_s2 + $0x598] sm:$0xff] }
 0x1b2   : > { %2887 = vmatpush.msra.mxu1 %v2886_v31  ;;  %2946 = vmatpush.msra.mxu2 %v8257_v25  ;;  %v2904_v31 = vand.u32 4294901760, %v2903_v35  ;;  %v670_v35 = vld [vmem:[%s11076_s2 + $0x658] sm:$0xff]  ;;  %v1978_v53 = vpop.f32.mrf.mxu1 }
 0x1b3   : > { %2786 = vmatpush.msra.mxu0 %v8191_v50  ;;  %2986 = vmatpush.msra.mxu3 %v8223_v30  ;;  %v8406_v4 = vsub.f32 %v686_v22, %v8382_v3  ;;  %v3160_v22 = vsub.f32 %v8371_v15, %v11160_v13  ;;  %v11353_v13 = vld [vmem:[#allocation2_spill] sm:$0xff] }
 0x1b4   : > { %2893 = vmatpush.msra.mxu1 %v2892_v16  ;;  %2949 = vmatpush.msra.mxu2 %v8281_v12  ;;  %v8391_v16 = vand.u32 4294901760, %v678_v14 }
 0x1b5   : > { %2788 = vmatpush.msra.mxu0 %v8208_v20  ;;  %2988 = vmatpush.msra.mxu3 %v8226_v27 }
 0x1b6   : > { %2899 = vmatpush.msra.mxu1 %v2898_v52  ;;  %2952 = vmatpush.msra.mxu2 %v8293_v42  ;;  %v3154_v52 = vsub.f32 %v8357_v39, %v11155_v19  ;;  %v8422_v19 = vsub.f32 %v678_v14, %v8391_v16 }
 0x1b7   : > { %2790 = vmatpush.msra.mxu0 %v8223_v30  ;;  %2990 = vmatpush.msra.mxu3 %v8253_v10  ;;  %v2047_v46 = vpop.f32.mrf.mxu2 }
 0x1b8   : > { %2905 = vmatpush.msra.mxu1 %v2904_v31  ;;  %2955 = vmatpush.msra.mxu2 %v8305_v40  ;;  %v8414_v31 = vand.u32 4294901760, %v670_v35  ;;  %11352 = vst [vmem:[#allocation9_spill] sm:$0xff] %v8422_v19 }
 0x1b9   : > { %2792 = vmatpush.msra.mxu0 %v8226_v27  ;;  %2992 = vmatpush.msra.mxu3 %v8268_v6  ;;  %v1939_v26 = vpop.f32.mrf.mxu0 }
 0x1ba   : > { %2907 = vmatmul.f32.vlgmr.msra.gmra.mxu1 %v6825_v59  ;;  %2958 = vmatpush.msra.mxu2 %v8315_v41  ;;  %v1940_v5 = vadd.f32 %v1939_v26, %v1886_v0  ;;  %v3155_v0 = vand.u32 4294901760, %v3154_v52  ;;  %v8444_v33 = vsub.f32 %v670_v35, %v8414_v31  ;;  %v8446_v52 = vand.u32 4294901760, %v654_v18  ;;  %v638_v26 = vld [vmem:[%s11076_s2 + $0x558] sm:$0xff]  ;;  %v2084_v41 = vpop.f32.mrf.mxu3 }
 0x1bb   : > { %3074 = vmatpush.msrb.mxu1 %v8073_v56  ;;  %2794 = vmatpush.msra.mxu0 %v8253_v10  ;;  %v11354_v56 = vand.u32 4294901760, %v8387_v24  ;;  %v11356_v35 = vand.u32 4294901760, %v8399_v37 }
 0x1bc   : > { %2994 = vmatpush.msra.mxu3 %v8283_v17  ;;  %2961 = vmatmul.f32.vlgmr.msra.gmra.mxu2 %v11353_v13  ;;  %v1979_v14 = vadd.f32 %v1978_v53, %v1940_v5  ;;  %v3161_v53 = vand.u32 4294901760, %v3160_v22  ;;  %v11355_v13 = vld [vmem:[#allocation3_spill] sm:$0xff] }
 0x1bd   : > { %3076 = vmatpush.msrb.mxu1 %v8083_v21  ;;  %3111 = vmatpush.msrb.mxu2 %v8337_v2  ;;  %v3166_v34 = vsub.f32 %v8387_v24, %v11354_v56  ;;  %v3172_v56 = vsub.f32 %v8399_v37, %v11356_v35  ;;  %v8460_v24 = vsub.f32 %v662_v49, %v8430_v1  ;;  %v614_v35 = vld [vmem:[%s11076_s2 + $0x498] sm:$0xff] }
 0x1be   : > { %2796 = vmatpush.msra.mxu0 %v8268_v6  ;;  %2996 = vmatpush.msra.mxu3 %v8295_v57  ;;  %v2048_v5 = vadd.f32 %v2047_v46, %v1979_v14  ;;  %v8462_v46 = vand.u32 4294901760, %v646_v9  ;;  %v11357_v14 = vand.u32 4294901760, %v8406_v4 }
 0x1bf   : > { %3000 = vmatmul.f32.vlgmr.msra.gmra.mxu3 %v11355_v13  ;;  %3078 = vmatpush.msrb.mxu1 %v8096_v54  ;;  %v630_v54 = vld [vmem:[%s11076_s2 + $0x518] sm:$0xff]  ;;  %v3167_v49 = vand.u32 4294901760, %v3166_v34  ;;  %v8475_v13 = vsub.f32 %v654_v18, %v8446_v52  ;;  %v3173_v34 = vand.u32 4294901760, %v3172_v56  ;;  %v8522_v56 = vand.u32 4294901760, %v614_v35 }
 0x1c0   : > { %3113 = vmatpush.msrb.mxu2 %v8345_v8  ;;  %3156 = vmatpush.msrb.mxu3 %v3155_v0  ;;  %v2085_v22 = vadd.f32 %v2084_v41, %v2048_v5  ;;  %v3178_v21 = vsub.f32 %v8406_v4, %v11357_v14  ;;  %v8477_v0 = vand.u32 4294901760, %v638_v26  ;;  %v11358_v41 = vand.u32 4294901760, %v8422_v19 }
 0x1c1   : > { %2798 = vmatpush.msra.mxu0 %v8283_v17  ;;  %3080 = vmatpush.msrb.mxu1 %v8109_v62  ;;  %v622_v62 = vld [vmem:[%s11076_s2 + $0x4d8] sm:$0xff]  ;;  %v8491_v14 = vsub.f32 %v646_v9, %v8462_v46 }
 0x1c2   : > { %3115 = vmatpush.msrb.mxu2 %v8364_v28  ;;  %3162 = vmatpush.msrb.mxu3 %v3161_v53  ;;  %6180 = vst [vmem:[%s7863_s4 + $0x8] sm:$0xff] %v2085_v22  ;;  %v3184_v5 = vsub.f32 %v8422_v19, %v11358_v41  ;;  %v8493_v53 = vand.u32 4294901760, %v630_v54  ;;  %v11359_v22 = vld [vmem:[#allocation4_spill] sm:$0xff]  ;;  %v3179_v41 = vand.u32 4294901760, %v3178_v21  ;;  %v11360_v19 = vand.u32 4294901760, %v8094_v55 }
 0x1c3   : > { %2800 = vmatpush.msra.mxu0 %v8295_v57  ;;  %3082 = vmatpush.msrb.mxu1 %v8120_v48  ;;  %v11361_v48 = vand.u32 4294901760, %v8444_v33  ;;  %v8507_v18 = vsub.f32 %v638_v26, %v8477_v0  ;;  %v11362_v55 = vand.u32 4294901760, %v8107_v63  ;;  %v11364_v63 = vand.u32 4294901760, %v8118_v58 }
 0x1c4   : > { %2806 = vmatmul.f32.vlgmr.msra.gmra.mxu0 %v11359_v22  ;;  %3117 = vmatpush.msrb.mxu2 %v8375_v32  ;;  %v8509_v22 = vand.u32 4294901760, %v622_v62  ;;  %v3185_v21 = vand.u32 4294901760, %v3184_v5  ;;  %v8520_v26 = vsub.f32 %v630_v54, %v8493_v53 }
 0x1c5   : > { %3007 = vmatpush.msrb.mxu0 %v11360_v19  ;;  %3168 = vmatpush.msrb.mxu3 %v3167_v49  ;;  %v3190_v9 = vsub.f32 %v8444_v33, %v11361_v48  ;;  %v11363_v19 = vand.u32 4294901760, %v8460_v24  ;;  %v3207_v48 = vand.u32 4294901760, %v8491_v14 }
 0x1c6   : > { %3084 = vmatpush.msrb.mxu1 %v8140_v51  ;;  %3119 = vmatpush.msrb.mxu2 %v8382_v3  ;;  %v606_v51 = vld [vmem:[%s11076_s2 + $0x458] sm:$0xff] }
 0x1c7   : > { %3011 = vmatpush.msrb.mxu0 %v11362_v55  ;;  %3174 = vmatpush.msrb.mxu3 %v3173_v34  ;;  %v3196_v49 = vsub.f32 %v8460_v24, %v11363_v19  ;;  %v3191_v5 = vand.u32 4294901760, %v3190_v9  ;;  %v11365_v34 = vand.u32 4294901760, %v8475_v13  ;;  %v3213_v55 = vand.u32 4294901760, %v8507_v18 }
 0x1c8   : > { %3086 = vmatpush.msrb.mxu1 %v8151_v29  ;;  %3121 = vmatpush.msrb.mxu2 %v8391_v16  ;;  %v8536_v19 = vsub.f32 %v622_v62, %v8509_v22  ;;  %v598_v29 = vld [vmem:[%s11076_s2 + $0x418] sm:$0xff]  ;;  %v8543_v58 = vand.u32 4294901760, %v606_v51  ;;  %v3208_v62 = vsub.f32 %v8491_v14, %v3207_v48 }
 0x1c9   : > { %3015 = vmatpush.msrb.mxu0 %v11364_v63  ;;  %3180 = vmatpush.msrb.mxu3 %v3179_v41  ;;  %v3202_v54 = vsub.f32 %v8475_v13, %v11365_v34  ;;  %v11366_v41 = vand.u32 4294901760, %v8135_v44  ;;  %v3197_v9 = vand.u32 4294901760, %v3196_v49  ;;  %v3219_v63 = vand.u32 4294901760, %v8520_v26 }
 0x1ca   : > { %3088 = vmatpush.msrb.mxu1 %v8174_v45  ;;  %3123 = vmatpush.msrb.mxu2 %v8414_v31  ;;  %v8552_v34 = vsub.f32 %v614_v35, %v8522_v56  ;;  %v8556_v45 = vand.u32 4294901760, %v598_v29  ;;  %v11367_v44 = vand.u32 4294901760, %v8149_v38  ;;  %v3214_v49 = vsub.f32 %v8507_v18, %v3213_v55 }
 0x1cb   : > { %3019 = vmatpush.msrb.mxu0 %v11366_v41  ;;  %3186 = vmatpush.msrb.mxu3 %v3185_v21  ;;  %v3203_v21 = vand.u32 4294901760, %v3202_v54  ;;  %v3225_v41 = vand.u32 4294901760, %v8536_v19  ;;  %v11368_v35 = vand.u32 4294901760, %v8172_v61  ;;  %v3209_v38 = vand.u32 4294901760, %v3208_v62 }
 0x1cc   : > { %3090 = vmatpush.msrb.mxu1 %v8191_v50  ;;  %3125 = vmatpush.msrb.mxu2 %v8430_v1  ;;  %v8567_v50 = vsub.f32 %v606_v51, %v8543_v58  ;;  %v3231_v54 = vand.u32 4294901760, %v8552_v34  ;;  %v11369_v51 = vand.u32 4294901760, %v8183_v43  ;;  %v3215_v61 = vand.u32 4294901760, %v3214_v49 }
 0x1cd   : > { %3023 = vmatpush.msrb.mxu0 %v11367_v44  ;;  %3192 = vmatpush.msrb.mxu3 %v3191_v5  ;;  %v3220_v5 = vsub.f32 %v8520_v26, %v3219_v63  ;;  %v11370_v62 = vand.u32 4294901760, %v8206_v36  ;;  %v11372_v49 = vand.u32 4294901760, %v8238_v7 }
 0x1ce   : > { %3092 = vmatpush.msrb.mxu1 %v8208_v20  ;;  %3127 = vmatpush.msrb.mxu2 %v8446_v52  ;;  %v8578_v20 = vsub.f32 %v598_v29, %v8556_v45  ;;  %v3232_v43 = vsub.f32 %v8552_v34, %v3231_v54 }
 0x1cf   : > { %3027 = vmatpush.msrb.mxu0 %v11368_v35  ;;  %3198 = vmatpush.msrb.mxu3 %v3197_v9  ;;  %v3226_v9 = vsub.f32 %v8536_v19, %v3225_v41  ;;  %v3221_v29 = vand.u32 4294901760, %v3220_v5  ;;  %v11374_v35 = vand.u32 4294901760, %v8257_v25  ;;  %v11377_v25 = vand.u32 4294901760, %v8293_v42  ;;  %v11380_v5 = vld [vmem:[#allocation8_spill] sm:$0xff]  ;;  %v11382_v42 = vld [vmem:[#allocation7_spill] sm:$0xff] }
 0x1d0   : > { %3094 = vmatpush.msrb.mxu1 %v8223_v30  ;;  %3129 = vmatpush.msrb.mxu2 %v8462_v46  ;;  %v3237_v30 = vand.u32 4294901760, %v8567_v50  ;;  %v3243_v44 = vand.u32 4294901760, %v8578_v20 }
 0x1d1   : > { %3031 = vmatpush.msrb.mxu0 %v11369_v51  ;;  %3204 = vmatpush.msrb.mxu3 %v3203_v21  ;;  %v3227_v21 = vand.u32 4294901760, %v3226_v9  ;;  %v11381_v51 = vand.u32 4294901760, %v11380_v5  ;;  %v11384_v9 = vand.u32 4294901760, %v8399_v37 }
 0x1d2   : > { %3096 = vmatpush.msrb.mxu1 %v8226_v27  ;;  %3131 = vmatpush.msrb.mxu2 %v8477_v0  ;;  %v11371_v27 = vand.u32 4294901760, %v8221_v60  ;;  %v3238_v36 = vsub.f32 %v8567_v50, %v3237_v30  ;;  %v3244_v60 = vsub.f32 %v8578_v20, %v3243_v44 }
 0x1d3   : > { %3035 = vmatpush.msrb.mxu0 %v11370_v62  ;;  %3210 = vmatpush.msrb.mxu3 %v3209_v38  ;;  %v11378_v38 = vand.u32 4294901760, %v8371_v15 }
 0x1d4   : > { %3098 = vmatpush.msrb.mxu1 %v8253_v10  ;;  %3133 = vmatpush.msrb.mxu2 %v8493_v53  ;;  %v3233_v10 = vand.u32 4294901760, %v3232_v43  ;;  %v3239_v7 = vand.u32 4294901760, %v3238_v36  ;;  %v567_v43 = vld [vmem:[%s11076_s2 + $0x320] sm:$0xff] }
 0x1d5   : > { %3039 = vmatpush.msrb.mxu0 %v11371_v27  ;;  %3216 = vmatpush.msrb.mxu3 %v3215_v61  ;;  %v11383_v61 = vand.u32 4294901760, %v11382_v42 }
 0x1d6   : > { %3100 = vmatpush.msrb.mxu1 %v8268_v6  ;;  %3135 = vmatpush.msrb.mxu2 %v8509_v22  ;;  %v11373_v6 = vand.u32 4294901760, %v8251_v47  ;;  %v11375_v47 = vand.u32 4294901760, %v8281_v12  ;;  %v11379_v12 = vand.u32 4294901760, %v8305_v40  ;;  %v11385_v40 = vand.u32 4294901760, %v8406_v4 }
 0x1d7   : > { %3043 = vmatpush.msrb.mxu0 %v11372_v49  ;;  %3222 = vmatpush.msrb.mxu3 %v3221_v29 }
 0x1d8   : > { %3102 = vmatpush.msrb.mxu1 %v8283_v17  ;;  %3137 = vmatpush.msrb.mxu2 %v8522_v56  ;;  %v3245_v17 = vand.u32 4294901760, %v3244_v60 }
 0x1d9   : > { %3047 = vmatpush.msrb.mxu0 %v11373_v6  ;;  %3228 = vmatpush.msrb.mxu3 %v3227_v21  ;;  %v559_v21 = vld [vmem:[%s11076_s2 + $0x2e0] sm:$0xff] }
 0x1da   : > { %3104 = vmatpush.msrb.mxu1 %v8295_v57  ;;  %3139 = vmatpush.msrb.mxu2 %v8543_v58  ;;  %v11376_v57 = vand.u32 4294901760, %v8357_v39 }
 0x1db   : > { %3051 = vmatpush.msrb.mxu0 %v11374_v35  ;;  %3234 = vmatpush.msrb.mxu3 %v3233_v10  ;;  %v551_v10 = vld [vmem:[%s11076_s2 + $0x2a0] sm:$0xff] }
 0x1dc   : > { %3106 = vmatmul.f32.vlgmr.msrb.gmra.mxu1 %v6825_v59  ;;  %3141 = vmatpush.msrb.mxu2 %v8556_v45  ;;  %v8729_v60 = vand.u32 4294901760, %v551_v10 }
 0x1dd   : > { %3307 = vmatpush.msra.mxu1 %v8337_v2  ;;  %3055 = vmatpush.msrb.mxu0 %v11375_v47 }
 0x1de   : > { %3240 = vmatpush.msrb.mxu3 %v3239_v7  ;;  %3147 = vmatmul.f32.vlgmr.msrb.gmra.mxu2 %v6898_v11  ;;  %v527_v7 = vld [vmem:[%s11076_s2 + $0x1e0] sm:$0xff] }
 0x1df   : > { %3309 = vmatpush.msra.mxu1 %v8345_v8  ;;  %3348 = vmatpush.msra.mxu2 %v11376_v57 }
 0x1e0   : > { %3059 = vmatpush.msrb.mxu0 %v11377_v25  ;;  %3246 = vmatpush.msrb.mxu3 %v3245_v17  ;;  %v511_v25 = vld [vmem:[%s11076_s2 + $0x160] sm:$0xff] }
 0x1e1   : > { %3248 = vmatmul.f32.vlgmr.msrb.gmra.mxu3 %v6855_v23  ;;  %3311 = vmatpush.msra.mxu1 %v8364_v28 }
 0x1e2   : > { %3352 = vmatpush.msra.mxu2 %v11378_v38  ;;  %3415 = vmatpush.msra.mxu3 %v8337_v2  ;;  %v591_v2 = vld [vmem:[%s11076_s2 + $0x3e0] sm:$0xff] }
 0x1e3   : > { %3063 = vmatpush.msrb.mxu0 %v11379_v12  ;;  %3313 = vmatpush.msra.mxu1 %v8375_v32  ;;  %v11391_v38 = vld [vmem:[#allocation6_spill] sm:$0xff] }
 0x1e4   : > { %3356 = vmatpush.msra.mxu2 %v11381_v51  ;;  %3417 = vmatpush.msra.mxu3 %v8345_v8  ;;  %v11386_v8 = vld [vmem:[#allocation9_spill] sm:$0xff]  ;;  %v503_v12 = vld [vmem:[%s11076_s2 + $0x120] sm:$0xff] }
 0x1e5   : > { %3067 = vmatpush.msrb.mxu0 %v11383_v61  ;;  %3315 = vmatpush.msra.mxu1 %v8382_v3  ;;  %v11387_v62 = vand.u32 4294901760, %v11386_v8  ;;  %v8812_v61 = vand.u32 4294901760, %v511_v25 }
 0x1e6   : > { %3069 = vmatmul.f32.vlgmr.msrb.gmra.mxu0 %v6825_v59  ;;  %3360 = vmatpush.msra.mxu2 %v11384_v9  ;;  %v8815_v9 = vand.u32 4294901760, %v503_v12 }
 0x1e7   : > { %3254 = vmatpush.msra.mxu0 %v8357_v39  ;;  %3419 = vmatpush.msra.mxu3 %v8364_v28  ;;  %v583_v39 = vld [vmem:[%s11076_s2 + $0x3a0] sm:$0xff]  ;;  %v8662_v28 = vand.u32 4294901760, %v591_v2 }
 0x1e8   : > { %3317 = vmatpush.msra.mxu1 %v8391_v16  ;;  %3364 = vmatpush.msra.mxu2 %v11385_v40  ;;  %v8672_v29 = vand.u32 4294901760, %v583_v39  ;;  %v495_v40 = vld [vmem:[%s11076_s2 + $0xe0] sm:$0xff] }
 0x1e9   : > { %3257 = vmatpush.msra.mxu0 %v8371_v15  ;;  %3421 = vmatpush.msra.mxu3 %v8375_v32  ;;  %v11388_v15 = vand.u32 4294901760, %v8444_v33  ;;  %v575_v32 = vld [vmem:[%s11076_s2 + $0x360] sm:$0xff]  ;;  %v8683_v27 = vsub.f32 %v591_v2, %v8662_v28 }
 0x1ea   : > { %3319 = vmatpush.msra.mxu1 %v8414_v31  ;;  %3368 = vmatpush.msra.mxu2 %v11387_v62 }
 0x1eb   : > { %3260 = vmatpush.msra.mxu0 %v11380_v5  ;;  %3423 = vmatpush.msra.mxu3 %v8382_v3  ;;  %v11389_v3 = vand.u32 4294901760, %v8460_v24  ;;  %v11182_v36 = vand.u32 4294901760, %v8683_v27 }
 0x1ec   : > { %3321 = vmatpush.msra.mxu1 %v8430_v1  ;;  %3372 = vmatpush.msra.mxu2 %v11388_v15 }
 0x1ed   : > { %3263 = vmatpush.msra.mxu0 %v8399_v37  ;;  %3425 = vmatpush.msra.mxu3 %v8391_v16  ;;  %v8685_v37 = vand.u32 4294901760, %v575_v32  ;;  %v11390_v16 = vand.u32 4294901760, %v8475_v13 }
 0x1ee   : > { %3323 = vmatpush.msra.mxu1 %v8446_v52  ;;  %3376 = vmatpush.msra.mxu2 %v11389_v3  ;;  %v8842_v3 = vand.u32 4294901760, %v495_v40 }
 0x1ef   : > { %3266 = vmatpush.msra.mxu0 %v8406_v4  ;;  %3427 = vmatpush.msra.mxu3 %v8414_v31  ;;  %v8696_v4 = vsub.f32 %v583_v39, %v8672_v29  ;;  %v8698_v31 = vand.u32 4294901760, %v567_v43  ;;  %v8707_v49 = vsub.f32 %v575_v32, %v8685_v37  ;;  %v8840_v32 = vsub.f32 %v511_v25, %v8812_v61  ;;  %v2280_v25 = vpop.f32.mrf.mxu2 }
 0x1f0   : > { %3325 = vmatpush.msra.mxu1 %v8462_v46  ;;  %3380 = vmatpush.msra.mxu2 %v11390_v16  ;;  %v479_v16 = vld [vmem:[%s11076_s2 + $0x60] sm:$0xff] }
 0x1f1   : > { %3269 = vmatpush.msra.mxu0 %v11386_v8  ;;  %3429 = vmatpush.msra.mxu3 %v8430_v1  ;;  %v8709_v1 = vand.u32 4294901760, %v559_v21 }
 0x1f2   : > { %3327 = vmatpush.msra.mxu1 %v8477_v0  ;;  %3384 = vmatpush.msra.mxu2 %v3207_v48  ;;  %v8724_v48 = vsub.f32 %v567_v43, %v8698_v31  ;;  %v8846_v43 = vsub.f32 %v503_v12, %v8815_v9 }
 0x1f3   : > { %3272 = vmatpush.msra.mxu0 %v8444_v33  ;;  %3431 = vmatpush.msra.mxu3 %v8446_v52  ;;  %v543_v33 = vld [vmem:[%s11076_s2 + $0x260] sm:$0xff]  ;;  %v11181_v52 = vand.u32 4294901760, %v8696_v4 }
 0x1f4   : > { %3329 = vmatpush.msra.mxu1 %v8493_v53  ;;  %3388 = vmatpush.msra.mxu2 %v3213_v55  ;;  %v8738_v55 = vsub.f32 %v559_v21, %v8709_v1  ;;  %v8740_v6 = vand.u32 4294901760, %v543_v33  ;;  %v2226_v21 = vpop.f32.mrf.mxu1 }
 0x1f5   : > { %3275 = vmatpush.msra.mxu0 %v8460_v24  ;;  %3433 = vmatpush.msra.mxu3 %v8462_v46  ;;  %v3495_v24 = vsub.f32 %v8683_v27, %v11182_v36  ;;  %v11180_v46 = vand.u32 4294901760, %v8707_v49 }
 0x1f6   : > { %3331 = vmatpush.msra.mxu1 %v8509_v22  ;;  %3392 = vmatpush.msra.mxu2 %v3219_v63  ;;  %v535_v63 = vld [vmem:[%s11076_s2 + $0x220] sm:$0xff]  ;;  %v11177_v17 = vand.u32 4294901760, %v8738_v55  ;;  %v8772_v47 = vsub.f32 %v543_v33, %v8740_v6 }
 0x1f7   : > { %3278 = vmatpush.msra.mxu0 %v8475_v13  ;;  %3435 = vmatpush.msra.mxu3 %v8477_v0  ;;  %v3501_v13 = vsub.f32 %v8696_v4, %v11181_v52  ;;  %v11179_v0 = vand.u32 4294901760, %v8724_v48  ;;  %v3507_v35 = vsub.f32 %v8707_v49, %v11180_v46 }
 0x1f8   : > { %3333 = vmatpush.msra.mxu1 %v8522_v56  ;;  %3396 = vmatpush.msra.mxu2 %v3225_v41  ;;  %v8761_v41 = vsub.f32 %v551_v10, %v8729_v60  ;;  %v3519_v51 = vsub.f32 %v8738_v55, %v11177_v17  ;;  %v663_v17 = vld [vmem:[%s11076_s2 + $0x620] sm:$0xff] }
 0x1f9   : > { %3281 = vmatpush.msra.mxu0 %v8491_v14  ;;  %3437 = vmatpush.msra.mxu3 %v8493_v53  ;;  %v8763_v14 = vand.u32 4294901760, %v535_v63  ;;  %v3496_v53 = vand.u32 4294901760, %v3495_v24  ;;  %v3513_v57 = vsub.f32 %v8724_v48, %v11179_v0  ;;  %v3508_v5 = vand.u32 4294901760, %v3507_v35  ;;  %v655_v0 = vld [vmem:[%s11076_s2 + $0x5e0] sm:$0xff] }
 0x1fa   : > { %3335 = vmatpush.msra.mxu1 %v8543_v58  ;;  %3400 = vmatpush.msra.mxu2 %v3231_v54  ;;  %v519_v54 = vld [vmem:[%s11076_s2 + $0x1a0] sm:$0xff]  ;;  %v3520_v62 = vand.u32 4294901760, %v3519_v51  ;;  %v9019_v36 = vand.u32 4294901760, %v663_v17 }
 0x1fb   : > { %3284 = vmatpush.msra.mxu0 %v8507_v18  ;;  %3439 = vmatpush.msra.mxu3 %v8509_v22  ;;  %v8780_v18 = vand.u32 4294901760, %v527_v7  ;;  %v3502_v22 = vand.u32 4294901760, %v3501_v13 }
 0x1fc   : > { %3337 = vmatpush.msra.mxu1 %v8556_v45  ;;  %3404 = vmatpush.msra.mxu2 %v3237_v30  ;;  %v11176_v30 = vand.u32 4294901760, %v8761_v41 }
 0x1fd   : > { %3287 = vmatpush.msra.mxu0 %v8520_v26  ;;  %3441 = vmatpush.msra.mxu3 %v8522_v56  ;;  %v8795_v26 = vsub.f32 %v535_v63, %v8763_v14  ;;  %v8797_v56 = vand.u32 4294901760, %v519_v54  ;;  %v8810_v42 = vsub.f32 %v527_v7, %v8780_v18  ;;  %v471_v7 = vld [vmem:[%s11076_s2 + $0x20] sm:$0xff] }
 0x1fe   : > { %3341 = vmatmul.f32.vlgmr.msra.gmra.mxu1 %v11391_v38  ;;  %3408 = vmatpush.msra.mxu2 %v3243_v44  ;;  %v11175_v44 = vand.u32 4294901760, %v8772_v47 }
 0x1ff   : > { %3497 = vmatpush.msrb.mxu1 %v3496_v53  ;;  %3290 = vmatpush.msra.mxu0 %v8536_v19  ;;  %v3514_v19 = vand.u32 4294901760, %v3513_v57  ;;  %v11174_v2 = vand.u32 4294901760, %v8795_v26  ;;  %v8827_v8 = vsub.f32 %v519_v54, %v8797_v56  ;;  %v11173_v15 = vand.u32 4294901760, %v8810_v42  ;;  %v11392_v53 = vld [vmem:[#allocation5_spill] sm:$0xff] }
 0x200   : > { %3443 = vmatpush.msra.mxu3 %v8543_v58  ;;  %3410 = vmatmul.f32.vlgmr.msra.gmra.mxu2 %v6855_v23  ;;  %v3525_v58 = vsub.f32 %v8761_v41, %v11176_v30  ;;  %v3531_v39 = vsub.f32 %v8772_v47, %v11175_v44  ;;  %v11170_v54 = vand.u32 4294901760, %v8840_v32  ;;  %v11166_v57 = vand.u32 4294901760, %v8846_v43 }
 0x201   : > { %3503 = vmatpush.msrb.mxu1 %v3502_v22  ;;  %3595 = vmatpush.msrb.mxu2 %v8683_v27  ;;  %v3537_v33 = vsub.f32 %v8795_v26, %v11174_v2  ;;  %v3543_v35 = vsub.f32 %v8810_v42, %v11173_v15  ;;  %v8870_v22 = vsub.f32 %v495_v40, %v8842_v3 }
 0x202   : > { %3293 = vmatpush.msra.mxu0 %v8552_v34  ;;  %3445 = vmatpush.msra.mxu3 %v8556_v45  ;;  %v487_v34 = vld [vmem:[%s11076_s2 + $0xa0] sm:$0xff]  ;;  %v2125_v45 = vpop.f32.mrf.mxu0  ;;  %v3526_v10 = vand.u32 4294901760, %v3525_v58  ;;  %v3532_v13 = vand.u32 4294901760, %v3531_v39 }
 0x203   : > { %3447 = vmatmul.f32.vlgmr.msra.gmra.mxu3 %v6855_v23  ;;  %3509 = vmatpush.msrb.mxu1 %v3508_v5  ;;  %v8857_v24 = vand.u32 4294901760, %v487_v34  ;;  %v2227_v63 = vadd.f32 %v2226_v21, %v2125_v45  ;;  %v3538_v12 = vand.u32 4294901760, %v3537_v33  ;;  %v3544_v58 = vand.u32 4294901760, %v3543_v35 }
 0x204   : > { %3598 = vmatpush.msrb.mxu2 %v8696_v4  ;;  %3648 = vmatpush.msrb.mxu3 %v8662_v28  ;;  %v11168_v39 = vand.u32 4294901760, %v8870_v22  ;;  %v3561_v45 = vsub.f32 %v8846_v43, %v11166_v57  ;;  %v711_v57 = vld [vmem:[%s11076_s2 + $0x7a0] sm:$0xff] }
 0x205   : > { %3296 = vmatpush.msra.mxu0 %v8567_v50  ;;  %3515 = vmatpush.msrb.mxu1 %v3514_v19  ;;  %v11172_v50 = vand.u32 4294901760, %v8827_v8  ;;  %v8882_v51 = vsub.f32 %v487_v34, %v8857_v24  ;;  %v8884_v19 = vand.u32 4294901760, %v471_v7  ;;  %v2281_v40 = vadd.f32 %v2280_v25, %v2227_v63  ;;  %v2319_v63 = vpop.f32.mrf.mxu3 }
 0x206   : > { %3601 = vmatpush.msrb.mxu2 %v8707_v49  ;;  %3650 = vmatpush.msrb.mxu3 %v8672_v29 }
 0x207   : > { %3299 = vmatpush.msra.mxu0 %v8578_v20  ;;  %3521 = vmatpush.msrb.mxu1 %v3520_v62  ;;  %v8872_v20 = vand.u32 4294901760, %v479_v16  ;;  %v3549_v5 = vsub.f32 %v8827_v8, %v11172_v50  ;;  %v3555_v62 = vsub.f32 %v8840_v32, %v11170_v54  ;;  %v8904_v33 = vsub.f32 %v471_v7, %v8884_v19  ;;  %v695_v54 = vld [vmem:[%s11076_s2 + $0x720] sm:$0xff] }
 0x208   : > { %3302 = vmatmul.f32.vlgmr.msra.gmra.mxu0 %v11392_v53  ;;  %3604 = vmatpush.msrb.mxu2 %v8724_v48  ;;  %v2320_v35 = vadd.f32 %v2319_v63, %v2281_v40  ;;  %v3567_v7 = vsub.f32 %v8870_v22, %v11168_v39  ;;  %v679_v50 = vld [vmem:[%s11076_s2 + $0x6a0] sm:$0xff] }
 0x209   : > { %3452 = vmatpush.msrb.mxu0 %v8662_v28  ;;  %3652 = vmatpush.msrb.mxu3 %v8685_v37  ;;  %v8894_v34 = vsub.f32 %v479_v16, %v8872_v20  ;;  %v3550_v21 = vand.u32 4294901760, %v3549_v5  ;;  %11393 = vst [vmem:[#allocation8_spill] sm:$0xff] %v8904_v33  ;;  %v3556_v25 = vand.u32 4294901760, %v3555_v62  ;;  %v3562_v5 = vand.u32 4294901760, %v3561_v45 }
 0x20a   : > { %3527 = vmatpush.msrb.mxu1 %v3526_v10  ;;  %3607 = vmatpush.msrb.mxu2 %v8738_v55  ;;  %v11167_v10 = vand.u32 4294901760, %v8882_v51  ;;  %v2388_v16 = vpop.f32.mrf.mxu0  ;;  %v11171_v62 = vand.u32 4294901760, %v8904_v33  ;;  %v3568_v45 = vand.u32 4294901760, %v3567_v7 }
 0x20b   : > { %3454 = vmatpush.msrb.mxu0 %v8672_v29  ;;  %3654 = vmatpush.msrb.mxu3 %v8698_v31  ;;  %v2389_v40 = vadd.f32 %v2388_v16, %v2320_v35  ;;  %v8934_v16 = vand.u32 4294901760, %v711_v57  ;;  %v703_v35 = vld [vmem:[%s11076_s2 + $0x760] sm:$0xff] }
 0x20c   : > { %3533 = vmatpush.msrb.mxu1 %v3532_v13  ;;  %3610 = vmatpush.msrb.mxu2 %v8761_v41  ;;  %v719_v13 = vld [vmem:[%s11076_s2 + $0x7e0] sm:$0xff]  ;;  %v3585_v7 = vsub.f32 %v8904_v33, %v11171_v62  ;;  %v8964_v62 = vand.u32 4294901760, %v695_v54 }
 0x20d   : > { %3456 = vmatpush.msrb.mxu0 %v8685_v37  ;;  %3656 = vmatpush.msrb.mxu3 %v8709_v1  ;;  %v8926_v63 = vand.u32 4294901760, %v719_v13 }
 0x20e   : > { %3539 = vmatpush.msrb.mxu1 %v3538_v12  ;;  %3613 = vmatpush.msrb.mxu2 %v8772_v47  ;;  %v11169_v12 = vand.u32 4294901760, %v8894_v34  ;;  %v8988_v44 = vsub.f32 %v695_v54, %v8964_v62 }
 0x20f   : > { %3458 = vmatpush.msrb.mxu0 %v8698_v31  ;;  %3658 = vmatpush.msrb.mxu3 %v8729_v60 }
 0x210   : > { %3545 = vmatpush.msrb.mxu1 %v3544_v58  ;;  %3616 = vmatpush.msrb.mxu2 %v8795_v26  ;;  %v3573_v58 = vsub.f32 %v8882_v51, %v11167_v10  ;;  %v2425_v10 = vpop.f32.mrf.mxu1 }
 0x211   : > { %3460 = vmatpush.msrb.mxu0 %v8709_v1  ;;  %3660 = vmatpush.msrb.mxu3 %v8740_v6  ;;  %v2426_v39 = vadd.f32 %v2425_v10, %v2389_v40  ;;  %v8953_v10 = vand.u32 4294901760, %v703_v35 }
 0x212   : > { %3551 = vmatpush.msrb.mxu1 %v3550_v21  ;;  %3619 = vmatpush.msrb.mxu2 %v8810_v42  ;;  %v3579_v21 = vsub.f32 %v8894_v34, %v11169_v12  ;;  %v8946_v12 = vsub.f32 %v719_v13, %v8926_v63  ;;  %v8960_v13 = vsub.f32 %v711_v57, %v8934_v16 }
 0x213   : > { %3462 = vmatpush.msrb.mxu0 %v8729_v60  ;;  %3662 = vmatpush.msrb.mxu3 %v8763_v14  ;;  %v8976_v2 = vsub.f32 %v703_v35, %v8953_v10 }
 0x214   : > { %3557 = vmatpush.msrb.mxu1 %v3556_v25  ;;  %3622 = vmatpush.msrb.mxu2 %v8827_v8  ;;  %v3574_v25 = vand.u32 4294901760, %v3573_v58  ;;  %v3580_v40 = vand.u32 4294901760, %v3579_v21  ;;  %v2466_v58 = vpop.f32.mrf.mxu2  ;;  %v11178_v21 = vand.u32 4294901760, %v8946_v12 }
 0x215   : > { %3464 = vmatpush.msrb.mxu0 %v8740_v6  ;;  %3664 = vmatpush.msrb.mxu3 %v8780_v18  ;;  %v2467_v15 = vadd.f32 %v2466_v58, %v2426_v39  ;;  %11394 = vst [vmem:[#allocation7_spill] sm:$0xff] %v8976_v2  ;;  %v11183_v39 = vand.u32 4294901760, %v8960_v13  ;;  %v2567_v58 = vpop.f32.mrf.mxu3 }
 0x216   : > { %3563 = vmatpush.msrb.mxu1 %v3562_v5  ;;  %3625 = vmatpush.msrb.mxu2 %v8840_v32  ;;  %v687_v5 = vld [vmem:[%s11076_s2 + $0x6e0] sm:$0xff] }
 0x217   : > { %3466 = vmatpush.msrb.mxu0 %v8763_v14  ;;  %3666 = vmatpush.msrb.mxu3 %v8797_v56  ;;  %v8971_v57 = vand.u32 4294901760, %v687_v5  ;;  %v2568_v35 = vadd.f32 %v2567_v58, %v2467_v15  ;;  %v647_v15 = vld [vmem:[%s11076_s2 + $0x5a0] sm:$0xff] }
 0x218   : > { %3569 = vmatpush.msrb.mxu1 %v3568_v45  ;;  %3628 = vmatpush.msrb.mxu2 %v8846_v43  ;;  %v3586_v45 = vand.u32 4294901760, %v3585_v7  ;;  %v671_v7 = vld [vmem:[%s11076_s2 + $0x660] sm:$0xff]  ;;  %v2660_v46 = vpop.f32.mrf.mxu1 }
 0x219   : > { %3468 = vmatpush.msrb.mxu0 %v8780_v18  ;;  %3668 = vmatpush.msrb.mxu3 %v8812_v61  ;;  %v8995_v30 = vsub.f32 %v687_v5, %v8971_v57  ;;  %v3842_v5 = vsub.f32 %v8960_v13, %v11183_v39  ;;  %v11396_v39 = vld [vmem:[#allocation2_spill] sm:$0xff] }
 0x21a   : > { %3575 = vmatpush.msrb.mxu1 %v3574_v25  ;;  %3631 = vmatpush.msrb.mxu2 %v8870_v22  ;;  %v8980_v25 = vand.u32 4294901760, %v679_v50 }
 0x21b   : > { %3470 = vmatpush.msrb.mxu0 %v8797_v56  ;;  %3670 = vmatpush.msrb.mxu3 %v8815_v9 }
 0x21c   : > { %3581 = vmatpush.msrb.mxu1 %v3580_v40  ;;  %3634 = vmatpush.msrb.mxu2 %v8882_v51  ;;  %v3836_v40 = vsub.f32 %v8946_v12, %v11178_v21  ;;  %v9011_v21 = vsub.f32 %v679_v50, %v8980_v25 }
 0x21d   : > { %3472 = vmatpush.msrb.mxu0 %v8812_v61  ;;  %3672 = vmatpush.msrb.mxu3 %v8842_v3  ;;  %v2729_v53 = vpop.f32.mrf.mxu2 }
 0x21e   : > { %3587 = vmatpush.msrb.mxu1 %v3586_v45  ;;  %3637 = vmatpush.msrb.mxu2 %v8894_v34  ;;  %v9003_v45 = vand.u32 4294901760, %v671_v7  ;;  %11395 = vst [vmem:[#allocation9_spill] sm:$0xff] %v9011_v21 }
 0x21f   : > { %3474 = vmatpush.msrb.mxu0 %v8815_v9  ;;  %3674 = vmatpush.msrb.mxu3 %v8857_v24  ;;  %v2621_v54 = vpop.f32.mrf.mxu0 }
 0x220   : > { %3589 = vmatmul.f32.vlgmr.msrb.gmra.mxu1 %v6825_v59  ;;  %3640 = vmatpush.msrb.mxu2 %v8904_v33  ;;  %v2622_v58 = vadd.f32 %v2621_v54, %v2568_v35  ;;  %v3837_v35 = vand.u32 4294901760, %v3836_v40  ;;  %v9033_v38 = vsub.f32 %v671_v7, %v9003_v45  ;;  %v9035_v40 = vand.u32 4294901760, %v655_v0  ;;  %v639_v54 = vld [vmem:[%s11076_s2 + $0x560] sm:$0xff]  ;;  %v2766_v33 = vpop.f32.mrf.mxu3 }
 0x221   : > { %3756 = vmatpush.msra.mxu1 %v8662_v28  ;;  %3476 = vmatpush.msrb.mxu0 %v8842_v3  ;;  %v11397_v28 = vand.u32 4294901760, %v8976_v2  ;;  %v11399_v7 = vand.u32 4294901760, %v8988_v44 }
 0x222   : > { %3676 = vmatpush.msrb.mxu3 %v8872_v20  ;;  %3643 = vmatmul.f32.vlgmr.msrb.gmra.mxu2 %v11396_v39  ;;  %v2661_v50 = vadd.f32 %v2660_v46, %v2622_v58  ;;  %v3843_v46 = vand.u32 4294901760, %v3842_v5  ;;  %v11398_v39 = vld [vmem:[#allocation3_spill] sm:$0xff] }
 0x223   : > { %3758 = vmatpush.msra.mxu1 %v8672_v29  ;;  %3793 = vmatpush.msra.mxu2 %v8926_v63  ;;  %v3848_v52 = vsub.f32 %v8976_v2, %v11397_v28  ;;  %v3854_v28 = vsub.f32 %v8988_v44, %v11399_v7  ;;  %v9049_v2 = vsub.f32 %v663_v17, %v9019_v36  ;;  %v615_v7 = vld [vmem:[%s11076_s2 + $0x4a0] sm:$0xff] }
 0x224   : > { %3478 = vmatpush.msrb.mxu0 %v8857_v24  ;;  %3678 = vmatpush.msrb.mxu3 %v8884_v19  ;;  %v2730_v58 = vadd.f32 %v2729_v53, %v2661_v50  ;;  %v9051_v53 = vand.u32 4294901760, %v647_v15  ;;  %v11400_v50 = vand.u32 4294901760, %v8995_v30 }
 0x225   : > { %3682 = vmatmul.f32.vlgmr.msrb.gmra.mxu3 %v11398_v39  ;;  %3760 = vmatpush.msra.mxu1 %v8685_v37  ;;  %v631_v37 = vld [vmem:[%s11076_s2 + $0x520] sm:$0xff]  ;;  %v3849_v17 = vand.u32 4294901760, %v3848_v52  ;;  %v9064_v39 = vsub.f32 %v655_v0, %v9035_v40  ;;  %v3855_v52 = vand.u32 4294901760, %v3854_v28  ;;  %v9111_v28 = vand.u32 4294901760, %v615_v7 }
 0x226   : > { %3795 = vmatpush.msra.mxu2 %v8934_v16  ;;  %3838 = vmatpush.msra.mxu3 %v3837_v35  ;;  %v2767_v5 = vadd.f32 %v2766_v33, %v2730_v58  ;;  %v3860_v29 = vsub.f32 %v8995_v30, %v11400_v50  ;;  %v9066_v35 = vand.u32 4294901760, %v639_v54  ;;  %v11401_v33 = vand.u32 4294901760, %v9011_v21 }
 0x227   : > { %3480 = vmatpush.msrb.mxu0 %v8872_v20  ;;  %3762 = vmatpush.msra.mxu1 %v8698_v31  ;;  %v623_v31 = vld [vmem:[%s11076_s2 + $0x4e0] sm:$0xff]  ;;  %v9080_v50 = vsub.f32 %v647_v15, %v9051_v53 }
 0x228   : > { %3797 = vmatpush.msra.mxu2 %v8953_v10  ;;  %3844 = vmatpush.msra.mxu3 %v3843_v46  ;;  %6181 = vst [vmem:[%s7863_s4 + $0x10] sm:$0xff] %v2767_v5  ;;  %v3866_v58 = vsub.f32 %v9011_v21, %v11401_v33  ;;  %v9082_v46 = vand.u32 4294901760, %v631_v37  ;;  %v11402_v5 = vld [vmem:[#allocation4_spill] sm:$0xff]  ;;  %v3861_v33 = vand.u32 4294901760, %v3860_v29  ;;  %v11403_v21 = vand.u32 4294901760, %v8683_v27 }
 0x229   : > { %3482 = vmatpush.msrb.mxu0 %v8884_v19  ;;  %3764 = vmatpush.msra.mxu1 %v8709_v1  ;;  %v11404_v1 = vand.u32 4294901760, %v9033_v38  ;;  %v9096_v0 = vsub.f32 %v639_v54, %v9066_v35  ;;  %v11405_v27 = vand.u32 4294901760, %v8696_v4  ;;  %v11407_v4 = vand.u32 4294901760, %v8707_v49 }
 0x22a   : > { %3488 = vmatmul.f32.vlgmr.msrb.gmra.mxu0 %v11402_v5  ;;  %3799 = vmatpush.msra.mxu2 %v8964_v62  ;;  %v9098_v5 = vand.u32 4294901760, %v623_v31  ;;  %v3867_v29 = vand.u32 4294901760, %v3866_v58  ;;  %v9109_v54 = vsub.f32 %v631_v37, %v9082_v46 }
 0x22b   : > { %3689 = vmatpush.msra.mxu0 %v11403_v21  ;;  %3850 = vmatpush.msra.mxu3 %v3849_v17  ;;  %v3872_v15 = vsub.f32 %v9033_v38, %v11404_v1  ;;  %v11406_v21 = vand.u32 4294901760, %v9049_v2  ;;  %v3889_v1 = vand.u32 4294901760, %v9080_v50 }
 0x22c   : > { %3766 = vmatpush.msra.mxu1 %v8729_v60  ;;  %3801 = vmatpush.msra.mxu2 %v8971_v57  ;;  %v607_v60 = vld [vmem:[%s11076_s2 + $0x460] sm:$0xff] }
 0x22d   : > { %3693 = vmatpush.msra.mxu0 %v11405_v27  ;;  %3856 = vmatpush.msra.mxu3 %v3855_v52  ;;  %v3878_v17 = vsub.f32 %v9049_v2, %v11406_v21  ;;  %v3873_v58 = vand.u32 4294901760, %v3872_v15  ;;  %v11408_v52 = vand.u32 4294901760, %v9064_v39  ;;  %v3895_v27 = vand.u32 4294901760, %v9096_v0 }
 0x22e   : > { %3768 = vmatpush.msra.mxu1 %v8740_v6  ;;  %3803 = vmatpush.msra.mxu2 %v8980_v25  ;;  %v9125_v21 = vsub.f32 %v623_v31, %v9098_v5  ;;  %v599_v6 = vld [vmem:[%s11076_s2 + $0x420] sm:$0xff]  ;;  %v9132_v49 = vand.u32 4294901760, %v607_v60  ;;  %v3890_v31 = vsub.f32 %v9080_v50, %v3889_v1 }
 0x22f   : > { %3697 = vmatpush.msra.mxu0 %v11407_v4  ;;  %3862 = vmatpush.msra.mxu3 %v3861_v33  ;;  %v3884_v37 = vsub.f32 %v9064_v39, %v11408_v52  ;;  %v11409_v33 = vand.u32 4294901760, %v8724_v48  ;;  %v3879_v15 = vand.u32 4294901760, %v3878_v17  ;;  %v3901_v4 = vand.u32 4294901760, %v9109_v54 }
 0x230   : > { %3770 = vmatpush.msra.mxu1 %v8763_v14  ;;  %3805 = vmatpush.msra.mxu2 %v9003_v45  ;;  %v9141_v52 = vsub.f32 %v615_v7, %v9111_v28  ;;  %v9145_v14 = vand.u32 4294901760, %v599_v6  ;;  %v11410_v48 = vand.u32 4294901760, %v8738_v55  ;;  %v3896_v17 = vsub.f32 %v9096_v0, %v3895_v27 }
 0x231   : > { %3701 = vmatpush.msra.mxu0 %v11409_v33  ;;  %3868 = vmatpush.msra.mxu3 %v3867_v29  ;;  %v3885_v29 = vand.u32 4294901760, %v3884_v37  ;;  %v3907_v33 = vand.u32 4294901760, %v9125_v21  ;;  %v11411_v7 = vand.u32 4294901760, %v8761_v41  ;;  %v3891_v55 = vand.u32 4294901760, %v3890_v31 }
 0x232   : > { %3772 = vmatpush.msra.mxu1 %v8780_v18  ;;  %3807 = vmatpush.msra.mxu2 %v9019_v36  ;;  %v9156_v18 = vsub.f32 %v607_v60, %v9132_v49  ;;  %v3913_v37 = vand.u32 4294901760, %v9141_v52  ;;  %v11412_v60 = vand.u32 4294901760, %v8772_v47  ;;  %v3897_v41 = vand.u32 4294901760, %v3896_v17 }
 0x233   : > { %3705 = vmatpush.msra.mxu0 %v11410_v48  ;;  %3874 = vmatpush.msra.mxu3 %v3873_v58  ;;  %v3902_v58 = vsub.f32 %v9109_v54, %v3901_v4  ;;  %v11413_v31 = vand.u32 4294901760, %v8795_v26  ;;  %v11415_v17 = vand.u32 4294901760, %v8827_v8 }
 0x234   : > { %3774 = vmatpush.msra.mxu1 %v8797_v56  ;;  %3809 = vmatpush.msra.mxu2 %v9035_v40  ;;  %v9167_v56 = vsub.f32 %v599_v6, %v9145_v14  ;;  %v3914_v47 = vsub.f32 %v9141_v52, %v3913_v37 }
 0x235   : > { %3709 = vmatpush.msra.mxu0 %v11411_v7  ;;  %3880 = vmatpush.msra.mxu3 %v3879_v15  ;;  %v3908_v15 = vsub.f32 %v9125_v21, %v3907_v33  ;;  %v3903_v6 = vand.u32 4294901760, %v3902_v58  ;;  %v11417_v7 = vand.u32 4294901760, %v8846_v43  ;;  %v11420_v43 = vand.u32 4294901760, %v8882_v51  ;;  %v11423_v58 = vld [vmem:[#allocation7_spill] sm:$0xff]  ;;  %v11425_v51 = vld [vmem:[#allocation8_spill] sm:$0xff] }
 0x236   : > { %3776 = vmatpush.msra.mxu1 %v8812_v61  ;;  %3811 = vmatpush.msra.mxu2 %v9051_v53  ;;  %v3919_v61 = vand.u32 4294901760, %v9156_v18  ;;  %v3925_v48 = vand.u32 4294901760, %v9167_v56 }
 0x237   : > { %3713 = vmatpush.msra.mxu0 %v11412_v60  ;;  %3886 = vmatpush.msra.mxu3 %v3885_v29  ;;  %v3909_v29 = vand.u32 4294901760, %v3908_v15  ;;  %v11424_v60 = vand.u32 4294901760, %v11423_v58  ;;  %v11427_v15 = vand.u32 4294901760, %v8988_v44 }
 0x238   : > { %3778 = vmatpush.msra.mxu1 %v8815_v9  ;;  %3813 = vmatpush.msra.mxu2 %v9066_v35  ;;  %v11414_v9 = vand.u32 4294901760, %v8810_v42  ;;  %v3920_v26 = vsub.f32 %v9156_v18, %v3919_v61  ;;  %v3926_v42 = vsub.f32 %v9167_v56, %v3925_v48 }
 0x239   : > { %3717 = vmatpush.msra.mxu0 %v11413_v31  ;;  %3892 = vmatpush.msra.mxu3 %v3891_v55  ;;  %v11421_v55 = vand.u32 4294901760, %v8960_v13 }
 0x23a   : > { %3780 = vmatpush.msra.mxu1 %v8842_v3  ;;  %3815 = vmatpush.msra.mxu2 %v9082_v46  ;;  %v3915_v3 = vand.u32 4294901760, %v3914_v47  ;;  %v3921_v8 = vand.u32 4294901760, %v3920_v26  ;;  %v568_v47 = vld [vmem:[%s11076_s2 + $0x328] sm:$0xff] }
 0x23b   : > { %3721 = vmatpush.msra.mxu0 %v11414_v9  ;;  %3898 = vmatpush.msra.mxu3 %v3897_v41  ;;  %v11426_v41 = vand.u32 4294901760, %v11425_v51 }
 0x23c   : > { %3782 = vmatpush.msra.mxu1 %v8857_v24  ;;  %3817 = vmatpush.msra.mxu2 %v9098_v5  ;;  %v11416_v24 = vand.u32 4294901760, %v8840_v32  ;;  %v11418_v32 = vand.u32 4294901760, %v8870_v22  ;;  %v11422_v22 = vand.u32 4294901760, %v8894_v34  ;;  %v11428_v34 = vand.u32 4294901760, %v8995_v30 }
 0x23d   : > { %3725 = vmatpush.msra.mxu0 %v11415_v17  ;;  %3904 = vmatpush.msra.mxu3 %v3903_v6 }
 0x23e   : > { %3784 = vmatpush.msra.mxu1 %v8872_v20  ;;  %3819 = vmatpush.msra.mxu2 %v9111_v28  ;;  %v3927_v20 = vand.u32 4294901760, %v3926_v42 }
 0x23f   : > { %3729 = vmatpush.msra.mxu0 %v11416_v24  ;;  %3910 = vmatpush.msra.mxu3 %v3909_v29  ;;  %v560_v29 = vld [vmem:[%s11076_s2 + $0x2e8] sm:$0xff] }
 0x240   : > { %3786 = vmatpush.msra.mxu1 %v8884_v19  ;;  %3821 = vmatpush.msra.mxu2 %v9132_v49  ;;  %v11419_v19 = vand.u32 4294901760, %v8946_v12 }
 0x241   : > { %3733 = vmatpush.msra.mxu0 %v11417_v7  ;;  %3916 = vmatpush.msra.mxu3 %v3915_v3  ;;  %v552_v3 = vld [vmem:[%s11076_s2 + $0x2a8] sm:$0xff] }
 0x242   : > { %3788 = vmatmul.f32.vlgmr.msra.gmra.mxu1 %v6825_v59  ;;  %3823 = vmatpush.msra.mxu2 %v9145_v14  ;;  %v9318_v42 = vand.u32 4294901760, %v552_v3 }
 0x243   : > { %3989 = vmatpush.msrb.mxu1 %v8926_v63  ;;  %3737 = vmatpush.msra.mxu0 %v11418_v32 }
 0x244   : > { %3922 = vmatpush.msra.mxu3 %v3921_v8  ;;  %3829 = vmatmul.f32.vlgmr.msra.gmra.mxu2 %v6898_v11  ;;  %v528_v8 = vld [vmem:[%s11076_s2 + $0x1e8] sm:$0xff] }
 0x245   : > { %3991 = vmatpush.msrb.mxu1 %v8934_v16  ;;  %4030 = vmatpush.msrb.mxu2 %v11419_v19 }
 0x246   : > { %3741 = vmatpush.msra.mxu0 %v11420_v43  ;;  %3928 = vmatpush.msra.mxu3 %v3927_v20  ;;  %v512_v43 = vld [vmem:[%s11076_s2 + $0x168] sm:$0xff] }
 0x247   : > { %3930 = vmatmul.f32.vlgmr.msra.gmra.mxu3 %v6855_v23  ;;  %3993 = vmatpush.msrb.mxu1 %v8953_v10 }
 0x248   : > { %4034 = vmatpush.msrb.mxu2 %v11421_v55  ;;  %4097 = vmatpush.msrb.mxu3 %v8926_v63  ;;  %v592_v63 = vld [vmem:[%s11076_s2 + $0x3e8] sm:$0xff]  ;;  %v11434_v55 = vld [vmem:[#allocation6_spill] sm:$0xff] }
 0x249   : > { %3745 = vmatpush.msra.mxu0 %v11422_v22  ;;  %3995 = vmatpush.msrb.mxu1 %v8964_v62  ;;  %v504_v22 = vld [vmem:[%s11076_s2 + $0x128] sm:$0xff] }
 0x24a   : > { %4038 = vmatpush.msrb.mxu2 %v11424_v60  ;;  %4099 = vmatpush.msrb.mxu3 %v8934_v16  ;;  %v11429_v16 = vld [vmem:[#allocation9_spill] sm:$0xff] }
 0x24b   : > { %3749 = vmatpush.msra.mxu0 %v11426_v41  ;;  %3997 = vmatpush.msrb.mxu1 %v8971_v57  ;;  %v11430_v31 = vand.u32 4294901760, %v11429_v16  ;;  %v9401_v41 = vand.u32 4294901760, %v512_v43 }
 0x24c   : > { %3751 = vmatmul.f32.vlgmr.msra.gmra.mxu0 %v6825_v59  ;;  %4042 = vmatpush.msrb.mxu2 %v11427_v15  ;;  %v9404_v15 = vand.u32 4294901760, %v504_v22 }
 0x24d   : > { %3936 = vmatpush.msrb.mxu0 %v8946_v12  ;;  %4101 = vmatpush.msrb.mxu3 %v8953_v10  ;;  %v584_v12 = vld [vmem:[%s11076_s2 + $0x3a8] sm:$0xff]  ;;  %v9251_v10 = vand.u32 4294901760, %v592_v63 }
 0x24e   : > { %3999 = vmatpush.msrb.mxu1 %v8980_v25  ;;  %4046 = vmatpush.msrb.mxu2 %v11428_v34  ;;  %v9261_v6 = vand.u32 4294901760, %v584_v12  ;;  %v496_v34 = vld [vmem:[%s11076_s2 + $0xe8] sm:$0xff] }
 0x24f   : > { %3939 = vmatpush.msrb.mxu0 %v8960_v13  ;;  %4103 = vmatpush.msrb.mxu3 %v8964_v62  ;;  %v11431_v13 = vand.u32 4294901760, %v9033_v38  ;;  %v576_v62 = vld [vmem:[%s11076_s2 + $0x368] sm:$0xff]  ;;  %v9272_v9 = vsub.f32 %v592_v63, %v9251_v10 }
 0x250   : > { %4001 = vmatpush.msrb.mxu1 %v9003_v45  ;;  %4050 = vmatpush.msrb.mxu2 %v11430_v31 }
 0x251   : > { %3942 = vmatpush.msrb.mxu0 %v11423_v58  ;;  %4105 = vmatpush.msrb.mxu3 %v8971_v57  ;;  %v11432_v57 = vand.u32 4294901760, %v9049_v2  ;;  %v11205_v26 = vand.u32 4294901760, %v9272_v9 }
 0x252   : > { %4003 = vmatpush.msrb.mxu1 %v9019_v36  ;;  %4054 = vmatpush.msrb.mxu2 %v11431_v13 }
 0x253   : > { %3945 = vmatpush.msrb.mxu0 %v8988_v44  ;;  %4107 = vmatpush.msrb.mxu3 %v8980_v25  ;;  %v9274_v44 = vand.u32 4294901760, %v576_v62  ;;  %v11433_v25 = vand.u32 4294901760, %v9064_v39 }
 0x254   : > { %4005 = vmatpush.msrb.mxu1 %v9035_v40  ;;  %4058 = vmatpush.msrb.mxu2 %v11432_v57  ;;  %v9431_v57 = vand.u32 4294901760, %v496_v34 }
 0x255   : > { %3948 = vmatpush.msrb.mxu0 %v8995_v30  ;;  %4109 = vmatpush.msrb.mxu3 %v9003_v45  ;;  %v9285_v30 = vsub.f32 %v584_v12, %v9261_v6  ;;  %v9287_v45 = vand.u32 4294901760, %v568_v47  ;;  %v9296_v17 = vsub.f32 %v576_v62, %v9274_v44  ;;  %v9429_v62 = vsub.f32 %v512_v43, %v9401_v41  ;;  %v2962_v43 = vpop.f32.mrf.mxu2 }
 0x256   : > { %4007 = vmatpush.msrb.mxu1 %v9051_v53  ;;  %4062 = vmatpush.msrb.mxu2 %v11433_v25  ;;  %v480_v25 = vld [vmem:[%s11076_s2 + $0x68] sm:$0xff] }
 0x257   : > { %3951 = vmatpush.msrb.mxu0 %v11429_v16  ;;  %4111 = vmatpush.msrb.mxu3 %v9019_v36  ;;  %v9298_v36 = vand.u32 4294901760, %v560_v29 }
 0x258   : > { %4009 = vmatpush.msrb.mxu1 %v9066_v35  ;;  %4066 = vmatpush.msrb.mxu2 %v3889_v1  ;;  %v9313_v1 = vsub.f32 %v568_v47, %v9287_v45  ;;  %v9435_v47 = vsub.f32 %v504_v22, %v9404_v15 }
 0x259   : > { %3954 = vmatpush.msrb.mxu0 %v9033_v38  ;;  %4113 = vmatpush.msrb.mxu3 %v9035_v40  ;;  %v544_v38 = vld [vmem:[%s11076_s2 + $0x268] sm:$0xff]  ;;  %v11204_v40 = vand.u32 4294901760, %v9285_v30 }
 0x25a   : > { %4011 = vmatpush.msrb.mxu1 %v9082_v46  ;;  %4070 = vmatpush.msrb.mxu2 %v3895_v27  ;;  %v9327_v27 = vsub.f32 %v560_v29, %v9298_v36  ;;  %v9329_v24 = vand.u32 4294901760, %v544_v38  ;;  %v2908_v29 = vpop.f32.mrf.mxu1 }
 0x25b   : > { %3957 = vmatpush.msrb.mxu0 %v9049_v2  ;;  %4115 = vmatpush.msrb.mxu3 %v9051_v53  ;;  %v4177_v2 = vsub.f32 %v9272_v9, %v11205_v26  ;;  %v11203_v53 = vand.u32 4294901760, %v9296_v17 }
 0x25c   : > { %4013 = vmatpush.msrb.mxu1 %v9098_v5  ;;  %4074 = vmatpush.msrb.mxu2 %v3901_v4  ;;  %v536_v4 = vld [vmem:[%s11076_s2 + $0x228] sm:$0xff]  ;;  %v11200_v20 = vand.u32 4294901760, %v9327_v27  ;;  %v9361_v32 = vsub.f32 %v544_v38, %v9329_v24 }
 0x25d   : > { %3960 = vmatpush.msrb.mxu0 %v9064_v39  ;;  %4117 = vmatpush.msrb.mxu3 %v9066_v35  ;;  %v4183_v39 = vsub.f32 %v9285_v30, %v11204_v40  ;;  %v11202_v35 = vand.u32 4294901760, %v9313_v1  ;;  %v4189_v7 = vsub.f32 %v9296_v17, %v11203_v53 }
 0x25e   : > { %4015 = vmatpush.msrb.mxu1 %v9111_v28  ;;  %4078 = vmatpush.msrb.mxu2 %v3907_v33  ;;  %v9350_v33 = vsub.f32 %v552_v3, %v9318_v42  ;;  %v4201_v60 = vsub.f32 %v9327_v27, %v11200_v20  ;;  %v664_v20 = vld [vmem:[%s11076_s2 + $0x628] sm:$0xff] }
 0x25f   : > { %3963 = vmatpush.msrb.mxu0 %v9080_v50  ;;  %4119 = vmatpush.msrb.mxu3 %v9082_v46  ;;  %v9352_v50 = vand.u32 4294901760, %v536_v4  ;;  %v4178_v46 = vand.u32 4294901760, %v4177_v2  ;;  %v4195_v19 = vsub.f32 %v9313_v1, %v11202_v35  ;;  %v4190_v58 = vand.u32 4294901760, %v4189_v7  ;;  %v656_v35 = vld [vmem:[%s11076_s2 + $0x5e8] sm:$0xff] }
 0x260   : > { %4017 = vmatpush.msrb.mxu1 %v9132_v49  ;;  %4082 = vmatpush.msrb.mxu2 %v3913_v37  ;;  %v520_v37 = vld [vmem:[%s11076_s2 + $0x1a8] sm:$0xff]  ;;  %v4202_v31 = vand.u32 4294901760, %v4201_v60  ;;  %v9608_v26 = vand.u32 4294901760, %v664_v20 }
 0x261   : > { %3966 = vmatpush.msrb.mxu0 %v9096_v0  ;;  %4121 = vmatpush.msrb.mxu3 %v9098_v5  ;;  %v9369_v0 = vand.u32 4294901760, %v528_v8  ;;  %v4184_v5 = vand.u32 4294901760, %v4183_v39 }
 0x262   : > { %4019 = vmatpush.msrb.mxu1 %v9145_v14  ;;  %4086 = vmatpush.msrb.mxu2 %v3919_v61  ;;  %v11199_v61 = vand.u32 4294901760, %v9350_v33 }
 0x263   : > { %3969 = vmatpush.msrb.mxu0 %v9109_v54  ;;  %4123 = vmatpush.msrb.mxu3 %v9111_v28  ;;  %v9384_v54 = vsub.f32 %v536_v4, %v9352_v50  ;;  %v9386_v28 = vand.u32 4294901760, %v520_v37  ;;  %v9399_v51 = vsub.f32 %v528_v8, %v9369_v0  ;;  %v472_v8 = vld [vmem:[%s11076_s2 + $0x28] sm:$0xff] }
 0x264   : > { %4023 = vmatmul.f32.vlgmr.msrb.gmra.mxu1 %v11434_v55  ;;  %4090 = vmatpush.msrb.mxu2 %v3925_v48  ;;  %v11198_v48 = vand.u32 4294901760, %v9361_v32 }
 0x265   : > { %4179 = vmatpush.msra.mxu1 %v4178_v46  ;;  %3972 = vmatpush.msrb.mxu0 %v9125_v21  ;;  %v4196_v21 = vand.u32 4294901760, %v4195_v19  ;;  %v11197_v63 = vand.u32 4294901760, %v9384_v54  ;;  %v9416_v16 = vsub.f32 %v520_v37, %v9386_v28  ;;  %v11196_v13 = vand.u32 4294901760, %v9399_v51  ;;  %v11435_v46 = vld [vmem:[#allocation5_spill] sm:$0xff] }
 0x266   : > { %4125 = vmatpush.msrb.mxu3 %v9132_v49  ;;  %4092 = vmatmul.f32.vlgmr.msrb.gmra.mxu2 %v6855_v23  ;;  %v4207_v49 = vsub.f32 %v9350_v33, %v11199_v61  ;;  %v4213_v12 = vsub.f32 %v9361_v32, %v11198_v48  ;;  %v11193_v37 = vand.u32 4294901760, %v9429_v62  ;;  %v11189_v19 = vand.u32 4294901760, %v9435_v47 }
 0x267   : > { %4185 = vmatpush.msra.mxu1 %v4184_v5  ;;  %4277 = vmatpush.msra.mxu2 %v9272_v9  ;;  %v4219_v38 = vsub.f32 %v9384_v54, %v11197_v63  ;;  %v4225_v7 = vsub.f32 %v9399_v51, %v11196_v13  ;;  %v9459_v5 = vsub.f32 %v496_v34, %v9431_v57 }
 0x268   : > { %3975 = vmatpush.msrb.mxu0 %v9141_v52  ;;  %4127 = vmatpush.msrb.mxu3 %v9145_v14  ;;  %v488_v52 = vld [vmem:[%s11076_s2 + $0xa8] sm:$0xff]  ;;  %v2807_v14 = vpop.f32.mrf.mxu0  ;;  %v4208_v3 = vand.u32 4294901760, %v4207_v49  ;;  %v4214_v39 = vand.u32 4294901760, %v4213_v12 }
 0x269   : > { %4129 = vmatmul.f32.vlgmr.msrb.gmra.mxu3 %v6855_v23  ;;  %4191 = vmatpush.msra.mxu1 %v4190_v58  ;;  %v9446_v2 = vand.u32 4294901760, %v488_v52  ;;  %v2909_v4 = vadd.f32 %v2908_v29, %v2807_v14  ;;  %v4220_v22 = vand.u32 4294901760, %v4219_v38  ;;  %v4226_v49 = vand.u32 4294901760, %v4225_v7 }
 0x26a   : > { %4280 = vmatpush.msra.mxu2 %v9285_v30  ;;  %4330 = vmatpush.msra.mxu3 %v9251_v10  ;;  %v11191_v12 = vand.u32 4294901760, %v9459_v5  ;;  %v4243_v14 = vsub.f32 %v9435_v47, %v11189_v19  ;;  %v712_v19 = vld [vmem:[%s11076_s2 + $0x7a8] sm:$0xff] }
 0x26b   : > { %3978 = vmatpush.msrb.mxu0 %v9156_v18  ;;  %4197 = vmatpush.msra.mxu1 %v4196_v21  ;;  %v11195_v18 = vand.u32 4294901760, %v9416_v16  ;;  %v9471_v60 = vsub.f32 %v488_v52, %v9446_v2  ;;  %v9473_v21 = vand.u32 4294901760, %v472_v8  ;;  %v2963_v34 = vadd.f32 %v2962_v43, %v2909_v4  ;;  %v3001_v4 = vpop.f32.mrf.mxu3 }
 0x26c   : > { %4283 = vmatpush.msra.mxu2 %v9296_v17  ;;  %4332 = vmatpush.msra.mxu3 %v9261_v6 }
 0x26d   : > { %3981 = vmatpush.msrb.mxu0 %v9167_v56  ;;  %4203 = vmatpush.msra.mxu1 %v4202_v31  ;;  %v9461_v56 = vand.u32 4294901760, %v480_v25  ;;  %v4231_v58 = vsub.f32 %v9416_v16, %v11195_v18  ;;  %v4237_v31 = vsub.f32 %v9429_v62, %v11193_v37  ;;  %v9493_v38 = vsub.f32 %v472_v8, %v9473_v21  ;;  %v696_v37 = vld [vmem:[%s11076_s2 + $0x728] sm:$0xff] }
 0x26e   : > { %3984 = vmatmul.f32.vlgmr.msrb.gmra.mxu0 %v11435_v46  ;;  %4286 = vmatpush.msra.mxu2 %v9313_v1  ;;  %v3002_v7 = vadd.f32 %v3001_v4, %v2963_v34  ;;  %v4249_v8 = vsub.f32 %v9459_v5, %v11191_v12  ;;  %v680_v18 = vld [vmem:[%s11076_s2 + $0x6a8] sm:$0xff] }
 0x26f   : > { %4134 = vmatpush.msra.mxu0 %v9251_v10  ;;  %4334 = vmatpush.msra.mxu3 %v9274_v44  ;;  %v9483_v52 = vsub.f32 %v480_v25, %v9461_v56  ;;  %v4232_v29 = vand.u32 4294901760, %v4231_v58  ;;  %11436 = vst [vmem:[#allocation7_spill] sm:$0xff] %v9493_v38  ;;  %v4238_v43 = vand.u32 4294901760, %v4237_v31  ;;  %v4244_v58 = vand.u32 4294901760, %v4243_v14 }
 0x270   : > { %4209 = vmatpush.msra.mxu1 %v4208_v3  ;;  %4289 = vmatpush.msra.mxu2 %v9327_v27  ;;  %v11190_v3 = vand.u32 4294901760, %v9471_v60  ;;  %v3070_v25 = vpop.f32.mrf.mxu0  ;;  %v11194_v31 = vand.u32 4294901760, %v9493_v38  ;;  %v4250_v14 = vand.u32 4294901760, %v4249_v8 }
 0x271   : > { %4136 = vmatpush.msra.mxu0 %v9261_v6  ;;  %4336 = vmatpush.msra.mxu3 %v9287_v45  ;;  %v3071_v34 = vadd.f32 %v3070_v25, %v3002_v7  ;;  %v9523_v25 = vand.u32 4294901760, %v712_v19  ;;  %v704_v7 = vld [vmem:[%s11076_s2 + $0x768] sm:$0xff] }
 0x272   : > { %4215 = vmatpush.msra.mxu1 %v4214_v39  ;;  %4292 = vmatpush.msra.mxu2 %v9350_v33  ;;  %v720_v39 = vld [vmem:[%s11076_s2 + $0x7e8] sm:$0xff]  ;;  %v4267_v8 = vsub.f32 %v9493_v38, %v11194_v31  ;;  %v9553_v31 = vand.u32 4294901760, %v696_v37 }
 0x273   : > { %4138 = vmatpush.msra.mxu0 %v9274_v44  ;;  %4338 = vmatpush.msra.mxu3 %v9298_v36  ;;  %v9515_v4 = vand.u32 4294901760, %v720_v39 }
 0x274   : > { %4221 = vmatpush.msra.mxu1 %v4220_v22  ;;  %4295 = vmatpush.msra.mxu2 %v9361_v32  ;;  %v11192_v22 = vand.u32 4294901760, %v9483_v52  ;;  %v9577_v48 = vsub.f32 %v696_v37, %v9553_v31 }
 0x275   : > { %4140 = vmatpush.msra.mxu0 %v9287_v45  ;;  %4340 = vmatpush.msra.mxu3 %v9318_v42 }
 0x276   : > { %4227 = vmatpush.msra.mxu1 %v4226_v49  ;;  %4298 = vmatpush.msra.mxu2 %v9384_v54  ;;  %v4255_v49 = vsub.f32 %v9471_v60, %v11190_v3  ;;  %v3107_v3 = vpop.f32.mrf.mxu1 }
 0x277   : > { %4142 = vmatpush.msra.mxu0 %v9298_v36  ;;  %4342 = vmatpush.msra.mxu3 %v9329_v24  ;;  %v3108_v12 = vadd.f32 %v3107_v3, %v3071_v34  ;;  %v9542_v3 = vand.u32 4294901760, %v704_v7 }
 0x278   : > { %4233 = vmatpush.msra.mxu1 %v4232_v29  ;;  %4301 = vmatpush.msra.mxu2 %v9399_v51  ;;  %v4261_v29 = vsub.f32 %v9483_v52, %v11192_v22  ;;  %v9535_v22 = vsub.f32 %v720_v39, %v9515_v4  ;;  %v9549_v39 = vsub.f32 %v712_v19, %v9523_v25 }
 0x279   : > { %4144 = vmatpush.msra.mxu0 %v9318_v42  ;;  %4344 = vmatpush.msra.mxu3 %v9352_v50  ;;  %v9565_v63 = vsub.f32 %v704_v7, %v9542_v3 }
 0x27a   : > { %4239 = vmatpush.msra.mxu1 %v4238_v43  ;;  %4304 = vmatpush.msra.mxu2 %v9416_v16  ;;  %v4256_v43 = vand.u32 4294901760, %v4255_v49  ;;  %v4262_v34 = vand.u32 4294901760, %v4261_v29  ;;  %v3148_v49 = vpop.f32.mrf.mxu2  ;;  %v11201_v29 = vand.u32 4294901760, %v9535_v22 }
 0x27b   : > { %4146 = vmatpush.msra.mxu0 %v9329_v24  ;;  %4346 = vmatpush.msra.mxu3 %v9369_v0  ;;  %v3149_v13 = vadd.f32 %v3148_v49, %v3108_v12  ;;  %11437 = vst [vmem:[#allocation8_spill] sm:$0xff] %v9565_v63  ;;  %v11206_v12 = vand.u32 4294901760, %v9549_v39  ;;  %v3249_v49 = vpop.f32.mrf.mxu3 }
 0x27c   : > { %4245 = vmatpush.msra.mxu1 %v4244_v58  ;;  %4307 = vmatpush.msra.mxu2 %v9429_v62  ;;  %v688_v58 = vld [vmem:[%s11076_s2 + $0x6e8] sm:$0xff] }
 0x27d   : > { %4148 = vmatpush.msra.mxu0 %v9352_v50  ;;  %4348 = vmatpush.msra.mxu3 %v9386_v28  ;;  %v9560_v19 = vand.u32 4294901760, %v688_v58  ;;  %v3250_v7 = vadd.f32 %v3249_v49, %v3149_v13  ;;  %v648_v13 = vld [vmem:[%s11076_s2 + $0x5a8] sm:$0xff] }
 0x27e   : > { %4251 = vmatpush.msra.mxu1 %v4250_v14  ;;  %4310 = vmatpush.msra.mxu2 %v9435_v47  ;;  %v4268_v14 = vand.u32 4294901760, %v4267_v8  ;;  %v672_v8 = vld [vmem:[%s11076_s2 + $0x668] sm:$0xff]  ;;  %v3342_v53 = vpop.f32.mrf.mxu1 }
 0x27f   : > { %4150 = vmatpush.msra.mxu0 %v9369_v0  ;;  %4350 = vmatpush.msra.mxu3 %v9401_v41  ;;  %v9584_v61 = vsub.f32 %v688_v58, %v9560_v19  ;;  %v4524_v58 = vsub.f32 %v9549_v39, %v11206_v12  ;;  %v11439_v12 = vld [vmem:[#allocation2_spill] sm:$0xff] }
 0x280   : > { %4257 = vmatpush.msra.mxu1 %v4256_v43  ;;  %4313 = vmatpush.msra.mxu2 %v9459_v5  ;;  %v9569_v43 = vand.u32 4294901760, %v680_v18 }
 0x281   : > { %4152 = vmatpush.msra.mxu0 %v9386_v28  ;;  %4352 = vmatpush.msra.mxu3 %v9404_v15 }
 0x282   : > { %4263 = vmatpush.msra.mxu1 %v4262_v34  ;;  %4316 = vmatpush.msra.mxu2 %v9471_v60  ;;  %v4518_v34 = vsub.f32 %v9535_v22, %v11201_v29  ;;  %v9600_v29 = vsub.f32 %v680_v18, %v9569_v43 }
 0x283   : > { %4154 = vmatpush.msra.mxu0 %v9401_v41  ;;  %4354 = vmatpush.msra.mxu3 %v9431_v57  ;;  %v3411_v46 = vpop.f32.mrf.mxu2 }
 0x284   : > { %4269 = vmatpush.msra.mxu1 %v4268_v14  ;;  %4319 = vmatpush.msra.mxu2 %v9483_v52  ;;  %v9592_v14 = vand.u32 4294901760, %v672_v8  ;;  %11438 = vst [vmem:[#allocation9_spill] sm:$0xff] %v9600_v29 }
 0x285   : > { %4156 = vmatpush.msra.mxu0 %v9404_v15  ;;  %4356 = vmatpush.msra.mxu3 %v9446_v2  ;;  %v3303_v37 = vpop.f32.mrf.mxu0 }
 0x286   : > { %4271 = vmatmul.f32.vlgmr.msra.gmra.mxu1 %v6825_v59  ;;  %4322 = vmatpush.msra.mxu2 %v9493_v38  ;;  %v3304_v49 = vadd.f32 %v3303_v37, %v3250_v7  ;;  %v4519_v7 = vand.u32 4294901760, %v4518_v34  ;;  %v9622_v55 = vsub.f32 %v672_v8, %v9592_v14  ;;  %v9624_v34 = vand.u32 4294901760, %v656_v35  ;;  %v640_v37 = vld [vmem:[%s11076_s2 + $0x568] sm:$0xff]  ;;  %v3448_v38 = vpop.f32.mrf.mxu3 }
 0x287   : > { %4438 = vmatpush.msrb.mxu1 %v9251_v10  ;;  %4158 = vmatpush.msra.mxu0 %v9431_v57  ;;  %v11440_v10 = vand.u32 4294901760, %v9565_v63  ;;  %v11442_v8 = vand.u32 4294901760, %v9577_v48 }
 0x288   : > { %4358 = vmatpush.msra.mxu3 %v9461_v56  ;;  %4325 = vmatmul.f32.vlgmr.msra.gmra.mxu2 %v11439_v12  ;;  %v3343_v18 = vadd.f32 %v3342_v53, %v3304_v49  ;;  %v4525_v53 = vand.u32 4294901760, %v4524_v58  ;;  %v11441_v12 = vld [vmem:[#allocation3_spill] sm:$0xff] }
 0x289   : > { %4440 = vmatpush.msrb.mxu1 %v9261_v6  ;;  %4475 = vmatpush.msrb.mxu2 %v9515_v4  ;;  %v4530_v40 = vsub.f32 %v9565_v63, %v11440_v10  ;;  %v4536_v10 = vsub.f32 %v9577_v48, %v11442_v8  ;;  %v9638_v63 = vsub.f32 %v664_v20, %v9608_v26  ;;  %v616_v8 = vld [vmem:[%s11076_s2 + $0x4a8] sm:$0xff] }
 0x28a   : > { %4160 = vmatpush.msra.mxu0 %v9446_v2  ;;  %4360 = vmatpush.msra.mxu3 %v9473_v21  ;;  %v3412_v49 = vadd.f32 %v3411_v46, %v3343_v18  ;;  %v9640_v46 = vand.u32 4294901760, %v648_v13  ;;  %v11443_v18 = vand.u32 4294901760, %v9584_v61 }
 0x28b   : > { %4364 = vmatmul.f32.vlgmr.msra.gmra.mxu3 %v11441_v12  ;;  %4442 = vmatpush.msrb.mxu1 %v9274_v44  ;;  %v632_v44 = vld [vmem:[%s11076_s2 + $0x528] sm:$0xff]  ;;  %v4531_v20 = vand.u32 4294901760, %v4530_v40  ;;  %v9653_v12 = vsub.f32 %v656_v35, %v9624_v34  ;;  %v4537_v40 = vand.u32 4294901760, %v4536_v10  ;;  %v9700_v10 = vand.u32 4294901760, %v616_v8 }
 0x28c   : > { %4477 = vmatpush.msrb.mxu2 %v9523_v25  ;;  %4520 = vmatpush.msrb.mxu3 %v4519_v7  ;;  %v3449_v58 = vadd.f32 %v3448_v38, %v3412_v49  ;;  %v4542_v6 = vsub.f32 %v9584_v61, %v11443_v18  ;;  %v9655_v7 = vand.u32 4294901760, %v640_v37  ;;  %v11444_v38 = vand.u32 4294901760, %v9600_v29 }
 0x28d   : > { %4162 = vmatpush.msra.mxu0 %v9461_v56  ;;  %4444 = vmatpush.msrb.mxu1 %v9287_v45  ;;  %v624_v45 = vld [vmem:[%s11076_s2 + $0x4e8] sm:$0xff]  ;;  %v9669_v18 = vsub.f32 %v648_v13, %v9640_v46 }
 0x28e   : > { %4479 = vmatpush.msrb.mxu2 %v9542_v3  ;;  %4526 = vmatpush.msrb.mxu3 %v4525_v53  ;;  %6182 = vst [vmem:[%s7863_s4 + $0x18] sm:$0xff] %v3449_v58  ;;  %v4548_v49 = vsub.f32 %v9600_v29, %v11444_v38  ;;  %v9671_v53 = vand.u32 4294901760, %v632_v44  ;;  %v11445_v58 = vld [vmem:[#allocation4_spill] sm:$0xff]  ;;  %v4543_v38 = vand.u32 4294901760, %v4542_v6  ;;  %v11446_v29 = vand.u32 4294901760, %v9272_v9 }
 0x28f   : > { %4164 = vmatpush.msra.mxu0 %v9473_v21  ;;  %4446 = vmatpush.msrb.mxu1 %v9298_v36  ;;  %v11447_v36 = vand.u32 4294901760, %v9622_v55  ;;  %v9685_v35 = vsub.f32 %v640_v37, %v9655_v7  ;;  %v11448_v9 = vand.u32 4294901760, %v9285_v30  ;;  %v11450_v30 = vand.u32 4294901760, %v9296_v17 }
 0x290   : > { %4170 = vmatmul.f32.vlgmr.msra.gmra.mxu0 %v11445_v58  ;;  %4481 = vmatpush.msrb.mxu2 %v9553_v31  ;;  %v9687_v58 = vand.u32 4294901760, %v624_v45  ;;  %v4549_v6 = vand.u32 4294901760, %v4548_v49  ;;  %v9698_v37 = vsub.f32 %v632_v44, %v9671_v53 }
 0x291   : > { %4371 = vmatpush.msrb.mxu0 %v11446_v29  ;;  %4532 = vmatpush.msrb.mxu3 %v4531_v20  ;;  %v4554_v13 = vsub.f32 %v9622_v55, %v11447_v36  ;;  %v11449_v29 = vand.u32 4294901760, %v9638_v63  ;;  %v4571_v36 = vand.u32 4294901760, %v9669_v18 }
 0x292   : > { %4448 = vmatpush.msrb.mxu1 %v9318_v42  ;;  %4483 = vmatpush.msrb.mxu2 %v9560_v19  ;;  %v608_v42 = vld [vmem:[%s11076_s2 + $0x468] sm:$0xff] }
 0x293   : > { %4375 = vmatpush.msrb.mxu0 %v11448_v9  ;;  %4538 = vmatpush.msrb.mxu3 %v4537_v40  ;;  %v4560_v20 = vsub.f32 %v9638_v63, %v11449_v29  ;;  %v4555_v49 = vand.u32 4294901760, %v4554_v13  ;;  %v11451_v40 = vand.u32 4294901760, %v9653_v12  ;;  %v4577_v9 = vand.u32 4294901760, %v9685_v35 }
 0x294   : > { %4450 = vmatpush.msrb.mxu1 %v9329_v24  ;;  %4485 = vmatpush.msrb.mxu2 %v9569_v43  ;;  %v9714_v29 = vsub.f32 %v624_v45, %v9687_v58  ;;  %v600_v24 = vld [vmem:[%s11076_s2 + $0x428] sm:$0xff]  ;;  %v9721_v17 = vand.u32 4294901760, %v608_v42  ;;  %v4572_v45 = vsub.f32 %v9669_v18, %v4571_v36 }
 0x295   : > { %4379 = vmatpush.msrb.mxu0 %v11450_v30  ;;  %4544 = vmatpush.msrb.mxu3 %v4543_v38  ;;  %v4566_v44 = vsub.f32 %v9653_v12, %v11451_v40  ;;  %v11452_v38 = vand.u32 4294901760, %v9313_v1  ;;  %v4561_v13 = vand.u32 4294901760, %v4560_v20  ;;  %v4583_v30 = vand.u32 4294901760, %v9698_v37 }
 0x296   : > { %4452 = vmatpush.msrb.mxu1 %v9352_v50  ;;  %4487 = vmatpush.msrb.mxu2 %v9592_v14  ;;  %v9730_v40 = vsub.f32 %v616_v8, %v9700_v10  ;;  %v9734_v50 = vand.u32 4294901760, %v600_v24  ;;  %v11453_v1 = vand.u32 4294901760, %v9327_v27  ;;  %v4578_v20 = vsub.f32 %v9685_v35, %v4577_v9 }
 0x297   : > { %4383 = vmatpush.msrb.mxu0 %v11452_v38  ;;  %4550 = vmatpush.msrb.mxu3 %v4549_v6  ;;  %v4567_v6 = vand.u32 4294901760, %v4566_v44  ;;  %v4589_v38 = vand.u32 4294901760, %v9714_v29  ;;  %v11454_v8 = vand.u32 4294901760, %v9350_v33  ;;  %v4573_v27 = vand.u32 4294901760, %v4572_v45 }
 0x298   : > { %4454 = vmatpush.msrb.mxu1 %v9369_v0  ;;  %4489 = vmatpush.msrb.mxu2 %v9608_v26  ;;  %v9745_v0 = vsub.f32 %v608_v42, %v9721_v17  ;;  %v4595_v44 = vand.u32 4294901760, %v9730_v40  ;;  %v11455_v42 = vand.u32 4294901760, %v9361_v32  ;;  %v4579_v33 = vand.u32 4294901760, %v4578_v20 }
 0x299   : > { %4387 = vmatpush.msrb.mxu0 %v11453_v1  ;;  %4556 = vmatpush.msrb.mxu3 %v4555_v49  ;;  %v4584_v49 = vsub.f32 %v9698_v37, %v4583_v30  ;;  %v11456_v45 = vand.u32 4294901760, %v9384_v54  ;;  %v11458_v20 = vand.u32 4294901760, %v9416_v16 }
 0x29a   : > { %4456 = vmatpush.msrb.mxu1 %v9386_v28  ;;  %4491 = vmatpush.msrb.mxu2 %v9624_v34  ;;  %v9756_v28 = vsub.f32 %v600_v24, %v9734_v50  ;;  %v4596_v32 = vsub.f32 %v9730_v40, %v4595_v44 }
 0x29b   : > { %4391 = vmatpush.msrb.mxu0 %v11454_v8  ;;  %4562 = vmatpush.msrb.mxu3 %v4561_v13  ;;  %v4590_v13 = vsub.f32 %v9714_v29, %v4589_v38  ;;  %v4585_v24 = vand.u32 4294901760, %v4584_v49  ;;  %v11460_v8 = vand.u32 4294901760, %v9435_v47  ;;  %v11463_v47 = vand.u32 4294901760, %v9471_v60  ;;  %v11466_v49 = vld [vmem:[#allocation8_spill] sm:$0xff]  ;;  %v11468_v60 = vld [vmem:[#allocation7_spill] sm:$0xff] }
 0x29c   : > { %4458 = vmatpush.msrb.mxu1 %v9401_v41  ;;  %4493 = vmatpush.msrb.mxu2 %v9640_v46  ;;  %v4601_v41 = vand.u32 4294901760, %v9745_v0  ;;  %v4607_v1 = vand.u32 4294901760, %v9756_v28 }
 0x29d   : > { %4395 = vmatpush.msrb.mxu0 %v11455_v42  ;;  %4568 = vmatpush.msrb.mxu3 %v4567_v6  ;;  %v4591_v6 = vand.u32 4294901760, %v4590_v13  ;;  %v11467_v42 = vand.u32 4294901760, %v11466_v49  ;;  %v11470_v13 = vand.u32 4294901760, %v9577_v48 }
 0x29e   : > { %4460 = vmatpush.msrb.mxu1 %v9404_v15  ;;  %4495 = vmatpush.msrb.mxu2 %v9655_v7  ;;  %v11457_v15 = vand.u32 4294901760, %v9399_v51  ;;  %v4602_v54 = vsub.f32 %v9745_v0, %v4601_v41  ;;  %v4608_v51 = vsub.f32 %v9756_v28, %v4607_v1 }
 0x29f   : > { %4399 = vmatpush.msrb.mxu0 %v11456_v45  ;;  %4574 = vmatpush.msrb.mxu3 %v4573_v27  ;;  %v11464_v27 = vand.u32 4294901760, %v9549_v39 }
 0x2a0   : > { %4462 = vmatpush.msrb.mxu1 %v9431_v57  ;;  %4497 = vmatpush.msrb.mxu2 %v9671_v53  ;;  %v4597_v57 = vand.u32 4294901760, %v4596_v32  ;;  %v4603_v16 = vand.u32 4294901760, %v4602_v54  ;;  %v569_v32 = vld [vmem:[%s11076_s2 + $0x330] sm:$0xff] }
 0x2a1   : > { %4403 = vmatpush.msrb.mxu0 %v11457_v15  ;;  %4580 = vmatpush.msrb.mxu3 %v4579_v33  ;;  %v11469_v33 = vand.u32 4294901760, %v11468_v60 }
 0x2a2   : > { %4464 = vmatpush.msrb.mxu1 %v9446_v2  ;;  %4499 = vmatpush.msrb.mxu2 %v9687_v58  ;;  %v11459_v2 = vand.u32 4294901760, %v9429_v62  ;;  %v11461_v62 = vand.u32 4294901760, %v9459_v5  ;;  %v11465_v5 = vand.u32 4294901760, %v9483_v52  ;;  %v11471_v52 = vand.u32 4294901760, %v9584_v61 }
 0x2a3   : > { %4407 = vmatpush.msrb.mxu0 %v11458_v20  ;;  %4586 = vmatpush.msrb.mxu3 %v4585_v24 }
 0x2a4   : > { %4466 = vmatpush.msrb.mxu1 %v9461_v56  ;;  %4501 = vmatpush.msrb.mxu2 %v9700_v10  ;;  %v4609_v56 = vand.u32 4294901760, %v4608_v51 }
 0x2a5   : > { %4411 = vmatpush.msrb.mxu0 %v11459_v2  ;;  %4592 = vmatpush.msrb.mxu3 %v4591_v6  ;;  %v561_v6 = vld [vmem:[%s11076_s2 + $0x2f0] sm:$0xff] }
 0x2a6   : > { %4468 = vmatpush.msrb.mxu1 %v9473_v21  ;;  %4503 = vmatpush.msrb.mxu2 %v9721_v17  ;;  %v11462_v21 = vand.u32 4294901760, %v9535_v22 }
 0x2a7   : > { %4415 = vmatpush.msrb.mxu0 %v11460_v8  ;;  %4598 = vmatpush.msrb.mxu3 %v4597_v57  ;;  %v553_v57 = vld [vmem:[%s11076_s2 + $0x2b0] sm:$0xff] }
 0x2a8   : > { %4470 = vmatmul.f32.vlgmr.msrb.gmra.mxu1 %v6825_v59  ;;  %4505 = vmatpush.msrb.mxu2 %v9734_v50  ;;  %v9907_v51 = vand.u32 4294901760, %v553_v57 }
 0x2a9   : > { %4671 = vmatpush.msra.mxu1 %v9515_v4  ;;  %4419 = vmatpush.msrb.mxu0 %v11461_v62 }
 0x2aa   : > { %4604 = vmatpush.msrb.mxu3 %v4603_v16  ;;  %4511 = vmatmul.f32.vlgmr.msrb.gmra.mxu2 %v6898_v11  ;;  %v529_v16 = vld [vmem:[%s11076_s2 + $0x1f0] sm:$0xff] }
 0x2ab   : > { %4673 = vmatpush.msra.mxu1 %v9523_v25  ;;  %4712 = vmatpush.msra.mxu2 %v11462_v21 }
 0x2ac   : > { %4423 = vmatpush.msrb.mxu0 %v11463_v47  ;;  %4610 = vmatpush.msrb.mxu3 %v4609_v56  ;;  %v513_v47 = vld [vmem:[%s11076_s2 + $0x170] sm:$0xff] }
 0x2ad   : > { %4612 = vmatmul.f32.vlgmr.msrb.gmra.mxu3 %v6855_v23  ;;  %4675 = vmatpush.msra.mxu1 %v9542_v3 }
 0x2ae   : > { %4716 = vmatpush.msra.mxu2 %v11464_v27  ;;  %4779 = vmatpush.msra.mxu3 %v9515_v4  ;;  %v593_v4 = vld [vmem:[%s11076_s2 + $0x3f0] sm:$0xff]  ;;  %v11477_v27 = vld [vmem:[#allocation6_spill] sm:$0xff] }
 0x2af   : > { %4427 = vmatpush.msrb.mxu0 %v11465_v5  ;;  %4677 = vmatpush.msra.mxu1 %v9553_v31  ;;  %v505_v5 = vld [vmem:[%s11076_s2 + $0x130] sm:$0xff] }
 0x2b0   : > { %4720 = vmatpush.msra.mxu2 %v11467_v42  ;;  %4781 = vmatpush.msra.mxu3 %v9523_v25  ;;  %v11472_v25 = vld [vmem:[#allocation9_spill] sm:$0xff] }
 0x2b1   : > { %4431 = vmatpush.msrb.mxu0 %v11469_v33  ;;  %4679 = vmatpush.msra.mxu1 %v9560_v19  ;;  %v11473_v45 = vand.u32 4294901760, %v11472_v25  ;;  %v9990_v33 = vand.u32 4294901760, %v513_v47 }
 0x2b2   : > { %4433 = vmatmul.f32.vlgmr.msrb.gmra.mxu0 %v6825_v59  ;;  %4724 = vmatpush.msra.mxu2 %v11470_v13  ;;  %v9993_v13 = vand.u32 4294901760, %v505_v5 }
 0x2b3   : > { %4618 = vmatpush.msra.mxu0 %v9535_v22  ;;  %4783 = vmatpush.msra.mxu3 %v9542_v3  ;;  %v585_v22 = vld [vmem:[%s11076_s2 + $0x3b0] sm:$0xff]  ;;  %v9840_v3 = vand.u32 4294901760, %v593_v4 }
 0x2b4   : > { %4681 = vmatpush.msra.mxu1 %v9569_v43  ;;  %4728 = vmatpush.msra.mxu2 %v11471_v52  ;;  %v9850_v24 = vand.u32 4294901760, %v585_v22  ;;  %v497_v52 = vld [vmem:[%s11076_s2 + $0xf0] sm:$0xff] }
 0x2b5   : > { %4621 = vmatpush.msra.mxu0 %v9549_v39  ;;  %4785 = vmatpush.msra.mxu3 %v9553_v31  ;;  %v11474_v39 = vand.u32 4294901760, %v9622_v55  ;;  %v577_v31 = vld [vmem:[%s11076_s2 + $0x370] sm:$0xff]  ;;  %v9861_v15 = vsub.f32 %v593_v4, %v9840_v3 }
 0x2b6   : > { %4683 = vmatpush.msra.mxu1 %v9592_v14  ;;  %4732 = vmatpush.msra.mxu2 %v11473_v45 }
 0x2b7   : > { %4624 = vmatpush.msra.mxu0 %v11466_v49  ;;  %4787 = vmatpush.msra.mxu3 %v9560_v19  ;;  %v11475_v19 = vand.u32 4294901760, %v9638_v63  ;;  %v11228_v54 = vand.u32 4294901760, %v9861_v15 }
 0x2b8   : > { %4685 = vmatpush.msra.mxu1 %v9608_v26  ;;  %4736 = vmatpush.msra.mxu2 %v11474_v39 }
 0x2b9   : > { %4627 = vmatpush.msra.mxu0 %v9577_v48  ;;  %4789 = vmatpush.msra.mxu3 %v9569_v43  ;;  %v9863_v48 = vand.u32 4294901760, %v577_v31  ;;  %v11476_v43 = vand.u32 4294901760, %v9653_v12 }
 0x2ba   : > { %4687 = vmatpush.msra.mxu1 %v9624_v34  ;;  %4740 = vmatpush.msra.mxu2 %v11475_v19  ;;  %v10020_v19 = vand.u32 4294901760, %v497_v52 }
 0x2bb   : > { %4630 = vmatpush.msra.mxu0 %v9584_v61  ;;  %4791 = vmatpush.msra.mxu3 %v9592_v14  ;;  %v9874_v61 = vsub.f32 %v585_v22, %v9850_v24  ;;  %v9876_v14 = vand.u32 4294901760, %v569_v32  ;;  %v9885_v20 = vsub.f32 %v577_v31, %v9863_v48  ;;  %v10018_v31 = vsub.f32 %v513_v47, %v9990_v33  ;;  %v3644_v47 = vpop.f32.mrf.mxu2 }
 0x2bc   : > { %4689 = vmatpush.msra.mxu1 %v9640_v46  ;;  %4744 = vmatpush.msra.mxu2 %v11476_v43  ;;  %v481_v43 = vld [vmem:[%s11076_s2 + $0x70] sm:$0xff] }
 0x2bd   : > { %4633 = vmatpush.msra.mxu0 %v11472_v25  ;;  %4793 = vmatpush.msra.mxu3 %v9608_v26  ;;  %v9887_v26 = vand.u32 4294901760, %v561_v6 }
 0x2be   : > { %4691 = vmatpush.msra.mxu1 %v9655_v7  ;;  %4748 = vmatpush.msra.mxu2 %v4571_v36  ;;  %v9902_v36 = vsub.f32 %v569_v32, %v9876_v14  ;;  %v10024_v32 = vsub.f32 %v505_v5, %v9993_v13 }
 0x2bf   : > { %4636 = vmatpush.msra.mxu0 %v9622_v55  ;;  %4795 = vmatpush.msra.mxu3 %v9624_v34  ;;  %v545_v55 = vld [vmem:[%s11076_s2 + $0x270] sm:$0xff]  ;;  %v11227_v34 = vand.u32 4294901760, %v9874_v61 }
 0x2c0   : > { %4693 = vmatpush.msra.mxu1 %v9671_v53  ;;  %4752 = vmatpush.msra.mxu2 %v4577_v9  ;;  %v9916_v9 = vsub.f32 %v561_v6, %v9887_v26  ;;  %v9918_v2 = vand.u32 4294901760, %v545_v55  ;;  %v3590_v6 = vpop.f32.mrf.mxu1 }
 0x2c1   : > { %4639 = vmatpush.msra.mxu0 %v9638_v63  ;;  %4797 = vmatpush.msra.mxu3 %v9640_v46  ;;  %v4859_v63 = vsub.f32 %v9861_v15, %v11228_v54  ;;  %v11226_v46 = vand.u32 4294901760, %v9885_v20 }
 0x2c2   : > { %4695 = vmatpush.msra.mxu1 %v9687_v58  ;;  %4756 = vmatpush.msra.mxu2 %v4583_v30  ;;  %v537_v30 = vld [vmem:[%s11076_s2 + $0x230] sm:$0xff]  ;;  %v11223_v56 = vand.u32 4294901760, %v9916_v9  ;;  %v9950_v62 = vsub.f32 %v545_v55, %v9918_v2 }
 0x2c3   : > { %4642 = vmatpush.msra.mxu0 %v9653_v12  ;;  %4799 = vmatpush.msra.mxu3 %v9655_v7  ;;  %v4865_v12 = vsub.f32 %v9874_v61, %v11227_v34  ;;  %v11225_v7 = vand.u32 4294901760, %v9902_v36  ;;  %v4871_v8 = vsub.f32 %v9885_v20, %v11226_v46 }
 0x2c4   : > { %4697 = vmatpush.msra.mxu1 %v9700_v10  ;;  %4760 = vmatpush.msra.mxu2 %v4589_v38  ;;  %v9939_v38 = vsub.f32 %v553_v57, %v9907_v51  ;;  %v4883_v42 = vsub.f32 %v9916_v9, %v11223_v56  ;;  %v665_v56 = vld [vmem:[%s11076_s2 + $0x630] sm:$0xff] }
 0x2c5   : > { %4645 = vmatpush.msra.mxu0 %v9669_v18  ;;  %4801 = vmatpush.msra.mxu3 %v9671_v53  ;;  %v9941_v18 = vand.u32 4294901760, %v537_v30  ;;  %v4860_v53 = vand.u32 4294901760, %v4859_v63  ;;  %v4877_v21 = vsub.f32 %v9902_v36, %v11225_v7  ;;  %v4872_v49 = vand.u32 4294901760, %v4871_v8  ;;  %v657_v7 = vld [vmem:[%s11076_s2 + $0x5f0] sm:$0xff] }
 0x2c6   : > { %4699 = vmatpush.msra.mxu1 %v9721_v17  ;;  %4764 = vmatpush.msra.mxu2 %v4595_v44  ;;  %v521_v44 = vld [vmem:[%s11076_s2 + $0x1b0] sm:$0xff]  ;;  %v4884_v45 = vand.u32 4294901760, %v4883_v42  ;;  %v10197_v54 = vand.u32 4294901760, %v665_v56 }
 0x2c7   : > { %4648 = vmatpush.msra.mxu0 %v9685_v35  ;;  %4803 = vmatpush.msra.mxu3 %v9687_v58  ;;  %v9958_v35 = vand.u32 4294901760, %v529_v16  ;;  %v4866_v58 = vand.u32 4294901760, %v4865_v12 }
 0x2c8   : > { %4701 = vmatpush.msra.mxu1 %v9734_v50  ;;  %4768 = vmatpush.msra.mxu2 %v4601_v41  ;;  %v11222_v41 = vand.u32 4294901760, %v9939_v38 }
 0x2c9   : > { %4651 = vmatpush.msra.mxu0 %v9698_v37  ;;  %4805 = vmatpush.msra.mxu3 %v9700_v10  ;;  %v9973_v37 = vsub.f32 %v537_v30, %v9941_v18  ;;  %v9975_v10 = vand.u32 4294901760, %v521_v44  ;;  %v9988_v60 = vsub.f32 %v529_v16, %v9958_v35  ;;  %v473_v16 = vld [vmem:[%s11076_s2 + $0x30] sm:$0xff] }
 0x2ca   : > { %4705 = vmatmul.f32.vlgmr.msra.gmra.mxu1 %v11477_v27  ;;  %4772 = vmatpush.msra.mxu2 %v4607_v1  ;;  %v11221_v1 = vand.u32 4294901760, %v9950_v62 }
 0x2cb   : > { %4861 = vmatpush.msrb.mxu1 %v4860_v53  ;;  %4654 = vmatpush.msra.mxu0 %v9714_v29  ;;  %v4878_v29 = vand.u32 4294901760, %v4877_v21  ;;  %v11220_v4 = vand.u32 4294901760, %v9973_v37  ;;  %v10005_v25 = vsub.f32 %v521_v44, %v9975_v10  ;;  %v11219_v39 = vand.u32 4294901760, %v9988_v60  ;;  %v11478_v53 = vld [vmem:[#allocation5_spill] sm:$0xff] }
 0x2cc   : > { %4807 = vmatpush.msra.mxu3 %v9721_v17  ;;  %4774 = vmatmul.f32.vlgmr.msra.gmra.mxu2 %v6855_v23  ;;  %v4889_v17 = vsub.f32 %v9939_v38, %v11222_v41  ;;  %v4895_v22 = vsub.f32 %v9950_v62, %v11221_v1  ;;  %v11216_v44 = vand.u32 4294901760, %v10018_v31  ;;  %v11212_v21 = vand.u32 4294901760, %v10024_v32 }
 0x2cd   : > { %4867 = vmatpush.msrb.mxu1 %v4866_v58  ;;  %4959 = vmatpush.msrb.mxu2 %v9861_v15  ;;  %v4901_v55 = vsub.f32 %v9973_v37, %v11220_v4  ;;  %v4907_v8 = vsub.f32 %v9988_v60, %v11219_v39  ;;  %v10048_v58 = vsub.f32 %v497_v52, %v10020_v19 }
 0x2ce   : > { %4657 = vmatpush.msra.mxu0 %v9730_v40  ;;  %4809 = vmatpush.msra.mxu3 %v9734_v50  ;;  %v489_v40 = vld [vmem:[%s11076_s2 + $0xb0] sm:$0xff]  ;;  %v3489_v50 = vpop.f32.mrf.mxu0  ;;  %v4890_v57 = vand.u32 4294901760, %v4889_v17  ;;  %v4896_v12 = vand.u32 4294901760, %v4895_v22 }
 0x2cf   : > { %4811 = vmatmul.f32.vlgmr.msra.gmra.mxu3 %v6855_v23  ;;  %4873 = vmatpush.msrb.mxu1 %v4872_v49  ;;  %v10035_v63 = vand.u32 4294901760, %v489_v40  ;;  %v3591_v30 = vadd.f32 %v3590_v6, %v3489_v50  ;;  %v4902_v5 = vand.u32 4294901760, %v4901_v55  ;;  %v4908_v17 = vand.u32 4294901760, %v4907_v8 }
 0x2d0   : > { %4962 = vmatpush.msrb.mxu2 %v9874_v61  ;;  %5012 = vmatpush.msrb.mxu3 %v9840_v3  ;;  %v11214_v22 = vand.u32 4294901760, %v10048_v58  ;;  %v4925_v50 = vsub.f32 %v10024_v32, %v11212_v21  ;;  %v713_v21 = vld [vmem:[%s11076_s2 + $0x7b0] sm:$0xff] }
 0x2d1   : > { %4660 = vmatpush.msra.mxu0 %v9745_v0  ;;  %4879 = vmatpush.msrb.mxu1 %v4878_v29  ;;  %v11218_v0 = vand.u32 4294901760, %v10005_v25  ;;  %v10060_v42 = vsub.f32 %v489_v40, %v10035_v63  ;;  %v10062_v29 = vand.u32 4294901760, %v473_v16  ;;  %v3645_v52 = vadd.f32 %v3644_v47, %v3591_v30  ;;  %v3683_v30 = vpop.f32.mrf.mxu3 }
 0x2d2   : > { %4965 = vmatpush.msrb.mxu2 %v9885_v20  ;;  %5014 = vmatpush.msrb.mxu3 %v9850_v24 }
 0x2d3   : > { %4663 = vmatpush.msra.mxu0 %v9756_v28  ;;  %4885 = vmatpush.msrb.mxu1 %v4884_v45  ;;  %v10050_v28 = vand.u32 4294901760, %v481_v43  ;;  %v4913_v49 = vsub.f32 %v10005_v25, %v11218_v0  ;;  %v4919_v45 = vsub.f32 %v10018_v31, %v11216_v44  ;;  %v10082_v55 = vsub.f32 %v473_v16, %v10062_v29  ;;  %v697_v44 = vld [vmem:[%s11076_s2 + $0x730] sm:$0xff] }
 0x2d4   : > { %4666 = vmatmul.f32.vlgmr.msra.gmra.mxu0 %v11478_v53  ;;  %4968 = vmatpush.msrb.mxu2 %v9902_v36  ;;  %v3684_v8 = vadd.f32 %v3683_v30, %v3645_v52  ;;  %v4931_v16 = vsub.f32 %v10048_v58, %v11214_v22  ;;  %v681_v0 = vld [vmem:[%s11076_s2 + $0x6b0] sm:$0xff] }
 0x2d5   : > { %4816 = vmatpush.msrb.mxu0 %v9840_v3  ;;  %5016 = vmatpush.msrb.mxu3 %v9863_v48  ;;  %v10072_v40 = vsub.f32 %v481_v43, %v10050_v28  ;;  %v4914_v6 = vand.u32 4294901760, %v4913_v49  ;;  %11479 = vst [vmem:[#allocation8_spill] sm:$0xff] %v10082_v55  ;;  %v4920_v47 = vand.u32 4294901760, %v4919_v45  ;;  %v4926_v49 = vand.u32 4294901760, %v4925_v50 }
 0x2d6   : > { %4891 = vmatpush.msrb.mxu1 %v4890_v57  ;;  %4971 = vmatpush.msrb.mxu2 %v9916_v9  ;;  %v11213_v57 = vand.u32 4294901760, %v10060_v42  ;;  %v3752_v43 = vpop.f32.mrf.mxu0  ;;  %v11217_v45 = vand.u32 4294901760, %v10082_v55  ;;  %v4932_v50 = vand.u32 4294901760, %v4931_v16 }
 0x2d7   : > { %4818 = vmatpush.msrb.mxu0 %v9850_v24  ;;  %5018 = vmatpush.msrb.mxu3 %v9876_v14  ;;  %v3753_v52 = vadd.f32 %v3752_v43, %v3684_v8  ;;  %v10112_v43 = vand.u32 4294901760, %v713_v21  ;;  %v705_v8 = vld [vmem:[%s11076_s2 + $0x770] sm:$0xff] }
 0x2d8   : > { %4897 = vmatpush.msrb.mxu1 %v4896_v12  ;;  %4974 = vmatpush.msrb.mxu2 %v9939_v38  ;;  %v721_v12 = vld [vmem:[%s11076_s2 + $0x7f0] sm:$0xff]  ;;  %v4949_v16 = vsub.f32 %v10082_v55, %v11217_v45  ;;  %v10142_v45 = vand.u32 4294901760, %v697_v44 }
 0x2d9   : > { %4820 = vmatpush.msrb.mxu0 %v9863_v48  ;;  %5020 = vmatpush.msrb.mxu3 %v9887_v26  ;;  %v10104_v30 = vand.u32 4294901760, %v721_v12 }
 0x2da   : > { %4903 = vmatpush.msrb.mxu1 %v4902_v5  ;;  %4977 = vmatpush.msrb.mxu2 %v9950_v62  ;;  %v11215_v5 = vand.u32 4294901760, %v10072_v40  ;;  %v10166_v1 = vsub.f32 %v697_v44, %v10142_v45 }
 0x2db   : > { %4822 = vmatpush.msrb.mxu0 %v9876_v14  ;;  %5022 = vmatpush.msrb.mxu3 %v9907_v51 }
 0x2dc   : > { %4909 = vmatpush.msrb.mxu1 %v4908_v17  ;;  %4980 = vmatpush.msrb.mxu2 %v9973_v37  ;;  %v4937_v17 = vsub.f32 %v10060_v42, %v11213_v57  ;;  %v3789_v57 = vpop.f32.mrf.mxu1 }
 0x2dd   : > { %4824 = vmatpush.msrb.mxu0 %v9887_v26  ;;  %5024 = vmatpush.msrb.mxu3 %v9918_v2  ;;  %v3790_v22 = vadd.f32 %v3789_v57, %v3753_v52  ;;  %v10131_v57 = vand.u32 4294901760, %v705_v8 }
 0x2de   : > { %4915 = vmatpush.msrb.mxu1 %v4914_v6  ;;  %4983 = vmatpush.msrb.mxu2 %v9988_v60  ;;  %v4943_v6 = vsub.f32 %v10072_v40, %v11215_v5  ;;  %v10124_v5 = vsub.f32 %v721_v12, %v10104_v30  ;;  %v10138_v12 = vsub.f32 %v713_v21, %v10112_v43 }
 0x2df   : > { %4826 = vmatpush.msrb.mxu0 %v9907_v51  ;;  %5026 = vmatpush.msrb.mxu3 %v9941_v18  ;;  %v10154_v4 = vsub.f32 %v705_v8, %v10131_v57 }
 0x2e0   : > { %4921 = vmatpush.msrb.mxu1 %v4920_v47  ;;  %4986 = vmatpush.msrb.mxu2 %v10005_v25  ;;  %v4938_v47 = vand.u32 4294901760, %v4937_v17  ;;  %v4944_v52 = vand.u32 4294901760, %v4943_v6  ;;  %v3830_v17 = vpop.f32.mrf.mxu2  ;;  %v11224_v6 = vand.u32 4294901760, %v10124_v5 }
 0x2e1   : > { %4828 = vmatpush.msrb.mxu0 %v9918_v2  ;;  %5028 = vmatpush.msrb.mxu3 %v9958_v35  ;;  %v3831_v39 = vadd.f32 %v3830_v17, %v3790_v22  ;;  %11480 = vst [vmem:[#allocation7_spill] sm:$0xff] %v10154_v4  ;;  %v11229_v22 = vand.u32 4294901760, %v10138_v12  ;;  %v3931_v17 = vpop.f32.mrf.mxu3 }
 0x2e2   : > { %4927 = vmatpush.msrb.mxu1 %v4926_v49  ;;  %4989 = vmatpush.msrb.mxu2 %v10018_v31  ;;  %v689_v49 = vld [vmem:[%s11076_s2 + $0x6f0] sm:$0xff] }
 0x2e3   : > { %4830 = vmatpush.msrb.mxu0 %v9941_v18  ;;  %5030 = vmatpush.msrb.mxu3 %v9975_v10  ;;  %v10149_v21 = vand.u32 4294901760, %v689_v49  ;;  %v3932_v8 = vadd.f32 %v3931_v17, %v3831_v39  ;;  %v649_v39 = vld [vmem:[%s11076_s2 + $0x5b0] sm:$0xff] }
 0x2e4   : > { %4933 = vmatpush.msrb.mxu1 %v4932_v50  ;;  %4992 = vmatpush.msrb.mxu2 %v10024_v32  ;;  %v4950_v50 = vand.u32 4294901760, %v4949_v16  ;;  %v673_v16 = vld [vmem:[%s11076_s2 + $0x670] sm:$0xff]  ;;  %v4024_v46 = vpop.f32.mrf.mxu1 }
 0x2e5   : > { %4832 = vmatpush.msrb.mxu0 %v9958_v35  ;;  %5032 = vmatpush.msrb.mxu3 %v9990_v33  ;;  %v10173_v41 = vsub.f32 %v689_v49, %v10149_v21  ;;  %v5206_v49 = vsub.f32 %v10138_v12, %v11229_v22  ;;  %v11482_v22 = vld [vmem:[#allocation2_spill] sm:$0xff] }
 0x2e6   : > { %4939 = vmatpush.msrb.mxu1 %v4938_v47  ;;  %4995 = vmatpush.msrb.mxu2 %v10048_v58  ;;  %v10158_v47 = vand.u32 4294901760, %v681_v0 }
 0x2e7   : > { %4834 = vmatpush.msrb.mxu0 %v9975_v10  ;;  %5034 = vmatpush.msrb.mxu3 %v9993_v13 }
 0x2e8   : > { %4945 = vmatpush.msrb.mxu1 %v4944_v52  ;;  %4998 = vmatpush.msrb.mxu2 %v10060_v42  ;;  %v5200_v52 = vsub.f32 %v10124_v5, %v11224_v6  ;;  %v10189_v6 = vsub.f32 %v681_v0, %v10158_v47 }
 0x2e9   : > { %4836 = vmatpush.msrb.mxu0 %v9990_v33  ;;  %5036 = vmatpush.msrb.mxu3 %v10020_v19  ;;  %v4093_v53 = vpop.f32.mrf.mxu2 }
 0x2ea   : > { %4951 = vmatpush.msrb.mxu1 %v4950_v50  ;;  %5001 = vmatpush.msrb.mxu2 %v10072_v40  ;;  %v10181_v50 = vand.u32 4294901760, %v673_v16  ;;  %11481 = vst [vmem:[#allocation9_spill] sm:$0xff] %v10189_v6 }
 0x2eb   : > { %4838 = vmatpush.msrb.mxu0 %v9993_v13  ;;  %5038 = vmatpush.msrb.mxu3 %v10035_v63  ;;  %v3985_v44 = vpop.f32.mrf.mxu0 }
 0x2ec   : > { %4953 = vmatmul.f32.vlgmr.msrb.gmra.mxu1 %v6825_v59  ;;  %5004 = vmatpush.msrb.mxu2 %v10082_v55  ;;  %v3986_v17 = vadd.f32 %v3985_v44, %v3932_v8  ;;  %v5201_v8 = vand.u32 4294901760, %v5200_v52  ;;  %v10211_v27 = vsub.f32 %v673_v16, %v10181_v50  ;;  %v10213_v52 = vand.u32 4294901760, %v657_v7  ;;  %v641_v44 = vld [vmem:[%s11076_s2 + $0x570] sm:$0xff]  ;;  %v4130_v55 = vpop.f32.mrf.mxu3 }
 0x2ed   : > { %5120 = vmatpush.msra.mxu1 %v9840_v3  ;;  %4840 = vmatpush.msrb.mxu0 %v10020_v19  ;;  %v11483_v3 = vand.u32 4294901760, %v10154_v4  ;;  %v11485_v16 = vand.u32 4294901760, %v10166_v1 }
 0x2ee   : > { %5040 = vmatpush.msrb.mxu3 %v10050_v28  ;;  %5007 = vmatmul.f32.vlgmr.msrb.gmra.mxu2 %v11482_v22  ;;  %v4025_v0 = vadd.f32 %v4024_v46, %v3986_v17  ;;  %v5207_v46 = vand.u32 4294901760, %v5206_v49  ;;  %v11484_v22 = vld [vmem:[#allocation3_spill] sm:$0xff] }
 0x2ef   : > { %5122 = vmatpush.msra.mxu1 %v9850_v24  ;;  %5157 = vmatpush.msra.mxu2 %v10104_v30  ;;  %v5212_v34 = vsub.f32 %v10154_v4, %v11483_v3  ;;  %v5218_v3 = vsub.f32 %v10166_v1, %v11485_v16  ;;  %v10227_v4 = vsub.f32 %v665_v56, %v10197_v54  ;;  %v617_v16 = vld [vmem:[%s11076_s2 + $0x4b0] sm:$0xff] }
 0x2f0   : > { %4842 = vmatpush.msrb.mxu0 %v10035_v63  ;;  %5042 = vmatpush.msrb.mxu3 %v10062_v29  ;;  %v4094_v17 = vadd.f32 %v4093_v53, %v4025_v0  ;;  %v10229_v53 = vand.u32 4294901760, %v649_v39  ;;  %v11486_v0 = vand.u32 4294901760, %v10173_v41 }
 0x2f1   : > { %5046 = vmatmul.f32.vlgmr.msrb.gmra.mxu3 %v11484_v22  ;;  %5124 = vmatpush.msra.mxu1 %v9863_v48  ;;  %v633_v48 = vld [vmem:[%s11076_s2 + $0x530] sm:$0xff]  ;;  %v5213_v56 = vand.u32 4294901760, %v5212_v34  ;;  %v10242_v22 = vsub.f32 %v657_v7, %v10213_v52  ;;  %v5219_v34 = vand.u32 4294901760, %v5218_v3  ;;  %v10289_v3 = vand.u32 4294901760, %v617_v16 }
 0x2f2   : > { %5159 = vmatpush.msra.mxu2 %v10112_v43  ;;  %5202 = vmatpush.msra.mxu3 %v5201_v8  ;;  %v4131_v49 = vadd.f32 %v4130_v55, %v4094_v17  ;;  %v5224_v24 = vsub.f32 %v10173_v41, %v11486_v0  ;;  %v10244_v8 = vand.u32 4294901760, %v641_v44  ;;  %v11487_v55 = vand.u32 4294901760, %v10189_v6 }
 0x2f3   : > { %4844 = vmatpush.msrb.mxu0 %v10050_v28  ;;  %5126 = vmatpush.msra.mxu1 %v9876_v14  ;;  %v625_v14 = vld [vmem:[%s11076_s2 + $0x4f0] sm:$0xff]  ;;  %v10258_v0 = vsub.f32 %v649_v39, %v10229_v53 }
 0x2f4   : > { %5161 = vmatpush.msra.mxu2 %v10131_v57  ;;  %5208 = vmatpush.msra.mxu3 %v5207_v46  ;;  %6183 = vst [vmem:[%s7863_s4 + $0x20] sm:$0xff] %v4131_v49  ;;  %v5230_v17 = vsub.f32 %v10189_v6, %v11487_v55  ;;  %v10260_v46 = vand.u32 4294901760, %v633_v48  ;;  %v11488_v49 = vld [vmem:[#allocation4_spill] sm:$0xff]  ;;  %v5225_v55 = vand.u32 4294901760, %v5224_v24  ;;  %v11489_v6 = vand.u32 4294901760, %v9861_v15 }
 0x2f5   : > { %4846 = vmatpush.msrb.mxu0 %v10062_v29  ;;  %5128 = vmatpush.msra.mxu1 %v9887_v26  ;;  %v11490_v26 = vand.u32 4294901760, %v10211_v27  ;;  %v10274_v7 = vsub.f32 %v641_v44, %v10244_v8  ;;  %v11491_v15 = vand.u32 4294901760, %v9874_v61  ;;  %v11493_v61 = vand.u32 4294901760, %v9885_v20 }
 0x2f6   : > { %4852 = vmatmul.f32.vlgmr.msrb.gmra.mxu0 %v11488_v49  ;;  %5163 = vmatpush.msra.mxu2 %v10142_v45  ;;  %v10276_v49 = vand.u32 4294901760, %v625_v14  ;;  %v5231_v24 = vand.u32 4294901760, %v5230_v17  ;;  %v10287_v44 = vsub.f32 %v633_v48, %v10260_v46 }
 0x2f7   : > { %5053 = vmatpush.msra.mxu0 %v11489_v6  ;;  %5214 = vmatpush.msra.mxu3 %v5213_v56  ;;  %v5236_v39 = vsub.f32 %v10211_v27, %v11490_v26  ;;  %v11492_v6 = vand.u32 4294901760, %v10227_v4  ;;  %v5253_v26 = vand.u32 4294901760, %v10258_v0 }
 0x2f8   : > { %5130 = vmatpush.msra.mxu1 %v9907_v51  ;;  %5165 = vmatpush.msra.mxu2 %v10149_v21  ;;  %v609_v51 = vld [vmem:[%s11076_s2 + $0x470] sm:$0xff] }
 0x2f9   : > { %5057 = vmatpush.msra.mxu0 %v11491_v15  ;;  %5220 = vmatpush.msra.mxu3 %v5219_v34  ;;  %v5242_v56 = vsub.f32 %v10227_v4, %v11492_v6  ;;  %v5237_v17 = vand.u32 4294901760, %v5236_v39  ;;  %v11494_v34 = vand.u32 4294901760, %v10242_v22  ;;  %v5259_v15 = vand.u32 4294901760, %v10274_v7 }
 0x2fa   : > { %5132 = vmatpush.msra.mxu1 %v9918_v2  ;;  %5167 = vmatpush.msra.mxu2 %v10158_v47  ;;  %v10303_v6 = vsub.f32 %v625_v14, %v10276_v49  ;;  %v601_v2 = vld [vmem:[%s11076_s2 + $0x430] sm:$0xff]  ;;  %v10310_v20 = vand.u32 4294901760, %v609_v51  ;;  %v5254_v14 = vsub.f32 %v10258_v0, %v5253_v26 }
 0x2fb   : > { %5061 = vmatpush.msra.mxu0 %v11493_v61  ;;  %5226 = vmatpush.msra.mxu3 %v5225_v55  ;;  %v5248_v48 = vsub.f32 %v10242_v22, %v11494_v34  ;;  %v11495_v55 = vand.u32 4294901760, %v9902_v36  ;;  %v5243_v39 = vand.u32 4294901760, %v5242_v56  ;;  %v5265_v61 = vand.u32 4294901760, %v10287_v44 }
 0x2fc   : > { %5134 = vmatpush.msra.mxu1 %v9941_v18  ;;  %5169 = vmatpush.msra.mxu2 %v10181_v50  ;;  %v10319_v34 = vsub.f32 %v617_v16, %v10289_v3  ;;  %v10323_v18 = vand.u32 4294901760, %v601_v2  ;;  %v11496_v36 = vand.u32 4294901760, %v9916_v9  ;;  %v5260_v56 = vsub.f32 %v10274_v7, %v5259_v15 }
 0x2fd   : > { %5065 = vmatpush.msra.mxu0 %v11495_v55  ;;  %5232 = vmatpush.msra.mxu3 %v5231_v24  ;;  %v5249_v24 = vand.u32 4294901760, %v5248_v48  ;;  %v5271_v55 = vand.u32 4294901760, %v10303_v6  ;;  %v11497_v16 = vand.u32 4294901760, %v9939_v38  ;;  %v5255_v9 = vand.u32 4294901760, %v5254_v14 }
 0x2fe   : > { %5136 = vmatpush.msra.mxu1 %v9958_v35  ;;  %5171 = vmatpush.msra.mxu2 %v10197_v54  ;;  %v10334_v35 = vsub.f32 %v609_v51, %v10310_v20  ;;  %v5277_v48 = vand.u32 4294901760, %v10319_v34  ;;  %v11498_v51 = vand.u32 4294901760, %v9950_v62  ;;  %v5261_v38 = vand.u32 4294901760, %v5260_v56 }
 0x2ff   : > { %5069 = vmatpush.msra.mxu0 %v11496_v36  ;;  %5238 = vmatpush.msra.mxu3 %v5237_v17  ;;  %v5266_v17 = vsub.f32 %v10287_v44, %v5265_v61  ;;  %v11499_v14 = vand.u32 4294901760, %v9973_v37  ;;  %v11501_v56 = vand.u32 4294901760, %v10005_v25 }
 0x300   : > { %5138 = vmatpush.msra.mxu1 %v9975_v10  ;;  %5173 = vmatpush.msra.mxu2 %v10213_v52  ;;  %v10345_v10 = vsub.f32 %v601_v2, %v10323_v18  ;;  %v5278_v62 = vsub.f32 %v10319_v34, %v5277_v48 }
 0x301   : > { %5073 = vmatpush.msra.mxu0 %v11497_v16  ;;  %5244 = vmatpush.msra.mxu3 %v5243_v39  ;;  %v5272_v39 = vsub.f32 %v10303_v6, %v5271_v55  ;;  %v5267_v2 = vand.u32 4294901760, %v5266_v17  ;;  %v11503_v16 = vand.u32 4294901760, %v10024_v32  ;;  %v11506_v32 = vand.u32 4294901760, %v10060_v42  ;;  %v11509_v17 = vld [vmem:[#allocation7_spill] sm:$0xff]  ;;  %v11511_v42 = vld [vmem:[#allocation8_spill] sm:$0xff] }
 0x302   : > { %5140 = vmatpush.msra.mxu1 %v9990_v33  ;;  %5175 = vmatpush.msra.mxu2 %v10229_v53  ;;  %v5283_v33 = vand.u32 4294901760, %v10334_v35  ;;  %v5289_v36 = vand.u32 4294901760, %v10345_v10 }
 0x303   : > { %5077 = vmatpush.msra.mxu0 %v11498_v51  ;;  %5250 = vmatpush.msra.mxu3 %v5249_v24  ;;  %v5273_v24 = vand.u32 4294901760, %v5272_v39  ;;  %v11510_v51 = vand.u32 4294901760, %v11509_v17  ;;  %v11513_v39 = vand.u32 4294901760, %v10166_v1 }
 0x304   : > { %5142 = vmatpush.msra.mxu1 %v9993_v13  ;;  %5177 = vmatpush.msra.mxu2 %v10244_v8  ;;  %v11500_v13 = vand.u32 4294901760, %v9988_v60  ;;  %v5284_v37 = vsub.f32 %v10334_v35, %v5283_v33  ;;  %v5290_v60 = vsub.f32 %v10345_v10, %v5289_v36 }
 0x305   : > { %5081 = vmatpush.msra.mxu0 %v11499_v14  ;;  %5256 = vmatpush.msra.mxu3 %v5255_v9  ;;  %v11507_v9 = vand.u32 4294901760, %v10138_v12 }
 0x306   : > { %5144 = vmatpush.msra.mxu1 %v10020_v19  ;;  %5179 = vmatpush.msra.mxu2 %v10260_v46  ;;  %v5279_v19 = vand.u32 4294901760, %v5278_v62  ;;  %v5285_v25 = vand.u32 4294901760, %v5284_v37  ;;  %v570_v62 = vld [vmem:[%s11076_s2 + $0x338] sm:$0xff] }
 0x307   : > { %5085 = vmatpush.msra.mxu0 %v11500_v13  ;;  %5262 = vmatpush.msra.mxu3 %v5261_v38  ;;  %v11512_v38 = vand.u32 4294901760, %v11511_v42 }
 0x308   : > { %5146 = vmatpush.msra.mxu1 %v10035_v63  ;;  %5181 = vmatpush.msra.mxu2 %v10276_v49  ;;  %v11502_v63 = vand.u32 4294901760, %v10018_v31  ;;  %v11504_v31 = vand.u32 4294901760, %v10048_v58  ;;  %v11508_v58 = vand.u32 4294901760, %v10072_v40  ;;  %v11514_v40 = vand.u32 4294901760, %v10173_v41 }
 0x309   : > { %5089 = vmatpush.msra.mxu0 %v11501_v56  ;;  %5268 = vmatpush.msra.mxu3 %v5267_v2 }
 0x30a   : > { %5148 = vmatpush.msra.mxu1 %v10050_v28  ;;  %5183 = vmatpush.msra.mxu2 %v10289_v3  ;;  %v5291_v28 = vand.u32 4294901760, %v5290_v60 }
 0x30b   : > { %5093 = vmatpush.msra.mxu0 %v11502_v63  ;;  %5274 = vmatpush.msra.mxu3 %v5273_v24  ;;  %v562_v24 = vld [vmem:[%s11076_s2 + $0x2f8] sm:$0xff] }
 0x30c   : > { %5150 = vmatpush.msra.mxu1 %v10062_v29  ;;  %5185 = vmatpush.msra.mxu2 %v10310_v20  ;;  %v11505_v29 = vand.u32 4294901760, %v10124_v5 }
 0x30d   : > { %5097 = vmatpush.msra.mxu0 %v11503_v16  ;;  %5280 = vmatpush.msra.mxu3 %v5279_v19  ;;  %v554_v19 = vld [vmem:[%s11076_s2 + $0x2b8] sm:$0xff] }
 0x30e   : > { %5152 = vmatmul.f32.vlgmr.msra.gmra.mxu1 %v6825_v59  ;;  %5187 = vmatpush.msra.mxu2 %v10323_v18  ;;  %v10496_v60 = vand.u32 4294901760, %v554_v19 }
 0x30f   : > { %5353 = vmatpush.msrb.mxu1 %v10104_v30  ;;  %5101 = vmatpush.msra.mxu0 %v11504_v31 }
 0x310   : > { %5286 = vmatpush.msra.mxu3 %v5285_v25  ;;  %5193 = vmatmul.f32.vlgmr.msra.gmra.mxu2 %v6898_v11  ;;  %v530_v25 = vld [vmem:[%s11076_s2 + $0x1f8] sm:$0xff] }
 0x311   : > { %5355 = vmatpush.msrb.mxu1 %v10112_v43  ;;  %5394 = vmatpush.msrb.mxu2 %v11505_v29 }
 0x312   : > { %5105 = vmatpush.msra.mxu0 %v11506_v32  ;;  %5292 = vmatpush.msra.mxu3 %v5291_v28  ;;  %v514_v32 = vld [vmem:[%s11076_s2 + $0x178] sm:$0xff] }
 0x313   : > { %5294 = vmatmul.f32.vlgmr.msra.gmra.mxu3 %v6855_v23  ;;  %5357 = vmatpush.msrb.mxu1 %v10131_v57 }
 0x314   : > { %5398 = vmatpush.msrb.mxu2 %v11507_v9  ;;  %5461 = vmatpush.msrb.mxu3 %v10104_v30  ;;  %v594_v30 = vld [vmem:[%s11076_s2 + $0x3f8] sm:$0xff]  ;;  %v11520_v9 = vld [vmem:[#allocation6_spill] sm:$0xff] }
 0x315   : > { %5109 = vmatpush.msra.mxu0 %v11508_v58  ;;  %5359 = vmatpush.msrb.mxu1 %v10142_v45  ;;  %v506_v58 = vld [vmem:[%s11076_s2 + $0x138] sm:$0xff] }
 0x316   : > { %5402 = vmatpush.msrb.mxu2 %v11510_v51  ;;  %5463 = vmatpush.msrb.mxu3 %v10112_v43  ;;  %v11515_v43 = vld [vmem:[#allocation9_spill] sm:$0xff] }
 0x317   : > { %5113 = vmatpush.msra.mxu0 %v11512_v38  ;;  %5361 = vmatpush.msrb.mxu1 %v10149_v21  ;;  %v11516_v14 = vand.u32 4294901760, %v11515_v43  ;;  %v10579_v38 = vand.u32 4294901760, %v514_v32 }
 0x318   : > { %5115 = vmatmul.f32.vlgmr.msra.gmra.mxu0 %v6825_v59  ;;  %5406 = vmatpush.msrb.mxu2 %v11513_v39  ;;  %v10582_v39 = vand.u32 4294901760, %v506_v58 }
 0x319   : > { %5300 = vmatpush.msrb.mxu0 %v10124_v5  ;;  %5465 = vmatpush.msrb.mxu3 %v10131_v57  ;;  %v586_v5 = vld [vmem:[%s11076_s2 + $0x3b8] sm:$0xff]  ;;  %v10429_v57 = vand.u32 4294901760, %v594_v30 }
 0x31a   : > { %5363 = vmatpush.msrb.mxu1 %v10158_v47  ;;  %5410 = vmatpush.msrb.mxu2 %v11514_v40  ;;  %v10439_v2 = vand.u32 4294901760, %v586_v5  ;;  %v498_v40 = vld [vmem:[%s11076_s2 + $0xf8] sm:$0xff] }
 0x31b   : > { %5303 = vmatpush.msrb.mxu0 %v10138_v12  ;;  %5467 = vmatpush.msrb.mxu3 %v10142_v45  ;;  %v11517_v12 = vand.u32 4294901760, %v10211_v27  ;;  %v578_v45 = vld [vmem:[%s11076_s2 + $0x378] sm:$0xff]  ;;  %v10450_v13 = vsub.f32 %v594_v30, %v10429_v57 }
 0x31c   : > { %5365 = vmatpush.msrb.mxu1 %v10181_v50  ;;  %5414 = vmatpush.msrb.mxu2 %v11516_v14 }
 0x31d   : > { %5306 = vmatpush.msrb.mxu0 %v11509_v17  ;;  %5469 = vmatpush.msrb.mxu3 %v10149_v21  ;;  %v11518_v21 = vand.u32 4294901760, %v10227_v4  ;;  %v11251_v37 = vand.u32 4294901760, %v10450_v13 }
 0x31e   : > { %5367 = vmatpush.msrb.mxu1 %v10197_v54  ;;  %5418 = vmatpush.msrb.mxu2 %v11517_v12 }
 0x31f   : > { %5309 = vmatpush.msrb.mxu0 %v10166_v1  ;;  %5471 = vmatpush.msrb.mxu3 %v10158_v47  ;;  %v10452_v1 = vand.u32 4294901760, %v578_v45  ;;  %v11519_v47 = vand.u32 4294901760, %v10242_v22 }
 0x320   : > { %5369 = vmatpush.msrb.mxu1 %v10213_v52  ;;  %5422 = vmatpush.msrb.mxu2 %v11518_v21  ;;  %v10609_v21 = vand.u32 4294901760, %v498_v40 }
 0x321   : > { %5312 = vmatpush.msrb.mxu0 %v10173_v41  ;;  %5473 = vmatpush.msrb.mxu3 %v10181_v50  ;;  %v10463_v41 = vsub.f32 %v586_v5, %v10439_v2  ;;  %v10465_v50 = vand.u32 4294901760, %v570_v62  ;;  %v10474_v56 = vsub.f32 %v578_v45, %v10452_v1  ;;  %v10607_v45 = vsub.f32 %v514_v32, %v10579_v38  ;;  %v4326_v32 = vpop.f32.mrf.mxu2 }
 0x322   : > { %5371 = vmatpush.msrb.mxu1 %v10229_v53  ;;  %5426 = vmatpush.msrb.mxu2 %v11519_v47  ;;  %v482_v47 = vld [vmem:[%s11076_s2 + $0x78] sm:$0xff] }
 0x323   : > { %5315 = vmatpush.msrb.mxu0 %v11515_v43  ;;  %5475 = vmatpush.msrb.mxu3 %v10197_v54  ;;  %v10476_v54 = vand.u32 4294901760, %v562_v24 }
 0x324   : > { %5373 = vmatpush.msrb.mxu1 %v10244_v8  ;;  %5430 = vmatpush.msrb.mxu2 %v5253_v26  ;;  %v10491_v26 = vsub.f32 %v570_v62, %v10465_v50  ;;  %v10613_v62 = vsub.f32 %v506_v58, %v10582_v39 }
 0x325   : > { %5318 = vmatpush.msrb.mxu0 %v10211_v27  ;;  %5477 = vmatpush.msrb.mxu3 %v10213_v52  ;;  %v546_v27 = vld [vmem:[%s11076_s2 + $0x278] sm:$0xff]  ;;  %v11250_v52 = vand.u32 4294901760, %v10463_v41 }
 0x326   : > { %5375 = vmatpush.msrb.mxu1 %v10260_v46  ;;  %5434 = vmatpush.msrb.mxu2 %v5259_v15  ;;  %v10505_v15 = vsub.f32 %v562_v24, %v10476_v54  ;;  %v10507_v63 = vand.u32 4294901760, %v546_v27  ;;  %v4272_v24 = vpop.f32.mrf.mxu1 }
 0x327   : > { %5321 = vmatpush.msrb.mxu0 %v10227_v4  ;;  %5479 = vmatpush.msrb.mxu3 %v10229_v53  ;;  %v5541_v4 = vsub.f32 %v10450_v13, %v11251_v37  ;;  %v11249_v53 = vand.u32 4294901760, %v10474_v56 }
 0x328   : > { %5377 = vmatpush.msrb.mxu1 %v10276_v49  ;;  %5438 = vmatpush.msrb.mxu2 %v5265_v61  ;;  %v538_v61 = vld [vmem:[%s11076_s2 + $0x238] sm:$0xff]  ;;  %v11246_v28 = vand.u32 4294901760, %v10505_v15  ;;  %v10539_v31 = vsub.f32 %v546_v27, %v10507_v63 }
 0x329   : > { %5324 = vmatpush.msrb.mxu0 %v10242_v22  ;;  %5481 = vmatpush.msrb.mxu3 %v10244_v8  ;;  %v5547_v22 = vsub.f32 %v10463_v41, %v11250_v52  ;;  %v11248_v8 = vand.u32 4294901760, %v10491_v26  ;;  %v5553_v16 = vsub.f32 %v10474_v56, %v11249_v53 }
 0x32a   : > { %5379 = vmatpush.msrb.mxu1 %v10289_v3  ;;  %5442 = vmatpush.msrb.mxu2 %v5271_v55  ;;  %v10528_v55 = vsub.f32 %v554_v19, %v10496_v60  ;;  %v5565_v51 = vsub.f32 %v10505_v15, %v11246_v28  ;;  %v666_v28 = vld [vmem:[%s11076_s2 + $0x638] sm:$0xff] }
 0x32b   : > { %5327 = vmatpush.msrb.mxu0 %v10258_v0  ;;  %5483 = vmatpush.msrb.mxu3 %v10260_v46  ;;  %v10530_v0 = vand.u32 4294901760, %v538_v61  ;;  %v5542_v46 = vand.u32 4294901760, %v5541_v4  ;;  %v5559_v29 = vsub.f32 %v10491_v26, %v11248_v8  ;;  %v5554_v17 = vand.u32 4294901760, %v5553_v16  ;;  %v658_v8 = vld [vmem:[%s11076_s2 + $0x5f8] sm:$0xff] }
 0x32c   : > { %5381 = vmatpush.msrb.mxu1 %v10310_v20  ;;  %5446 = vmatpush.msrb.mxu2 %v5277_v48  ;;  %v522_v48 = vld [vmem:[%s11076_s2 + $0x1b8] sm:$0xff]  ;;  %v5566_v14 = vand.u32 4294901760, %v5565_v51  ;;  %v10786_v37 = vand.u32 4294901760, %v666_v28 }
 0x32d   : > { %5330 = vmatpush.msrb.mxu0 %v10274_v7  ;;  %5485 = vmatpush.msrb.mxu3 %v10276_v49  ;;  %v10547_v7 = vand.u32 4294901760, %v530_v25  ;;  %v5548_v49 = vand.u32 4294901760, %v5547_v22 }
 0x32e   : > { %5383 = vmatpush.msrb.mxu1 %v10323_v18  ;;  %5450 = vmatpush.msrb.mxu2 %v5283_v33  ;;  %v11245_v33 = vand.u32 4294901760, %v10528_v55 }
 0x32f   : > { %5333 = vmatpush.msrb.mxu0 %v10287_v44  ;;  %5487 = vmatpush.msrb.mxu3 %v10289_v3  ;;  %v10562_v44 = vsub.f32 %v538_v61, %v10530_v0  ;;  %v10564_v3 = vand.u32 4294901760, %v522_v48  ;;  %v10577_v42 = vsub.f32 %v530_v25, %v10547_v7  ;;  %v474_v25 = vld [vmem:[%s11076_s2 + $0x38] sm:$0xff] }
 0x330   : > { %5387 = vmatmul.f32.vlgmr.msrb.gmra.mxu1 %v11520_v9  ;;  %5454 = vmatpush.msrb.mxu2 %v5289_v36  ;;  %v11244_v36 = vand.u32 4294901760, %v10539_v31 }
 0x331   : > { %5543 = vmatpush.msra.mxu1 %v5542_v46  ;;  %5336 = vmatpush.msrb.mxu0 %v10303_v6  ;;  %v5560_v6 = vand.u32 4294901760, %v5559_v29  ;;  %v11243_v30 = vand.u32 4294901760, %v10562_v44  ;;  %v10594_v43 = vsub.f32 %v522_v48, %v10564_v3  ;;  %v11242_v12 = vand.u32 4294901760, %v10577_v42  ;;  %v11521_v46 = vld [vmem:[#allocation5_spill] sm:$0xff] }
 0x332   : > { %5489 = vmatpush.msrb.mxu3 %v10310_v20  ;;  %5456 = vmatmul.f32.vlgmr.msrb.gmra.mxu2 %v6855_v23  ;;  %v5571_v20 = vsub.f32 %v10528_v55, %v11245_v33  ;;  %v5577_v5 = vsub.f32 %v10539_v31, %v11244_v36  ;;  %v11239_v48 = vand.u32 4294901760, %v10607_v45  ;;  %v11235_v29 = vand.u32 4294901760, %v10613_v62 }
 0x333   : > { %5549 = vmatpush.msra.mxu1 %v5548_v49  ;;  %5641 = vmatpush.msra.mxu2 %v10450_v13  ;;  %v5583_v27 = vsub.f32 %v10562_v44, %v11243_v30  ;;  %v5589_v16 = vsub.f32 %v10577_v42, %v11242_v12  ;;  %v10637_v49 = vsub.f32 %v498_v40, %v10609_v21 }
 0x334   : > { %5339 = vmatpush.msrb.mxu0 %v10319_v34  ;;  %5491 = vmatpush.msrb.mxu3 %v10323_v18  ;;  %v490_v34 = vld [vmem:[%s11076_s2 + $0xb8] sm:$0xff]  ;;  %v4171_v18 = vpop.f32.mrf.mxu0  ;;  %v5572_v19 = vand.u32 4294901760, %v5571_v20  ;;  %v5578_v22 = vand.u32 4294901760, %v5577_v5 }
 0x335   : > { %5493 = vmatmul.f32.vlgmr.msrb.gmra.mxu3 %v6855_v23  ;;  %5555 = vmatpush.msra.mxu1 %v5554_v17  ;;  %v10624_v4 = vand.u32 4294901760, %v490_v34  ;;  %v4273_v61 = vadd.f32 %v4272_v24, %v4171_v18  ;;  %v5584_v58 = vand.u32 4294901760, %v5583_v27  ;;  %v5590_v20 = vand.u32 4294901760, %v5589_v16 }
 0x336   : > { %5644 = vmatpush.msra.mxu2 %v10463_v41  ;;  %5694 = vmatpush.msra.mxu3 %v10429_v57  ;;  %v11237_v5 = vand.u32 4294901760, %v10637_v49  ;;  %v5607_v18 = vsub.f32 %v10613_v62, %v11235_v29  ;;  %v714_v29 = vld [vmem:[%s11076_s2 + $0x7b8] sm:$0xff] }
 0x337   : > { %5342 = vmatpush.msrb.mxu0 %v10334_v35  ;;  %5561 = vmatpush.msra.mxu1 %v5560_v6  ;;  %v11241_v35 = vand.u32 4294901760, %v10594_v43  ;;  %v10649_v51 = vsub.f32 %v490_v34, %v10624_v4  ;;  %v10651_v6 = vand.u32 4294901760, %v474_v25  ;;  %v4327_v40 = vadd.f32 %v4326_v32, %v4273_v61  ;;  %v4365_v61 = vpop.f32.mrf.mxu3 }
 0x338   : > { %5647 = vmatpush.msra.mxu2 %v10474_v56  ;;  %5696 = vmatpush.msra.mxu3 %v10439_v2 }
 0x339   : > { %5345 = vmatpush.msrb.mxu0 %v10345_v10  ;;  %5567 = vmatpush.msra.mxu1 %v5566_v14  ;;  %v10639_v10 = vand.u32 4294901760, %v482_v47  ;;  %v5595_v17 = vsub.f32 %v10594_v43, %v11241_v35  ;;  %v5601_v14 = vsub.f32 %v10607_v45, %v11239_v48  ;;  %v10671_v27 = vsub.f32 %v474_v25, %v10651_v6  ;;  %v698_v48 = vld [vmem:[%s11076_s2 + $0x738] sm:$0xff] }
 0x33a   : > { %5348 = vmatmul.f32.vlgmr.msrb.gmra.mxu0 %v11521_v46  ;;  %5650 = vmatpush.msra.mxu2 %v10491_v26  ;;  %v4366_v16 = vadd.f32 %v4365_v61, %v4327_v40  ;;  %v5613_v25 = vsub.f32 %v10637_v49, %v11237_v5  ;;  %v682_v35 = vld [vmem:[%s11076_s2 + $0x6b8] sm:$0xff] }
 0x33b   : > { %5498 = vmatpush.msra.mxu0 %v10429_v57  ;;  %5698 = vmatpush.msra.mxu3 %v10452_v1  ;;  %v10661_v34 = vsub.f32 %v482_v47, %v10639_v10  ;;  %v5596_v24 = vand.u32 4294901760, %v5595_v17  ;;  %11522 = vst [vmem:[#allocation7_spill] sm:$0xff] %v10671_v27  ;;  %v5602_v32 = vand.u32 4294901760, %v5601_v14  ;;  %v5608_v17 = vand.u32 4294901760, %v5607_v18 }
 0x33c   : > { %5573 = vmatpush.msra.mxu1 %v5572_v19  ;;  %5653 = vmatpush.msra.mxu2 %v10505_v15  ;;  %v11236_v19 = vand.u32 4294901760, %v10649_v51  ;;  %v4434_v47 = vpop.f32.mrf.mxu0  ;;  %v11240_v14 = vand.u32 4294901760, %v10671_v27  ;;  %v5614_v18 = vand.u32 4294901760, %v5613_v25 }
 0x33d   : > { %5500 = vmatpush.msra.mxu0 %v10439_v2  ;;  %5700 = vmatpush.msra.mxu3 %v10465_v50  ;;  %v4435_v40 = vadd.f32 %v4434_v47, %v4366_v16  ;;  %v10701_v47 = vand.u32 4294901760, %v714_v29  ;;  %v706_v16 = vld [vmem:[%s11076_s2 + $0x778] sm:$0xff] }
 0x33e   : > { %5579 = vmatpush.msra.mxu1 %v5578_v22  ;;  %5656 = vmatpush.msra.mxu2 %v10528_v55  ;;  %v722_v22 = vld [vmem:[%s11076_s2 + $0x7f8] sm:$0xff]  ;;  %v5631_v25 = vsub.f32 %v10671_v27, %v11240_v14  ;;  %v10731_v14 = vand.u32 4294901760, %v698_v48 }
 0x33f   : > { %5502 = vmatpush.msra.mxu0 %v10452_v1  ;;  %5702 = vmatpush.msra.mxu3 %v10476_v54  ;;  %v10693_v61 = vand.u32 4294901760, %v722_v22 }
 0x340   : > { %5585 = vmatpush.msra.mxu1 %v5584_v58  ;;  %5659 = vmatpush.msra.mxu2 %v10539_v31  ;;  %v11238_v58 = vand.u32 4294901760, %v10661_v34  ;;  %v10755_v36 = vsub.f32 %v698_v48, %v10731_v14 }
 0x341   : > { %5504 = vmatpush.msra.mxu0 %v10465_v50  ;;  %5704 = vmatpush.msra.mxu3 %v10496_v60 }
 0x342   : > { %5591 = vmatpush.msra.mxu1 %v5590_v20  ;;  %5662 = vmatpush.msra.mxu2 %v10562_v44  ;;  %v5619_v20 = vsub.f32 %v10649_v51, %v11236_v19  ;;  %v4471_v19 = vpop.f32.mrf.mxu1 }
 0x343   : > { %5506 = vmatpush.msra.mxu0 %v10476_v54  ;;  %5706 = vmatpush.msra.mxu3 %v10507_v63  ;;  %v4472_v5 = vadd.f32 %v4471_v19, %v4435_v40  ;;  %v10720_v19 = vand.u32 4294901760, %v706_v16 }
 0x344   : > { %5597 = vmatpush.msra.mxu1 %v5596_v24  ;;  %5665 = vmatpush.msra.mxu2 %v10577_v42  ;;  %v5625_v24 = vsub.f32 %v10661_v34, %v11238_v58  ;;  %v10713_v58 = vsub.f32 %v722_v22, %v10693_v61  ;;  %v10727_v22 = vsub.f32 %v714_v29, %v10701_v47 }
 0x345   : > { %5508 = vmatpush.msra.mxu0 %v10496_v60  ;;  %5708 = vmatpush.msra.mxu3 %v10530_v0  ;;  %v10743_v30 = vsub.f32 %v706_v16, %v10720_v19 }
 0x346   : > { %5603 = vmatpush.msra.mxu1 %v5602_v32  ;;  %5668 = vmatpush.msra.mxu2 %v10594_v43  ;;  %v5620_v32 = vand.u32 4294901760, %v5619_v20  ;;  %v5626_v40 = vand.u32 4294901760, %v5625_v24  ;;  %v4512_v20 = vpop.f32.mrf.mxu2  ;;  %v11247_v24 = vand.u32 4294901760, %v10713_v58 }
 0x347   : > { %5510 = vmatpush.msra.mxu0 %v10507_v63  ;;  %5710 = vmatpush.msra.mxu3 %v10547_v7  ;;  %v4513_v12 = vadd.f32 %v4512_v20, %v4472_v5  ;;  %11523 = vst [vmem:[#allocation8_spill] sm:$0xff] %v10743_v30  ;;  %v11252_v5 = vand.u32 4294901760, %v10727_v22  ;;  %v4613_v20 = vpop.f32.mrf.mxu3 }
 0x348   : > { %5609 = vmatpush.msra.mxu1 %v5608_v17  ;;  %5671 = vmatpush.msra.mxu2 %v10607_v45  ;;  %v690_v17 = vld [vmem:[%s11076_s2 + $0x6f8] sm:$0xff] }
 0x349   : > { %5512 = vmatpush.msra.mxu0 %v10530_v0  ;;  %5712 = vmatpush.msra.mxu3 %v10564_v3  ;;  %v10738_v29 = vand.u32 4294901760, %v690_v17  ;;  %v4614_v16 = vadd.f32 %v4613_v20, %v4513_v12  ;;  %v650_v12 = vld [vmem:[%s11076_s2 + $0x5b8] sm:$0xff] }
 0x34a   : > { %5615 = vmatpush.msra.mxu1 %v5614_v18  ;;  %5674 = vmatpush.msra.mxu2 %v10613_v62  ;;  %v5632_v18 = vand.u32 4294901760, %v5631_v25  ;;  %v674_v25 = vld [vmem:[%s11076_s2 + $0x678] sm:$0xff]  ;;  %v4706_v53 = vpop.f32.mrf.mxu1 }
 0x34b   : > { %5514 = vmatpush.msra.mxu0 %v10547_v7  ;;  %5714 = vmatpush.msra.mxu3 %v10579_v38  ;;  %v10762_v33 = vsub.f32 %v690_v17, %v10738_v29  ;;  %v5888_v17 = vsub.f32 %v10727_v22, %v11252_v5  ;;  %v11525_v5 = vld [vmem:[#allocation2_spill] sm:$0xff] }
 0x34c   : > { %5621 = vmatpush.msra.mxu1 %v5620_v32  ;;  %5677 = vmatpush.msra.mxu2 %v10637_v49  ;;  %v10747_v32 = vand.u32 4294901760, %v682_v35 }
 0x34d   : > { %5516 = vmatpush.msra.mxu0 %v10564_v3  ;;  %5716 = vmatpush.msra.mxu3 %v10582_v39 }
 0x34e   : > { %5627 = vmatpush.msra.mxu1 %v5626_v40  ;;  %5680 = vmatpush.msra.mxu2 %v10649_v51  ;;  %v5882_v40 = vsub.f32 %v10713_v58, %v11247_v24  ;;  %v10778_v24 = vsub.f32 %v682_v35, %v10747_v32 }
 0x34f   : > { %5518 = vmatpush.msra.mxu0 %v10579_v38  ;;  %5718 = vmatpush.msra.mxu3 %v10609_v21  ;;  %v4775_v46 = vpop.f32.mrf.mxu2 }
 0x350   : > { %5633 = vmatpush.msra.mxu1 %v5632_v18  ;;  %5683 = vmatpush.msra.mxu2 %v10661_v34  ;;  %v10770_v18 = vand.u32 4294901760, %v674_v25  ;;  %11524 = vst [vmem:[#allocation9_spill] sm:$0xff] %v10778_v24 }
 0x351   : > { %5520 = vmatpush.msra.mxu0 %v10582_v39  ;;  %5720 = vmatpush.msra.mxu3 %v10624_v4  ;;  %v4667_v48 = vpop.f32.mrf.mxu0 }
 0x352   : > { %5635 = vmatmul.f32.vlgmr.msra.gmra.mxu1 %v6825_v59  ;;  %5686 = vmatpush.msra.mxu2 %v10671_v27  ;;  %v4668_v20 = vadd.f32 %v4667_v48, %v4614_v16  ;;  %v5883_v16 = vand.u32 4294901760, %v5882_v40  ;;  %v10800_v9 = vsub.f32 %v674_v25, %v10770_v18  ;;  %v11527_v48 = vld [vmem:[#allocation3_spill] sm:$0xff]  ;;  %v11528_v25 = vand.u32 4294901760, %v10755_v36  ;;  %v4812_v27 = vpop.f32.mrf.mxu3 }
 0x353   : > { %5802 = vmatpush.msrb.mxu1 %v10429_v57  ;;  %5522 = vmatpush.msra.mxu0 %v10609_v21  ;;  %v11526_v57 = vand.u32 4294901760, %v10743_v30 }
 0x354   : > { %5722 = vmatpush.msra.mxu3 %v10639_v10  ;;  %5689 = vmatmul.f32.vlgmr.msra.gmra.mxu2 %v11525_v5  ;;  %v4707_v35 = vadd.f32 %v4706_v53, %v4668_v20  ;;  %v10802_v5 = vand.u32 4294901760, %v658_v8  ;;  %v5889_v53 = vand.u32 4294901760, %v5888_v17  ;;  %v642_v20 = vld [vmem:[%s11076_s2 + $0x578] sm:$0xff] }
 0x355   : > { %5804 = vmatpush.msrb.mxu1 %v10439_v2  ;;  %5839 = vmatpush.msrb.mxu2 %v10693_v61  ;;  %v5894_v52 = vsub.f32 %v10743_v30, %v11526_v57  ;;  %v5900_v57 = vsub.f32 %v10755_v36, %v11528_v25  ;;  %v10816_v30 = vsub.f32 %v666_v28, %v10786_v37  ;;  %v618_v25 = vld [vmem:[%s11076_s2 + $0x4b8] sm:$0xff] }
 0x356   : > { %5524 = vmatpush.msra.mxu0 %v10624_v4  ;;  %5724 = vmatpush.msra.mxu3 %v10651_v6  ;;  %v4776_v40 = vadd.f32 %v4775_v46, %v4707_v35  ;;  %v10818_v46 = vand.u32 4294901760, %v650_v12  ;;  %v11529_v35 = vand.u32 4294901760, %v10762_v33  ;;  %v10831_v2 = vsub.f32 %v658_v8, %v10802_v5 }
 0x357   : > { %5728 = vmatmul.f32.vlgmr.msra.gmra.mxu3 %v11527_v48  ;;  %5806 = vmatpush.msrb.mxu1 %v10452_v1  ;;  %v634_v1 = vld [vmem:[%s11076_s2 + $0x538] sm:$0xff]  ;;  %v5895_v28 = vand.u32 4294901760, %v5894_v52  ;;  %v5901_v52 = vand.u32 4294901760, %v5900_v57  ;;  %v10878_v57 = vand.u32 4294901760, %v618_v25 }
 0x358   : > { %5841 = vmatpush.msrb.mxu2 %v10701_v47  ;;  %5884 = vmatpush.msrb.mxu3 %v5883_v16  ;;  %v4813_v17 = vadd.f32 %v4812_v27, %v4776_v40  ;;  %v5906_v48 = vsub.f32 %v10762_v33, %v11529_v35  ;;  %v10833_v16 = vand.u32 4294901760, %v642_v20  ;;  %v11530_v27 = vand.u32 4294901760, %v10778_v24 }
 0x359   : > { %5526 = vmatpush.msra.mxu0 %v10639_v10  ;;  %5808 = vmatpush.msrb.mxu1 %v10465_v50  ;;  %v626_v50 = vld [vmem:[%s11076_s2 + $0x4f8] sm:$0xff]  ;;  %v10847_v35 = vsub.f32 %v650_v12, %v10818_v46 }
 0x35a   : > { %5843 = vmatpush.msrb.mxu2 %v10720_v19  ;;  %5890 = vmatpush.msrb.mxu3 %v5889_v53  ;;  %6184 = vst [vmem:[%s7863_s4 + $0x28] sm:$0xff] %v4813_v17  ;;  %v5912_v40 = vsub.f32 %v10778_v24, %v11530_v27  ;;  %v10849_v53 = vand.u32 4294901760, %v634_v1  ;;  %v11531_v17 = vld [vmem:[#allocation4_spill] sm:$0xff]  ;;  %v5907_v27 = vand.u32 4294901760, %v5906_v48  ;;  %v11532_v24 = vand.u32 4294901760, %v10450_v13 }
 0x35b   : > { %5528 = vmatpush.msra.mxu0 %v10651_v6  ;;  %5810 = vmatpush.msrb.mxu1 %v10476_v54  ;;  %v11533_v54 = vand.u32 4294901760, %v10800_v9  ;;  %v10863_v8 = vsub.f32 %v642_v20, %v10833_v16  ;;  %v11534_v13 = vand.u32 4294901760, %v10463_v41  ;;  %v11536_v41 = vand.u32 4294901760, %v10474_v56 }
 0x35c   : > { %5534 = vmatmul.f32.vlgmr.msra.gmra.mxu0 %v11531_v17  ;;  %5845 = vmatpush.msrb.mxu2 %v10731_v14  ;;  %v10865_v17 = vand.u32 4294901760, %v626_v50  ;;  %v5913_v48 = vand.u32 4294901760, %v5912_v40  ;;  %v10876_v20 = vsub.f32 %v634_v1, %v10849_v53 }
 0x35d   : > { %5735 = vmatpush.msrb.mxu0 %v11532_v24  ;;  %5896 = vmatpush.msrb.mxu3 %v5895_v28  ;;  %v5918_v12 = vsub.f32 %v10800_v9, %v11533_v54  ;;  %v11535_v24 = vand.u32 4294901760, %v10816_v30  ;;  %v5935_v54 = vand.u32 4294901760, %v10847_v35 }
 0x35e   : > { %5812 = vmatpush.msrb.mxu1 %v10496_v60  ;;  %5847 = vmatpush.msrb.mxu2 %v10738_v29  ;;  %v610_v60 = vld [vmem:[%s11076_s2 + $0x478] sm:$0xff] }
 0x35f   : > { %5739 = vmatpush.msrb.mxu0 %v11534_v13  ;;  %5902 = vmatpush.msrb.mxu3 %v5901_v52  ;;  %v5924_v28 = vsub.f32 %v10816_v30, %v11535_v24  ;;  %v5919_v40 = vand.u32 4294901760, %v5918_v12  ;;  %v11537_v52 = vand.u32 4294901760, %v10831_v2  ;;  %v5941_v13 = vand.u32 4294901760, %v10863_v8 }
 0x360   : > { %5814 = vmatpush.msrb.mxu1 %v10507_v63  ;;  %5849 = vmatpush.msrb.mxu2 %v10747_v32  ;;  %v10892_v24 = vsub.f32 %v626_v50, %v10865_v17  ;;  %v602_v63 = vld [vmem:[%s11076_s2 + $0x438] sm:$0xff]  ;;  %v10899_v56 = vand.u32 4294901760, %v610_v60  ;;  %v5936_v50 = vsub.f32 %v10847_v35, %v5935_v54 }
 0x361   : > { %5743 = vmatpush.msrb.mxu0 %v11536_v41  ;;  %5908 = vmatpush.msrb.mxu3 %v5907_v27  ;;  %v5930_v1 = vsub.f32 %v10831_v2, %v11537_v52  ;;  %v11538_v27 = vand.u32 4294901760, %v10491_v26  ;;  %v5925_v12 = vand.u32 4294901760, %v5924_v28  ;;  %v5947_v41 = vand.u32 4294901760, %v10876_v20 }
 0x362   : > { %5816 = vmatpush.msrb.mxu1 %v10530_v0  ;;  %5851 = vmatpush.msrb.mxu2 %v10770_v18  ;;  %v10908_v52 = vsub.f32 %v618_v25, %v10878_v57  ;;  %v10912_v0 = vand.u32 4294901760, %v602_v63  ;;  %v11539_v26 = vand.u32 4294901760, %v10505_v15  ;;  %v5942_v28 = vsub.f32 %v10863_v8, %v5941_v13 }
 0x363   : > { %5747 = vmatpush.msrb.mxu0 %v11538_v27  ;;  %5914 = vmatpush.msrb.mxu3 %v5913_v48  ;;  %v5931_v48 = vand.u32 4294901760, %v5930_v1  ;;  %v5953_v27 = vand.u32 4294901760, %v10892_v24  ;;  %v11540_v25 = vand.u32 4294901760, %v10528_v55  ;;  %v5937_v15 = vand.u32 4294901760, %v5936_v50 }
 0x364   : > { %5818 = vmatpush.msrb.mxu1 %v10547_v7  ;;  %5853 = vmatpush.msrb.mxu2 %v10786_v37  ;;  %v10923_v7 = vsub.f32 %v610_v60, %v10899_v56  ;;  %v5959_v1 = vand.u32 4294901760, %v10908_v52  ;;  %v11541_v60 = vand.u32 4294901760, %v10539_v31  ;;  %v5943_v55 = vand.u32 4294901760, %v5942_v28 }
 0x365   : > { %5751 = vmatpush.msrb.mxu0 %v11539_v26  ;;  %5920 = vmatpush.msrb.mxu3 %v5919_v40  ;;  %v5948_v40 = vsub.f32 %v10876_v20, %v5947_v41  ;;  %v11542_v50 = vand.u32 4294901760, %v10562_v44  ;;  %v11544_v28 = vand.u32 4294901760, %v10594_v43 }
 0x366   : > { %5820 = vmatpush.msrb.mxu1 %v10564_v3  ;;  %5855 = vmatpush.msrb.mxu2 %v10802_v5  ;;  %v10934_v3 = vsub.f32 %v602_v63, %v10912_v0  ;;  %v5960_v31 = vsub.f32 %v10908_v52, %v5959_v1 }
 0x367   : > { %5755 = vmatpush.msrb.mxu0 %v11540_v25  ;;  %5926 = vmatpush.msrb.mxu3 %v5925_v12  ;;  %v5954_v12 = vsub.f32 %v10892_v24, %v5953_v27  ;;  %v5949_v63 = vand.u32 4294901760, %v5948_v40  ;;  %v11546_v25 = vand.u32 4294901760, %v10613_v62  ;;  %v11549_v62 = vand.u32 4294901760, %v10649_v51  ;;  %v11554_v51 = vld [vmem:[#allocation7_spill] sm:$0xff] }
 0x368   : > { %5822 = vmatpush.msrb.mxu1 %v10579_v38  ;;  %5857 = vmatpush.msrb.mxu2 %v10818_v46  ;;  %v5965_v38 = vand.u32 4294901760, %v10923_v7  ;;  %v5971_v26 = vand.u32 4294901760, %v10934_v3 }
 0x369   : > { %5759 = vmatpush.msrb.mxu0 %v11541_v60  ;;  %5932 = vmatpush.msrb.mxu3 %v5931_v48  ;;  %v5955_v48 = vand.u32 4294901760, %v5954_v12  ;;  %v11555_v60 = vand.u32 4294901760, %v11554_v51 }
 0x36a   : > { %5824 = vmatpush.msrb.mxu1 %v10582_v39  ;;  %5859 = vmatpush.msrb.mxu2 %v10833_v16  ;;  %v11543_v39 = vand.u32 4294901760, %v10577_v42  ;;  %v5966_v44 = vsub.f32 %v10923_v7, %v5965_v38  ;;  %v5972_v42 = vsub.f32 %v10934_v3, %v5971_v26 }
 0x36b   : > { %5763 = vmatpush.msrb.mxu0 %v11542_v50  ;;  %5938 = vmatpush.msrb.mxu3 %v5937_v15  ;;  %v11550_v15 = vand.u32 4294901760, %v10727_v22 }
 0x36c   : > { %5826 = vmatpush.msrb.mxu1 %v10609_v21  ;;  %5861 = vmatpush.msrb.mxu2 %v10849_v53  ;;  %v5961_v21 = vand.u32 4294901760, %v5960_v31  ;;  %v5967_v43 = vand.u32 4294901760, %v5966_v44 }
 0x36d   : > { %5767 = vmatpush.msrb.mxu0 %v11543_v39  ;;  %5944 = vmatpush.msrb.mxu3 %v5943_v55  ;;  %v11556_v55 = vand.u32 4294901760, %v10755_v36 }
 0x36e   : > { %5828 = vmatpush.msrb.mxu1 %v10624_v4  ;;  %5863 = vmatpush.msrb.mxu2 %v10865_v17  ;;  %v11545_v4 = vand.u32 4294901760, %v10607_v45  ;;  %v11547_v45 = vand.u32 4294901760, %v10637_v49  ;;  %v11552_v49 = vld [vmem:[#allocation8_spill] sm:$0xff] }
 0x36f   : > { %5771 = vmatpush.msrb.mxu0 %v11544_v28  ;;  %5950 = vmatpush.msrb.mxu3 %v5949_v63  ;;  %v11553_v40 = vand.u32 4294901760, %v11552_v49 }
 0x370   : > { %5830 = vmatpush.msrb.mxu1 %v10639_v10  ;;  %5865 = vmatpush.msrb.mxu2 %v10878_v57  ;;  %v5973_v10 = vand.u32 4294901760, %v5972_v42 }
 0x371   : > { %5775 = vmatpush.msrb.mxu0 %v11545_v4  ;;  %5956 = vmatpush.msrb.mxu3 %v5955_v48 }
 0x372   : > { %5832 = vmatpush.msrb.mxu1 %v10651_v6  ;;  %5867 = vmatpush.msrb.mxu2 %v10899_v56  ;;  %v11548_v6 = vand.u32 4294901760, %v10713_v58 }
 0x373   : > { %5779 = vmatpush.msrb.mxu0 %v11546_v25  ;;  %5962 = vmatpush.msrb.mxu3 %v5961_v21 }
 0x374   : > { %5834 = vmatmul.f32.vlgmr.msrb.gmra.mxu1 %v6825_v59  ;;  %5869 = vmatpush.msrb.mxu2 %v10912_v0 }
 0x375   : > { %6035 = vmatpush.msra.mxu1 %v10693_v61  ;;  %5783 = vmatpush.msrb.mxu0 %v11547_v45 }
 0x376   : > { %5968 = vmatpush.msrb.mxu3 %v5967_v43  ;;  %5875 = vmatmul.f32.vlgmr.msrb.gmra.mxu2 %v6898_v11  ;;  %v11551_v11 = vand.u32 4294901760, %v10661_v34  ;;  %v11557_v34 = vand.u32 4294901760, %v10762_v33 }
 0x377   : > { %6037 = vmatpush.msra.mxu1 %v10701_v47  ;;  %6076 = vmatpush.msra.mxu2 %v11548_v6 }
 0x378   : > { %5787 = vmatpush.msrb.mxu0 %v11549_v62  ;;  %5974 = vmatpush.msrb.mxu3 %v5973_v10 }
 0x379   : > { %5976 = vmatmul.f32.vlgmr.msrb.gmra.mxu3 %v6855_v23  ;;  %6039 = vmatpush.msra.mxu1 %v10720_v19 }
 0x37a   : > { %6080 = vmatpush.msra.mxu2 %v11550_v15  ;;  %6143 = vmatpush.msra.mxu3 %v10693_v61  ;;  %v11558_v61 = vld [vmem:[#allocation9_spill] sm:$0xff] }
 0x37b   : > { %5791 = vmatpush.msrb.mxu0 %v11551_v11  ;;  %6041 = vmatpush.msra.mxu1 %v10731_v14 }
 0x37c   : > { %6084 = vmatpush.msra.mxu2 %v11553_v40  ;;  %6145 = vmatpush.msra.mxu3 %v10701_v47  ;;  %v11562_v47 = vand.u32 4294901760, %v10831_v2 }
 0x37d   : > { %5795 = vmatpush.msrb.mxu0 %v11555_v60  ;;  %6043 = vmatpush.msra.mxu1 %v10738_v29 }
 0x37e   : > { %5797 = vmatmul.f32.vlgmr.msrb.gmra.mxu0 %v6825_v59  ;;  %6088 = vmatpush.msra.mxu2 %v11556_v55  ;;  %v11559_v59 = vand.u32 4294901760, %v11558_v61 }
 0x37f   : > { %5982 = vmatpush.msra.mxu0 %v10713_v58  ;;  %6147 = vmatpush.msra.mxu3 %v10720_v19  ;;  %v11560_v58 = vand.u32 4294901760, %v10800_v9  ;;  %v5008_v19 = vpop.f32.mrf.mxu2 }
 0x380   : > { %6045 = vmatpush.msra.mxu1 %v10747_v32  ;;  %6092 = vmatpush.msra.mxu2 %v11557_v34 }
 0x381   : > { %5985 = vmatpush.msra.mxu0 %v10727_v22  ;;  %6149 = vmatpush.msra.mxu3 %v10731_v14  ;;  %v11561_v14 = vand.u32 4294901760, %v10816_v30 }
 0x382   : > { %6047 = vmatpush.msra.mxu1 %v10770_v18  ;;  %6096 = vmatpush.msra.mxu2 %v11559_v59 }
 0x383   : > { %5988 = vmatpush.msra.mxu0 %v11552_v49  ;;  %6151 = vmatpush.msra.mxu3 %v10738_v29  ;;  %v5047_v29 = vpop.f32.mrf.mxu3 }
 0x384   : > { %6049 = vmatpush.msra.mxu1 %v10786_v37  ;;  %6100 = vmatpush.msra.mxu2 %v11560_v58 }
 0x385   : > { %5991 = vmatpush.msra.mxu0 %v10755_v36  ;;  %6153 = vmatpush.msra.mxu3 %v10747_v32  ;;  %v4954_v36 = vpop.f32.mrf.mxu1 }
 0x386   : > { %6051 = vmatpush.msra.mxu1 %v10802_v5  ;;  %6104 = vmatpush.msra.mxu2 %v11561_v14 }
 0x387   : > { %5994 = vmatpush.msra.mxu0 %v10762_v33  ;;  %6155 = vmatpush.msra.mxu3 %v10770_v18  ;;  %v11564_v33 = vld [vmem:[#allocation5_spill] sm:$0xff] }
 0x388   : > { %6053 = vmatpush.msra.mxu1 %v10818_v46  ;;  %6108 = vmatpush.msra.mxu2 %v11562_v47 }
 0x389   : > { %5997 = vmatpush.msra.mxu0 %v11558_v61  ;;  %6157 = vmatpush.msra.mxu3 %v10786_v37  ;;  %v11563_v37 = vld [vmem:[#allocation6_spill] sm:$0xff] }
 0x38a   : > { %6055 = vmatpush.msra.mxu1 %v10833_v16  ;;  %6112 = vmatpush.msra.mxu2 %v5935_v54 }
 0x38b   : > { %6000 = vmatpush.msra.mxu0 %v10800_v9  ;;  %6159 = vmatpush.msra.mxu3 %v10802_v5  ;;  %v4853_v9 = vpop.f32.mrf.mxu0 }
 0x38c   : > { %6057 = vmatpush.msra.mxu1 %v10849_v53  ;;  %6116 = vmatpush.msra.mxu2 %v5941_v13 }
 0x38d   : > { %6003 = vmatpush.msra.mxu0 %v10816_v30  ;;  %6161 = vmatpush.msra.mxu3 %v10818_v46  ;;  %v4955_v30 = vadd.f32 %v4954_v36, %v4853_v9 }
 0x38e   : > { %6059 = vmatpush.msra.mxu1 %v10865_v17  ;;  %6120 = vmatpush.msra.mxu2 %v5947_v41 }
 0x38f   : > { %6006 = vmatpush.msra.mxu0 %v10831_v2  ;;  %6163 = vmatpush.msra.mxu3 %v10833_v16  ;;  %v5009_v22 = vadd.f32 %v5008_v19, %v4955_v30  ;;  %v5153_v2 = vpop.f32.mrf.mxu1 }
 0x390   : > { %6061 = vmatpush.msra.mxu1 %v10878_v57  ;;  %6124 = vmatpush.msra.mxu2 %v5953_v27 }
 0x391   : > { %6009 = vmatpush.msra.mxu0 %v10847_v35  ;;  %6165 = vmatpush.msra.mxu3 %v10849_v53  ;;  %v5048_v18 = vadd.f32 %v5047_v29, %v5009_v22 }
 0x392   : > { %6063 = vmatpush.msra.mxu1 %v10899_v56  ;;  %6128 = vmatpush.msra.mxu2 %v5959_v1 }
 0x393   : > { %6012 = vmatpush.msra.mxu0 %v10863_v8  ;;  %6167 = vmatpush.msra.mxu3 %v10865_v17  ;;  %v5194_v16 = vpop.f32.mrf.mxu2 }
 0x394   : > { %6065 = vmatpush.msra.mxu1 %v10912_v0  ;;  %6132 = vmatpush.msra.mxu2 %v5965_v38 }
 0x395   : > { %6015 = vmatpush.msra.mxu0 %v10876_v20  ;;  %6169 = vmatpush.msra.mxu3 %v10878_v57  ;;  %v5116_v32 = vpop.f32.mrf.mxu0 }
 0x396   : > { %6069 = vmatmul.f32.vlgmr.msra.gmra.mxu1 %v11563_v37  ;;  %6136 = vmatpush.msra.mxu2 %v5971_v26  ;;  %v5117_v5 = vadd.f32 %v5116_v32, %v5048_v18  ;;  %v5295_v8 = vpop.f32.mrf.mxu3 }
 0x397   : > { %6018 = vmatpush.msra.mxu0 %v10892_v24  ;;  %6171 = vmatpush.msra.mxu3 %v10899_v56 }
 0x398   : > { %6138 = vmatmul.f32.vlgmr.msra.gmra.mxu2 %v6855_v23  ;;  %v5154_v46 = vadd.f32 %v5153_v2, %v5117_v5 }
 0x399   : > { %6021 = vmatpush.msra.mxu0 %v10908_v52  ;;  %6173 = vmatpush.msra.mxu3 %v10912_v0 }
 0x39a   : > { %6175 = vmatmul.f32.vlgmr.msra.gmra.mxu3 %v6855_v23  ;;  %v5195_v23 = vadd.f32 %v5194_v16, %v5154_v46 }
 0x39b   : > { %6024 = vmatpush.msra.mxu0 %v10923_v7 }
 0x39c   : > { %v5296_v35 = vadd.f32 %v5295_v8, %v5195_v23 }
 0x39d   : > { %6027 = vmatpush.msra.mxu0 %v10934_v3 }
 0x39e   : > { %6030 = vmatmul.f32.vlgmr.msra.gmra.mxu0 %v11564_v33 }
 0x3ad   : > { %v5388_v17 = vpop.f32.mrf.mxu1 }
 0x3b5   : > { %v5457_v20 = vpop.f32.mrf.mxu2 }
 0x3b7   : > { %v5349_v53 = vpop.f32.mrf.mxu0 }
 0x3b8   : > { %v5350_v57 = vadd.f32 %v5349_v53, %v5296_v35  ;;  %v5494_v24 = vpop.f32.mrf.mxu3 }
 0x3ba   : > { %v5389_v54 = vadd.f32 %v5388_v17, %v5350_v57 }
 0x3bc   : > { %v5458_v13 = vadd.f32 %v5457_v20, %v5389_v54 }
 0x3be   : > { %v5495_v56 = vadd.f32 %v5494_v24, %v5458_v13 }
 0x3c0   : > { %6185 = vst [vmem:[%s7863_s4 + $0x30] sm:$0xff] %v5495_v56 }
 0x3cf   : > { %v5636_v52 = vpop.f32.mrf.mxu1 }
 0x3d7   : > { %v5690_v27 = vpop.f32.mrf.mxu2 }
 0x3d9   : > { %v5535_v41 = vpop.f32.mrf.mxu0 }
 0x3da   : > { %v5637_v0 = vadd.f32 %v5636_v52, %v5535_v41  ;;  %v5729_v1 = vpop.f32.mrf.mxu3 }
 0x3dc   : > { %v5691_v7 = vadd.f32 %v5690_v27, %v5637_v0 }
 0x3de   : > { %v5730_v12 = vadd.f32 %v5729_v1, %v5691_v7 }
 0x3f1   : > { %v5835_v50 = vpop.f32.mrf.mxu1 }
 0x3f9   : > { %v5876_v31 = vpop.f32.mrf.mxu2 }
 0x3fb   : > { %v5798_v3 = vpop.f32.mrf.mxu0 }
 0x3fc   : > { %v5799_v38 = vadd.f32 %v5798_v3, %v5730_v12  ;;  %v5977_v39 = vpop.f32.mrf.mxu3 }
 0x3fe   : > { %v5836_v63 = vadd.f32 %v5835_v50, %v5799_v38 }
 0x400   : > { %v5877_v26 = vadd.f32 %v5876_v31, %v5836_v63 }
 0x402   : > { %v5978_v48 = vadd.f32 %v5977_v39, %v5877_v26 }
 0x413   : > { %v6070_v21 = vpop.f32.mrf.mxu1 }
 0x41b   : > { %v6031_v44 = vpop.f32.mrf.mxu0  ;;  %v6139_v4 = vpop.f32.mrf.mxu2 }
 0x41c   : > { %v6032_v28 = vadd.f32 %v6031_v44, %v5978_v48 }
 0x41d   : > { %v6176_v25 = vpop.f32.mrf.mxu3 }
 0x41e   : > { %v6071_v42 = vadd.f32 %v6070_v21, %v6032_v28 }
 0x420   : > { %v6140_v43 = vadd.f32 %v6139_v4, %v6071_v42 }
 0x422   : > { %v6177_v10 = vadd.f32 %v6176_v25, %v6140_v43 }
 0x424   : > { %6186 = vst [vmem:[%s7863_s4 + $0x38] sm:$0xff] %v6177_v10 }
 0x425 PF: > { %s13_s12 = sadd.s32 1, %s6267_s12  }
 0x426   : > { %p10_p4 = scmp.ge.s32.totalorder %s13_s12, 4  }
 0x428   :  { %12 = sbr.rel (!%p10_p4) target bundleno = 1 (0x1), region = 62 }

</bundles_post_ra>
